<compile_context>
chip_gen: v5e
topology: v5e:2x2
jax: 0.10.0
libtpu: 0.0.40
codegen_flags: <defaults>
</compile_context>

<pallas_src>
import numpy as np
import jax
import jax.numpy as jnp
from jax.experimental import pallas as pl
from jax.experimental.pallas import tpu as pltpu


# ---------------------------------------------------------------------------
# Static geometry (Python ints only)
# ---------------------------------------------------------------------------
def geometry(height, width, classes):
    g = {'H0': height, 'W0': width, 'C4': classes}
    g['SH'] = ((height + 7) // 8) * 8                     # per-image row stride
    g['H1'], g['W1'], g['C1'] = height - 2, width - 2, 12     # conv1
    g['P1h'], g['P1w'] = g['H1'] // 2, g['W1'] // 2
    g['H2'], g['W2'], g['C2'] = g['P1h'] - 2, g['P1w'] - 2, 16  # conv2
    g['P2h'], g['P2w'] = g['H2'] // 2, g['W2'] // 2
    g['H3'], g['W3'], g['C3'] = g['P2h'] - 2, g['P2w'] - 2, 32  # conv3
    g['P3h'], g['P3w'] = g['H3'] // 2, g['W3'] // 2
    g['H4'], g['W4'] = g['P3h'] + 2, g['P3w'] + 2             # conv4 (pad=2)
    g['N1'] = g['W1'] * g['C1']                               # 336
    g['N2'] = g['W2'] * g['C2']                               # 192
    g['N3'] = g['W3'] * g['C3']                               # 128
    g['N4'] = g['W4'] * classes                               # 40
    g['N4P'] = ((g['N4'] + 127) // 128) * 128                 # lane-dense output
    g['H4S'] = ((g['H4'] + 2 + 7) // 8) * 8                   # per-image out rows
    g['SBW'] = max(g['N1'], g['N2'], g['N3'], g['N4P'])
    return g


# ---------------------------------------------------------------------------
# One-time parameter preparation (hoisted out of the forward pass)
# ---------------------------------------------------------------------------
def _banded_cat(w, win_buf, gs, pw, n_pad=None):
    """w: (3,3,cin,cout) HWIO -> (3*win_buf*cin, n) dh-concatenated Toeplitz band.

    The input buffer has `win_buf` groups of `cin` lanes; logical (pooled) column
    c lives at buffer group c*gs (gs=2 for un-compacted max-pool outputs).
    Columns that fall into the padding (pw) get no entries (zero weights), which
    folds the spatial W-padding of conv4 into the band."""
    w = np.asarray(w, dtype=np.float32)
    kh, kw, cin, cout = w.shape
    win_log = -(-win_buf // gs)
    wout = win_log + 2 * pw - (kw - 1)
    n = wout * cout
    m = np.zeros((kh, win_buf * cin, n), np.float32)
    for dh in range(kh):
        for wo in range(wout):
            for dw in range(kw):
                wi = wo + dw - pw
                if 0 <= wi < win_log:
                    grp = wi * gs
                    m[dh, grp * cin:(grp + 1) * cin, wo * cout:(wo + 1) * cout] = w[dh, dw]
    m = m.reshape(kh * win_buf * cin, n)
    if n_pad is not None and n_pad > n:
        m = np.pad(m, ((0, 0), (0, n_pad - n)))
    return jnp.asarray(m, jnp.bfloat16)


def _tiled_sb(scale, shift, wo, width):
    s = jnp.tile(scale.astype(jnp.float32), wo)
    b = jnp.tile(shift.astype(jnp.float32), wo)
    return jnp.stack([jnp.pad(s, (0, width - s.shape[0])),
                      jnp.pad(b, (0, width - b.shape[0]))], 0)


def prepare_params(p, g):
    """Fold conv0 into conv1, build dh-concatenated (stride-2) bands, tile BN."""
    w0 = p['w0'][0, 0, 0, :]                                   # (3,)
    b0 = p['b0']                                               # (3,)
    w1 = p['w1']                                               # (3,3,3,12)
    w1f = jnp.einsum('c,hwco->hwo', w0, w1)[:, :, None, :]     # (3,3,1,12)
    bias1 = jnp.einsum('c,hwco->o', b0, w1)                    # (12,)
    sh1f = p['sh1'] + p['s1'] * bias1                          # conv0 bias through BN

    m1 = _banded_cat(w1f, g['W0'], 1, 0)                       # (90, 336)
    m2 = _banded_cat(p['w2'], g['W1'], 2, 0)                   # (1008, 192)
    m3 = _banded_cat(p['w3'], g['W2'], 2, 0)                   # (576, 128)
    m4 = _banded_cat(p['w4'], g['W3'], 2, 2, n_pad=g['N4P'])   # (384, 128)

    sb = jnp.stack([_tiled_sb(p['s1'], sh1f, g['W1'], g['SBW']),
                    _tiled_sb(p['s2'], p['sh2'], g['W2'], g['SBW']),
                    _tiled_sb(p['s3'], p['sh3'], g['W3'], g['SBW']),
                    _tiled_sb(p['s4'], p['sh4'], g['W4'], g['SBW'])], 0)
    return {'m1': m1, 'm2': m2, 'm3': m3, 'm4': m4, 'sb': sb}


# ---------------------------------------------------------------------------
# Fused kernel: conv1..conv4 (+ folded conv0, BN, Hswish) and the 2x2 pools
# ---------------------------------------------------------------------------
def _make_anet_kernel(g, bt):
    SH = g['SH']
    R = bt * SH                                   # activation rows per step
    H4S = g['H4S']
    R4 = bt * H4S                                 # conv4 output rows per step
    N1, N2, N3, N4P = g['N1'], g['N2'], g['N3'], g['N4P']
    C1, C2, C3 = g['C1'], g['C2'], g['C3']

    def conv_block(rows, read, s, m_ref, sb_ref, layer, n_out):
        """3x3 conv = ONE long-K matmul: LHS = [win(0) | win(s) | win(2s)],
        weight is the dh-concatenated band.  bf16 MXU operands, f32 acc."""
        lhs = jnp.concatenate([read(0, rows), read(s, rows), read(2 * s, rows)],
                              axis=1)
        acc = jnp.dot(lhs, m_ref[...], preferred_element_type=jnp.float32)
        y = acc * sb_ref[layer, 0:1, :n_out] + sb_ref[layer, 1:2, :n_out]
        return y * jnp.clip(y + 3.0, 0.0, 6.0) * (1.0 / 6.0)   # Hswish (f32)

    def pool_into(dst_ref, y, s, c, n):
        """2x2 max-pool without compaction.  Rows: shifted max (valid results at
        even multiples of 2*s within each image).  Cols: one lane-shifted max
        (valid results at even groups).  The next layer's stride-2 band ignores
        the in-between slots, so no narrow per-group stores are needed."""
        yb = y.astype(jnp.bfloat16)               # max is monotone -> exact
        rows = yb.shape[0] - s
        rm = jnp.maximum(yb[:rows], yb[s:])
        dst_ref[0:rows, 0:n - c] = jnp.maximum(rm[:, :n - c], rm[:, c:])

    def kernel(x_ref, m1_ref, m2_ref, m3_ref, m4_ref, sb_ref, o_ref,
               p1, p2, p3, x4):
        # Scratch persists across grid steps: zero once.  Every valid slot is
        # rewritten each step; only the pad border of x4 and the never-written
        # tails of p1..p3 rely on these zeros.
        @pl.when(pl.program_id(0) == 0)
        def _init():
            p1[...] = jnp.zeros((R, N1), jnp.bfloat16)
            p2[...] = jnp.zeros((R, N2), jnp.bfloat16)
            p3[...] = jnp.zeros((R, N3), jnp.bfloat16)
            x4[...] = jnp.zeros((R4 + 2, N4P), jnp.float32)

        # ---- conv1 (conv0 folded) + BN + Hswish + pool1 ---------------------
        y1 = conv_block(R - 2,
                        lambda d, r: x_ref[d:d + r, :].astype(jnp.bfloat16),
                        1, m1_ref, sb_ref, 0, N1)
        pool_into(p1, y1, 1, C1, N1)              # valid: rows 2p, groups 2q

        # ---- conv2 + BN + Hswish + pool2 (reads even groups/rows of p1) -----
        y2 = conv_block(R - 4, lambda d, r: p1[d:d + r, :],
                        2, m2_ref, sb_ref, 1, N2)
        pool_into(p2, y2, 2, C2, N2)              # valid: rows 4p, groups 2q

        # ---- conv3 + BN + Hswish + pool3 ------------------------------------
        y3 = conv_block(R - 8, lambda d, r: p2[d:d + r, :],
                        4, m3_ref, sb_ref, 2, N3)
        pool_into(p3, y3, 4, C3, N3)              # valid: rows 8p, groups 2q

        # ---- gather the 2x2 pooled patch into conv4's H-padded input --------
        # (W-padding is folded into m4's band; only the H pad is materialized.)
        # TODO(synk): replace with a strided pl.ds copy for very large tiles.
        for b in range(bt):
            for pp in range(2):
                x4[b * H4S + 2 + pp:b * H4S + 3 + pp, :] = \
                    p3[b * SH + 8 * pp:b * SH + 8 * pp + 1, :].astype(jnp.float32)

        # ---- conv4 (pad=2) + BN + Hswish; lane-dense (R4, 128) store --------
        o_ref[...] = conv_block(R4,
                                lambda d, r: x4[d:d + r, :].astype(jnp.bfloat16),
                                1, m4_ref, sb_ref, 3, N4P).astype(o_ref.dtype)

    return kernel


def a_net_forward(x_nchw, prep, g, b_tile=None):
    n = x_nchw.shape[0]
    if b_tile is None:
        b_tile = n                                 # whole batch per grid step
    assert n % b_tile == 0
    SH, H0, W0, H4S, N4P = g['SH'], g['H0'], g['W0'], g['H4S'], g['N4P']

    # Planar image, per-image row stride padded to SH (multiple of 8) so batch
    # stacks cleanly along the matmul M axis.
    xp = x_nchw[:, 0, :, :].astype(jnp.float32)
    xp = jnp.pad(xp, ((0, 0), (0, SH - H0), (0, 0))).reshape(n * SH, W0)
    R = b_tile * SH

    def full_spec(a):
        return pl.BlockSpec(a.shape, lambda i: (0,) * a.ndim)

    out = pl.pallas_call(
        _make_anet_kernel(g, b_tile),
        out_shape=jax.ShapeDtypeStruct((n * H4S, N4P), jnp.float32),
        grid=(n // b_tile,),
        in_specs=[
            pl.BlockSpec((R, W0), lambda i: (i, 0)),
            full_spec(prep['m1']), full_spec(prep['m2']),
            full_spec(prep['m3']), full_spec(prep['m4']),
            full_spec(prep['sb']),
        ],
        out_specs=pl.BlockSpec((b_tile * H4S, N4P), lambda i: (i, 0)),
        scratch_shapes=[
            pltpu.VMEM((R, g['N1']), jnp.bfloat16),                # pool1 (un-compacted)
            pltpu.VMEM((R, g['N2']), jnp.bfloat16),                # pool2
            pltpu.VMEM((R, g['N3']), jnp.bfloat16),                # pool3
            pltpu.VMEM((b_tile * g['H4S'] + 2, g['N4P']), jnp.float32),  # conv4 input (H pad)
        ],
        compiler_params=pltpu.CompilerParams(
            dimension_semantics=("parallel",)),    # batch tiles shard across TCs
    )(xp, prep['m1'], prep['m2'], prep['m3'], prep['m4'], prep['sb'])

    y = out.reshape(n, H4S, N4P)[:, :g['H4'], :g['N4']]
    y = y.reshape(n, g['H4'], g['W4'], g['C4'])
    return jnp.transpose(y, (0, 3, 1, 2))          # NHWC -> NCHW


# ---------------------------------------------------------------------------
# Parameters (deterministic, synthetic)
# ---------------------------------------------------------------------------
def init_params(key, classes):
    p = {}
    keys = jax.random.split(key, 6)
    # conv: Conv2d(1, 3, 1, 1, 0) with bias, no BN, no activation
    p['w0'] = 0.5 * jax.random.normal(keys[0], (1, 1, 1, 3), jnp.float32)
    p['b0'] = 0.1 * jax.random.normal(keys[1], (3,), jnp.float32)
    cfg = [(3, 12), (12, 16), (16, 32), (32, classes)]
    eps = 1e-5
    for li, (cin, cout) in enumerate(cfg, start=1):
        kw_, kg, kb, km, kv = jax.random.split(keys[1 + li], 5)
        w = jax.random.normal(kw_, (3, 3, cin, cout), jnp.float32) / jnp.sqrt(9.0 * cin)
        gamma = 1.0 + 0.1 * jax.random.normal(kg, (cout,), jnp.float32)
        beta = 0.1 * jax.random.normal(kb, (cout,), jnp.float32)
        mean = 0.1 * jax.random.normal(km, (cout,), jnp.float32)
        var = 0.5 + jax.random.uniform(kv, (cout,), jnp.float32)
        scale = gamma / jnp.sqrt(var + eps)        # fold BN (inference)
        shift = beta - mean * scale
        p[f'w{li}'], p[f's{li}'], p[f'sh{li}'] = w, scale, shift
    return p


# ---------------------------------------------------------------------------
# Pure-JAX reference (f32, HIGHEST precision) for the correctness check
# ---------------------------------------------------------------------------
def ref_forward(x_nchw, p):
    x = jnp.transpose(x_nchw, (0, 2, 3, 1)).astype(jnp.float32)

    def conv(v, w, pad):
        return jax.lax.conv_general_dilated(
            v, w, (1, 1), [(pad, pad), (pad, pad)],
            dimension_numbers=('NHWC', 'HWIO', 'NHWC'),
            precision=jax.lax.Precision.HIGHEST)

    def hswish(v):
        return v * jnp.clip(v + 3.0, 0.0, 6.0) / 6.0

    def pool(v):
        n, h, w, c = v.shape
        ho, wo = h // 2, w // 2
        return v[:, :2 * ho, :2 * wo, :].reshape(n, ho, 2, wo, 2, c).max(axis=(2, 4))

    y = conv(x, p['w0'], 0) + p['b0'][None, None, None, :]
    y = hswish(conv(y, p['w1'], 0) * p['s1'] + p['sh1'])
    y = pool(y)
    y = hswish(conv(y, p['w2'], 0) * p['s2'] + p['sh2'])
    y = pool(y)
    y = hswish(conv(y, p['w3'], 0) * p['s3'] + p['sh3'])
    y = pool(y)
    y = hswish(conv(y, p['w4'], 2) * p['s4'] + p['sh4'])
    return jnp.transpose(y, (0, 3, 1, 2))


if __name__ == "__main__":
    classes = 10
    key = jax.random.PRNGKey(0)
    kx, kp = jax.random.split(key)
    # PyTorch-style NCHW input: batch=2, 1 channel, 30x30 spatial
    x = jax.random.normal(kx, (2, 1, 30, 30), jnp.float32)
    params = init_params(kp, classes)

    g = geometry(30, 30, classes)
    prep = prepare_params(params, g)               # one-time weight prep (hoisted)

    fwd = jax.jit(lambda xin, pr: a_net_forward(xin, pr, g))
    out = jax.block_until_ready(fwd(x, prep))
    assert out.shape == (2, classes, 4, 4), out.shape

    ref = jax.block_until_ready(ref_forward(x, params))
    max_err = float(jnp.max(jnp.abs(out - ref)))
    # bf16 MXU operands / bf16 pooled activations through 4 conv layers.
    if max_err > 5e-2:
        raise AssertionError(f"Pallas output mismatch vs reference: {max_err}")

    print("KERNEL_OK")
</pallas_src>

<mosaic_0001>
module attributes {stable_mosaic.version = 11 : i64} {
  func.func @kernel(%arg0: i32, %arg1: memref<64x30xf32, #tpu.memory_space<vmem>>, %arg2: memref<90x336xbf16, #tpu.memory_space<vmem>>, %arg3: memref<1008x192xbf16, #tpu.memory_space<vmem>>, %arg4: memref<576x128xbf16, #tpu.memory_space<vmem>>, %arg5: memref<384x128xbf16, #tpu.memory_space<vmem>>, %arg6: memref<4x2x336xf32, #tpu.memory_space<vmem>>, %arg7: memref<16x128xf32, #tpu.memory_space<vmem>>, %arg8: memref<64x336xbf16, #tpu.memory_space<vmem>>, %arg9: memref<64x192xbf16, #tpu.memory_space<vmem>>, %arg10: memref<64x128xbf16, #tpu.memory_space<vmem>>, %arg11: memref<18x128xf32, #tpu.memory_space<vmem>>) attributes {dimension_semantics = [#tpu.dimension_semantics<parallel>], iteration_bounds = array<i64: 1>, scalar_prefetch = 0 : i64, scratch_operands = 4 : i64, tpu.core_type = #tpu.core_type<tc>, window_params = [{transform_indices = @transform_0, window_bounds = array<i64: 64, 30>}, {pipeline_mode = #tpu.pipeline_mode<synchronous>, transform_indices = @transform_1, window_bounds = array<i64: 90, 336>}, {pipeline_mode = #tpu.pipeline_mode<synchronous>, transform_indices = @transform_2, window_bounds = array<i64: 1008, 192>}, {pipeline_mode = #tpu.pipeline_mode<synchronous>, transform_indices = @transform_3, window_bounds = array<i64: 576, 128>}, {pipeline_mode = #tpu.pipeline_mode<synchronous>, transform_indices = @transform_4, window_bounds = array<i64: 384, 128>}, {pipeline_mode = #tpu.pipeline_mode<synchronous>, transform_indices = @transform_5, window_bounds = array<i64: 4, 2, 336>}, {transform_indices = @transform_6, window_bounds = array<i64: 16, 128>}]} {
    %c0_i32 = arith.constant 0 : i32
    %0 = arith.cmpi eq, %arg0, %c0_i32 : i32
    %1 = arith.extui %0 : i1 to i32
    %c0_i32_0 = arith.constant 0 : i32
    %2 = arith.cmpi ne, %1, %c0_i32_0 : i32
    scf.if %2 {
      %cst_90 = arith.constant 0.000000e+00 : bf16
      %138 = vector.broadcast %cst_90 : bf16 to vector<64x336xbf16>
      %c0_91 = arith.constant 0 : index
      %c0_92 = arith.constant 0 : index
      %139 = vector.load %arg8[%c0_91, %c0_92] : memref<64x336xbf16, #tpu.memory_space<vmem>>, vector<64x336xbf16>
      tpu.vector_store %arg8[%c0_91, %c0_92], %138 {strides = array<i32>} : memref<64x336xbf16, #tpu.memory_space<vmem>>, vector<64x336xbf16>,
      %cst_93 = arith.constant 0.000000e+00 : bf16
      %140 = vector.broadcast %cst_93 : bf16 to vector<64x192xbf16>
      %c0_94 = arith.constant 0 : index
      %c0_95 = arith.constant 0 : index
      %141 = vector.load %arg9[%c0_94, %c0_95] : memref<64x192xbf16, #tpu.memory_space<vmem>>, vector<64x192xbf16>
      tpu.vector_store %arg9[%c0_94, %c0_95], %140 {strides = array<i32>} : memref<64x192xbf16, #tpu.memory_space<vmem>>, vector<64x192xbf16>,
      %cst_96 = arith.constant 0.000000e+00 : bf16
      %142 = vector.broadcast %cst_96 : bf16 to vector<64x128xbf16>
      %c0_97 = arith.constant 0 : index
      %c0_98 = arith.constant 0 : index
      %143 = vector.load %arg10[%c0_97, %c0_98] : memref<64x128xbf16, #tpu.memory_space<vmem>>, vector<64x128xbf16>
      tpu.vector_store %arg10[%c0_97, %c0_98], %142 {strides = array<i32>} : memref<64x128xbf16, #tpu.memory_space<vmem>>, vector<64x128xbf16>,
      %cst_99 = arith.constant 0.000000e+00 : f32
      %144 = vector.broadcast %cst_99 : f32 to vector<18x128xf32>
      %c0_100 = arith.constant 0 : index
      %c0_101 = arith.constant 0 : index
      %145 = vector.load %arg11[%c0_100, %c0_101] : memref<18x128xf32, #tpu.memory_space<vmem>>, vector<18x128xf32>
      tpu.vector_store %arg11[%c0_100, %c0_101], %144 {strides = array<i32>} : memref<18x128xf32, #tpu.memory_space<vmem>>, vector<18x128xf32>,
    } else {
    }
    %c0 = arith.constant 0 : index
    %c0_1 = arith.constant 0 : index
    %3 = vector.load %arg1[%c0, %c0_1] : memref<64x30xf32, #tpu.memory_space<vmem>>, vector<62x30xf32>
    %4 = arith.truncf %3 : vector<62x30xf32> to vector<62x30xbf16>
    %c1 = arith.constant 1 : index
    %c0_2 = arith.constant 0 : index
    %5 = vector.load %arg1[%c1, %c0_2] : memref<64x30xf32, #tpu.memory_space<vmem>>, vector<62x30xf32>
    %6 = arith.truncf %5 : vector<62x30xf32> to vector<62x30xbf16>
    %c2 = arith.constant 2 : index
    %c0_3 = arith.constant 0 : index
    %7 = vector.load %arg1[%c2, %c0_3] : memref<64x30xf32, #tpu.memory_space<vmem>>, vector<62x30xf32>
    %8 = arith.truncf %7 : vector<62x30xf32> to vector<62x30xbf16>
    %9 = tpu.concatenate %4, %6, %8 in 1 : vector<62x30xbf16>, vector<62x30xbf16>, vector<62x30xbf16> -> vector<62x90xbf16>
    %c0_4 = arith.constant 0 : index
    %c0_5 = arith.constant 0 : index
    %10 = vector.load %arg2[%c0_4, %c0_5] : memref<90x336xbf16, #tpu.memory_space<vmem>>, vector<90x336xbf16>
    %cst = arith.constant dense<0.000000e+00> : vector<62x336xf32>
    %11 = tpu.matmul %9, %10, %cst {dimension_numbers = #tpu.dot_dimension_numbers<[1], [0], [0], [1], [0, 0, 1, 1], [], []>} : vector<62x90xbf16>, vector<90x336xbf16>, vector<62x336xf32> -> vector<62x336xf32>
    %c0_6 = arith.constant 0 : index
    %c0_7 = arith.constant 0 : index
    %c0_8 = arith.constant 0 : index
    %12 = vector.load %arg6[%c0_6, %c0_7, %c0_8] : memref<4x2x336xf32, #tpu.memory_space<vmem>>, vector<1x1x336xf32>
    %13 = vector.shape_cast %12 : vector<1x1x336xf32> to vector<1x336xf32>
    %14 = vector.broadcast %13 : vector<1x336xf32> to vector<62x336xf32>
    %15 = arith.mulf %11, %14 : vector<62x336xf32>
    %c0_9 = arith.constant 0 : index
    %c1_10 = arith.constant 1 : index
    %c0_11 = arith.constant 0 : index
    %16 = vector.load %arg6[%c0_9, %c1_10, %c0_11] : memref<4x2x336xf32, #tpu.memory_space<vmem>>, vector<1x1x336xf32>
    %17 = vector.shape_cast %16 : vector<1x1x336xf32> to vector<1x336xf32>
    %18 = vector.broadcast %17 : vector<1x336xf32> to vector<62x336xf32>
    %19 = arith.addf %15, %18 : vector<62x336xf32>
    %cst_12 = arith.constant 3.000000e+00 : f32
    %20 = vector.broadcast %cst_12 : f32 to vector<62x336xf32>
    %21 = arith.addf %19, %20 : vector<62x336xf32>
    %cst_13 = arith.constant 0.000000e+00 : f32
    %cst_14 = arith.constant 6.000000e+00 : f32
    %22 = vector.broadcast %cst_13 : f32 to vector<62x336xf32>
    %23 = arith.maximumf %22, %21 : vector<62x336xf32>
    %24 = vector.broadcast %cst_14 : f32 to vector<62x336xf32>
    %25 = arith.minimumf %24, %23 : vector<62x336xf32>
    %26 = arith.mulf %19, %25 : vector<62x336xf32>
    %cst_15 = arith.constant 0.166666672 : f32
    %27 = vector.broadcast %cst_15 : f32 to vector<62x336xf32>
    %28 = arith.mulf %26, %27 : vector<62x336xf32>
    %29 = arith.truncf %28 : vector<62x336xf32> to vector<62x336xbf16>
    %30 = vector.extract_strided_slice %29 {offsets = [0, 0], sizes = [61, 336], strides = [1, 1]} : vector<62x336xbf16> to vector<61x336xbf16>
    %31 = vector.extract_strided_slice %29 {offsets = [1, 0], sizes = [61, 336], strides = [1, 1]} : vector<62x336xbf16> to vector<61x336xbf16>
    %32 = arith.maximumf %30, %31 : vector<61x336xbf16>
    %33 = vector.extract_strided_slice %32 {offsets = [0, 0], sizes = [61, 324], strides = [1, 1]} : vector<61x336xbf16> to vector<61x324xbf16>
    %34 = vector.extract_strided_slice %32 {offsets = [0, 12], sizes = [61, 324], strides = [1, 1]} : vector<61x336xbf16> to vector<61x324xbf16>
    %35 = arith.maximumf %33, %34 : vector<61x324xbf16>
    %c0_16 = arith.constant 0 : index
    %c0_17 = arith.constant 0 : index
    %36 = vector.load %arg8[%c0_16, %c0_17] : memref<64x336xbf16, #tpu.memory_space<vmem>>, vector<61x324xbf16>
    tpu.vector_store %arg8[%c0_16, %c0_17], %35 {strides = array<i32>} : memref<64x336xbf16, #tpu.memory_space<vmem>>, vector<61x324xbf16>,
    %c0_18 = arith.constant 0 : index
    %c0_19 = arith.constant 0 : index
    %37 = vector.load %arg8[%c0_18, %c0_19] : memref<64x336xbf16, #tpu.memory_space<vmem>>, vector<60x336xbf16>
    %c2_20 = arith.constant 2 : index
    %c0_21 = arith.constant 0 : index
    %38 = vector.load %arg8[%c2_20, %c0_21] : memref<64x336xbf16, #tpu.memory_space<vmem>>, vector<60x336xbf16>
    %c4 = arith.constant 4 : index
    %c0_22 = arith.constant 0 : index
    %39 = vector.load %arg8[%c4, %c0_22] : memref<64x336xbf16, #tpu.memory_space<vmem>>, vector<60x336xbf16>
    %40 = tpu.concatenate %37, %38, %39 in 1 : vector<60x336xbf16>, vector<60x336xbf16>, vector<60x336xbf16> -> vector<60x1008xbf16>
    %c0_23 = arith.constant 0 : index
    %c0_24 = arith.constant 0 : index
    %41 = vector.load %arg3[%c0_23, %c0_24] : memref<1008x192xbf16, #tpu.memory_space<vmem>>, vector<1008x192xbf16>
    %cst_25 = arith.constant dense<0.000000e+00> : vector<60x192xf32>
    %42 = tpu.matmul %40, %41, %cst_25 {dimension_numbers = #tpu.dot_dimension_numbers<[1], [0], [0], [1], [0, 0, 1, 1], [], []>} : vector<60x1008xbf16>, vector<1008x192xbf16>, vector<60x192xf32> -> vector<60x192xf32>
    %c1_26 = arith.constant 1 : index
    %c0_27 = arith.constant 0 : index
    %c0_28 = arith.constant 0 : index
    %43 = vector.load %arg6[%c1_26, %c0_27, %c0_28] : memref<4x2x336xf32, #tpu.memory_space<vmem>>, vector<1x1x192xf32>
    %44 = vector.shape_cast %43 : vector<1x1x192xf32> to vector<1x192xf32>
    %45 = vector.broadcast %44 : vector<1x192xf32> to vector<60x192xf32>
    %46 = arith.mulf %42, %45 : vector<60x192xf32>
    %c1_29 = arith.constant 1 : index
    %c1_30 = arith.constant 1 : index
    %c0_31 = arith.constant 0 : index
    %47 = vector.load %arg6[%c1_29, %c1_30, %c0_31] : memref<4x2x336xf32, #tpu.memory_space<vmem>>, vector<1x1x192xf32>
    %48 = vector.shape_cast %47 : vector<1x1x192xf32> to vector<1x192xf32>
    %49 = vector.broadcast %48 : vector<1x192xf32> to vector<60x192xf32>
    %50 = arith.addf %46, %49 : vector<60x192xf32>
    %cst_32 = arith.constant 3.000000e+00 : f32
    %51 = vector.broadcast %cst_32 : f32 to vector<60x192xf32>
    %52 = arith.addf %50, %51 : vector<60x192xf32>
    %cst_33 = arith.constant 0.000000e+00 : f32
    %cst_34 = arith.constant 6.000000e+00 : f32
    %53 = vector.broadcast %cst_33 : f32 to vector<60x192xf32>
    %54 = arith.maximumf %53, %52 : vector<60x192xf32>
    %55 = vector.broadcast %cst_34 : f32 to vector<60x192xf32>
    %56 = arith.minimumf %55, %54 : vector<60x192xf32>
    %57 = arith.mulf %50, %56 : vector<60x192xf32>
    %cst_35 = arith.constant 0.166666672 : f32
    %58 = vector.broadcast %cst_35 : f32 to vector<60x192xf32>
    %59 = arith.mulf %57, %58 : vector<60x192xf32>
    %60 = arith.truncf %59 : vector<60x192xf32> to vector<60x192xbf16>
    %61 = vector.extract_strided_slice %60 {offsets = [0, 0], sizes = [58, 192], strides = [1, 1]} : vector<60x192xbf16> to vector<58x192xbf16>
    %62 = vector.extract_strided_slice %60 {offsets = [2, 0], sizes = [58, 192], strides = [1, 1]} : vector<60x192xbf16> to vector<58x192xbf16>
    %63 = arith.maximumf %61, %62 : vector<58x192xbf16>
    %64 = vector.extract_strided_slice %63 {offsets = [0, 0], sizes = [58, 176], strides = [1, 1]} : vector<58x192xbf16> to vector<58x176xbf16>
    %65 = vector.extract_strided_slice %63 {offsets = [0, 16], sizes = [58, 176], strides = [1, 1]} : vector<58x192xbf16> to vector<58x176xbf16>
    %66 = arith.maximumf %64, %65 : vector<58x176xbf16>
    %c0_36 = arith.constant 0 : index
    %c0_37 = arith.constant 0 : index
    %67 = vector.load %arg9[%c0_36, %c0_37] : memref<64x192xbf16, #tpu.memory_space<vmem>>, vector<58x176xbf16>
    tpu.vector_store %arg9[%c0_36, %c0_37], %66 {strides = array<i32>} : memref<64x192xbf16, #tpu.memory_space<vmem>>, vector<58x176xbf16>,
    %c0_38 = arith.constant 0 : index
    %c0_39 = arith.constant 0 : index
    %68 = vector.load %arg9[%c0_38, %c0_39] : memref<64x192xbf16, #tpu.memory_space<vmem>>, vector<56x192xbf16>
    %c4_40 = arith.constant 4 : index
    %c0_41 = arith.constant 0 : index
    %69 = vector.load %arg9[%c4_40, %c0_41] : memref<64x192xbf16, #tpu.memory_space<vmem>>, vector<56x192xbf16>
    %c8 = arith.constant 8 : index
    %c0_42 = arith.constant 0 : index
    %70 = vector.load %arg9[%c8, %c0_42] : memref<64x192xbf16, #tpu.memory_space<vmem>>, vector<56x192xbf16>
    %71 = tpu.concatenate %68, %69, %70 in 1 : vector<56x192xbf16>, vector<56x192xbf16>, vector<56x192xbf16> -> vector<56x576xbf16>
    %c0_43 = arith.constant 0 : index
    %c0_44 = arith.constant 0 : index
    %72 = vector.load %arg4[%c0_43, %c0_44] : memref<576x128xbf16, #tpu.memory_space<vmem>>, vector<576x128xbf16>
    %cst_45 = arith.constant dense<0.000000e+00> : vector<56x128xf32>
    %73 = tpu.matmul %71, %72, %cst_45 {dimension_numbers = #tpu.dot_dimension_numbers<[1], [0], [0], [1], [0, 0, 1, 1], [], []>} : vector<56x576xbf16>, vector<576x128xbf16>, vector<56x128xf32> -> vector<56x128xf32>
    %c2_46 = arith.constant 2 : index
    %c0_47 = arith.constant 0 : index
    %c0_48 = arith.constant 0 : index
    %74 = vector.load %arg6[%c2_46, %c0_47, %c0_48] : memref<4x2x336xf32, #tpu.memory_space<vmem>>, vector<1x1x128xf32>
    %75 = vector.shape_cast %74 : vector<1x1x128xf32> to vector<1x128xf32>
    %76 = vector.broadcast %75 : vector<1x128xf32> to vector<56x128xf32>
    %77 = arith.mulf %73, %76 : vector<56x128xf32>
    %c2_49 = arith.constant 2 : index
    %c1_50 = arith.constant 1 : index
    %c0_51 = arith.constant 0 : index
    %78 = vector.load %arg6[%c2_49, %c1_50, %c0_51] : memref<4x2x336xf32, #tpu.memory_space<vmem>>, vector<1x1x128xf32>
    %79 = vector.shape_cast %78 : vector<1x1x128xf32> to vector<1x128xf32>
    %80 = vector.broadcast %79 : vector<1x128xf32> to vector<56x128xf32>
    %81 = arith.addf %77, %80 : vector<56x128xf32>
    %cst_52 = arith.constant 3.000000e+00 : f32
    %82 = vector.broadcast %cst_52 : f32 to vector<56x128xf32>
    %83 = arith.addf %81, %82 : vector<56x128xf32>
    %cst_53 = arith.constant 0.000000e+00 : f32
    %cst_54 = arith.constant 6.000000e+00 : f32
    %84 = vector.broadcast %cst_53 : f32 to vector<56x128xf32>
    %85 = arith.maximumf %84, %83 : vector<56x128xf32>
    %86 = vector.broadcast %cst_54 : f32 to vector<56x128xf32>
    %87 = arith.minimumf %86, %85 : vector<56x128xf32>
    %88 = arith.mulf %81, %87 : vector<56x128xf32>
    %cst_55 = arith.constant 0.166666672 : f32
    %89 = vector.broadcast %cst_55 : f32 to vector<56x128xf32>
    %90 = arith.mulf %88, %89 : vector<56x128xf32>
    %91 = arith.truncf %90 : vector<56x128xf32> to vector<56x128xbf16>
    %92 = vector.extract_strided_slice %91 {offsets = [0, 0], sizes = [52, 128], strides = [1, 1]} : vector<56x128xbf16> to vector<52x128xbf16>
    %93 = vector.extract_strided_slice %91 {offsets = [4, 0], sizes = [52, 128], strides = [1, 1]} : vector<56x128xbf16> to vector<52x128xbf16>
    %94 = arith.maximumf %92, %93 : vector<52x128xbf16>
    %95 = vector.extract_strided_slice %94 {offsets = [0, 0], sizes = [52, 96], strides = [1, 1]} : vector<52x128xbf16> to vector<52x96xbf16>
    %96 = vector.extract_strided_slice %94 {offsets = [0, 32], sizes = [52, 96], strides = [1, 1]} : vector<52x128xbf16> to vector<52x96xbf16>
    %97 = arith.maximumf %95, %96 : vector<52x96xbf16>
    %c0_56 = arith.constant 0 : index
    %c0_57 = arith.constant 0 : index
    %98 = vector.load %arg10[%c0_56, %c0_57] : memref<64x128xbf16, #tpu.memory_space<vmem>>, vector<52x96xbf16>
    tpu.vector_store %arg10[%c0_56, %c0_57], %97 {strides = array<i32>} : memref<64x128xbf16, #tpu.memory_space<vmem>>, vector<52x96xbf16>,
    %c0_58 = arith.constant 0 : index
    %c0_59 = arith.constant 0 : index
    %99 = vector.load %arg10[%c0_58, %c0_59] : memref<64x128xbf16, #tpu.memory_space<vmem>>, vector<1x128xbf16>
    %100 = arith.extf %99 : vector<1x128xbf16> to vector<1x128xf32>
    %c2_60 = arith.constant 2 : index
    %c0_61 = arith.constant 0 : index
    %101 = vector.load %arg11[%c2_60, %c0_61] : memref<18x128xf32, #tpu.memory_space<vmem>>, vector<1x128xf32>
    tpu.vector_store %arg11[%c2_60, %c0_61], %100 {strides = array<i32>} : memref<18x128xf32, #tpu.memory_space<vmem>>, vector<1x128xf32>,
    %c8_62 = arith.constant 8 : index
    %c0_63 = arith.constant 0 : index
    %102 = vector.load %arg10[%c8_62, %c0_63] : memref<64x128xbf16, #tpu.memory_space<vmem>>, vector<1x128xbf16>
    %103 = arith.extf %102 : vector<1x128xbf16> to vector<1x128xf32>
    %c3 = arith.constant 3 : index
    %c0_64 = arith.constant 0 : index
    %104 = vector.load %arg11[%c3, %c0_64] : memref<18x128xf32, #tpu.memory_space<vmem>>, vector<1x128xf32>
    tpu.vector_store %arg11[%c3, %c0_64], %103 {strides = array<i32>} : memref<18x128xf32, #tpu.memory_space<vmem>>, vector<1x128xf32>,
    %c32 = arith.constant 32 : index
    %c0_65 = arith.constant 0 : index
    %105 = vector.load %arg10[%c32, %c0_65] : memref<64x128xbf16, #tpu.memory_space<vmem>>, vector<1x128xbf16>
    %106 = arith.extf %105 : vector<1x128xbf16> to vector<1x128xf32>
    %c10 = arith.constant 10 : index
    %c0_66 = arith.constant 0 : index
    %107 = vector.load %arg11[%c10, %c0_66] : memref<18x128xf32, #tpu.memory_space<vmem>>, vector<1x128xf32>
    tpu.vector_store %arg11[%c10, %c0_66], %106 {strides = array<i32>} : memref<18x128xf32, #tpu.memory_space<vmem>>, vector<1x128xf32>,
    %c40 = arith.constant 40 : index
    %c0_67 = arith.constant 0 : index
    %108 = vector.load %arg10[%c40, %c0_67] : memref<64x128xbf16, #tpu.memory_space<vmem>>, vector<1x128xbf16>
    %109 = arith.extf %108 : vector<1x128xbf16> to vector<1x128xf32>
    %c11 = arith.constant 11 : index
    %c0_68 = arith.constant 0 : index
    %110 = vector.load %arg11[%c11, %c0_68] : memref<18x128xf32, #tpu.memory_space<vmem>>, vector<1x128xf32>
    tpu.vector_store %arg11[%c11, %c0_68], %109 {strides = array<i32>} : memref<18x128xf32, #tpu.memory_space<vmem>>, vector<1x128xf32>,
    %c0_69 = arith.constant 0 : index
    %c0_70 = arith.constant 0 : index
    %111 = vector.load %arg11[%c0_69, %c0_70] : memref<18x128xf32, #tpu.memory_space<vmem>>, vector<16x128xf32>
    %112 = arith.truncf %111 : vector<16x128xf32> to vector<16x128xbf16>
    %c1_71 = arith.constant 1 : index
    %c0_72 = arith.constant 0 : index
    %113 = vector.load %arg11[%c1_71, %c0_72] : memref<18x128xf32, #tpu.memory_space<vmem>>, vector<16x128xf32>
    %114 = arith.truncf %113 : vector<16x128xf32> to vector<16x128xbf16>
    %c2_73 = arith.constant 2 : index
    %c0_74 = arith.constant 0 : index
    %115 = vector.load %arg11[%c2_73, %c0_74] : memref<18x128xf32, #tpu.memory_space<vmem>>, vector<16x128xf32>
    %116 = arith.truncf %115 : vector<16x128xf32> to vector<16x128xbf16>
    %117 = tpu.concatenate %112, %114, %116 in 1 : vector<16x128xbf16>, vector<16x128xbf16>, vector<16x128xbf16> -> vector<16x384xbf16>
    %c0_75 = arith.constant 0 : index
    %c0_76 = arith.constant 0 : index
    %118 = vector.load %arg5[%c0_75, %c0_76] : memref<384x128xbf16, #tpu.memory_space<vmem>>, vector<384x128xbf16>
    %cst_77 = arith.constant dense<0.000000e+00> : vector<16x128xf32>
    %119 = tpu.matmul %117, %118, %cst_77 {dimension_numbers = #tpu.dot_dimension_numbers<[1], [0], [0], [1], [0, 0, 1, 1], [], []>} : vector<16x384xbf16>, vector<384x128xbf16>, vector<16x128xf32> -> vector<16x128xf32>
    %c3_78 = arith.constant 3 : index
    %c0_79 = arith.constant 0 : index
    %c0_80 = arith.constant 0 : index
    %120 = vector.load %arg6[%c3_78, %c0_79, %c0_80] : memref<4x2x336xf32, #tpu.memory_space<vmem>>, vector<1x1x128xf32>
    %121 = vector.shape_cast %120 : vector<1x1x128xf32> to vector<1x128xf32>
    %122 = vector.broadcast %121 : vector<1x128xf32> to vector<16x128xf32>
    %123 = arith.mulf %119, %122 : vector<16x128xf32>
    %c3_81 = arith.constant 3 : index
    %c1_82 = arith.constant 1 : index
    %c0_83 = arith.constant 0 : index
    %124 = vector.load %arg6[%c3_81, %c1_82, %c0_83] : memref<4x2x336xf32, #tpu.memory_space<vmem>>, vector<1x1x128xf32>
    %125 = vector.shape_cast %124 : vector<1x1x128xf32> to vector<1x128xf32>
    %126 = vector.broadcast %125 : vector<1x128xf32> to vector<16x128xf32>
    %127 = arith.addf %123, %126 : vector<16x128xf32>
    %cst_84 = arith.constant 3.000000e+00 : f32
    %128 = vector.broadcast %cst_84 : f32 to vector<16x128xf32>
    %129 = arith.addf %127, %128 : vector<16x128xf32>
    %cst_85 = arith.constant 0.000000e+00 : f32
    %cst_86 = arith.constant 6.000000e+00 : f32
    %130 = vector.broadcast %cst_85 : f32 to vector<16x128xf32>
    %131 = arith.maximumf %130, %129 : vector<16x128xf32>
    %132 = vector.broadcast %cst_86 : f32 to vector<16x128xf32>
    %133 = arith.minimumf %132, %131 : vector<16x128xf32>
    %134 = arith.mulf %127, %133 : vector<16x128xf32>
    %cst_87 = arith.constant 0.166666672 : f32
    %135 = vector.broadcast %cst_87 : f32 to vector<16x128xf32>
    %136 = arith.mulf %134, %135 : vector<16x128xf32>
    %c0_88 = arith.constant 0 : index
    %c0_89 = arith.constant 0 : index
    %137 = vector.load %arg7[%c0_88, %c0_89] : memref<16x128xf32, #tpu.memory_space<vmem>>, vector<16x128xf32>
    tpu.vector_store %arg7[%c0_88, %c0_89], %136 {strides = array<i32>} : memref<16x128xf32, #tpu.memory_space<vmem>>, vector<16x128xf32>,
    return
  }
  func.func @transform_0(%arg0: i32) -> (i32, i32) {
    %c0_i32 = arith.constant 0 : i32
    %c0_i32_0 = arith.constant 0 : i32
    return %arg0, %c0_i32 : i32, i32
  }
  func.func @transform_1(%arg0: i32) -> (i32, i32) {
    %c0_i32 = arith.constant 0 : i32
    %c0_i32_0 = arith.constant 0 : i32
    %c0_i32_1 = arith.constant 0 : i32
    return %c0_i32, %c0_i32_0 : i32, i32
  }
  func.func @transform_2(%arg0: i32) -> (i32, i32) {
    %c0_i32 = arith.constant 0 : i32
    %c0_i32_0 = arith.constant 0 : i32
    %c0_i32_1 = arith.constant 0 : i32
    return %c0_i32, %c0_i32_0 : i32, i32
  }
  func.func @transform_3(%arg0: i32) -> (i32, i32) {
    %c0_i32 = arith.constant 0 : i32
    %c0_i32_0 = arith.constant 0 : i32
    %c0_i32_1 = arith.constant 0 : i32
    return %c0_i32, %c0_i32_0 : i32, i32
  }
  func.func @transform_4(%arg0: i32) -> (i32, i32) {
    %c0_i32 = arith.constant 0 : i32
    %c0_i32_0 = arith.constant 0 : i32
    %c0_i32_1 = arith.constant 0 : i32
    return %c0_i32, %c0_i32_0 : i32, i32
  }
  func.func @transform_5(%arg0: i32) -> (i32, i32, i32) {
    %c0_i32 = arith.constant 0 : i32
    %c0_i32_0 = arith.constant 0 : i32
    %c0_i32_1 = arith.constant 0 : i32
    %c0_i32_2 = arith.constant 0 : i32
    return %c0_i32, %c0_i32_0, %c0_i32_1 : i32, i32, i32
  }
  func.func @transform_6(%arg0: i32) -> (i32, i32) {
    %c0_i32 = arith.constant 0 : i32
    %c0_i32_0 = arith.constant 0 : i32
    return %arg0, %c0_i32 : i32, i32
  }
}

</mosaic_0001>

<bundles_post_ra>
// kernel: _lambda_.1
= control target key start
LH: loop header
LB: loop body
LE: loop exit
PB: predicated region body
PF: predicated region fallthrough
CT: control target
= control target key end

     0   :  { %s5113_s27 = smov 30   ;;  %vm339_vm0 = vcmask 1044480   ;;  %s5114_s15 = smov 60   ;;  %vm191_vm1 = vcmask 244736   ;;  %vm204_vm2 = vcmask 490496   ;;  %vm330_vm3 = vcmask 736256   ;;  %s7496_s0 = inlined_call_operand.vmem [shape: f32[64,30], index: 0, kind: input, shape index: {}]   ;;  %s7497_s1 = inlined_call_operand.vmem [shape: bf16[90,336], index: 1, kind: input, shape index: {}]   ;;  %s7498_s5 = inlined_call_operand.vmem [shape: f32[4,2,336], index: 5, kind: input, shape index: {}]   ;;  %s7499_s2 = inlined_call_operand.vmem [shape: bf16[1008,192], index: 2, kind: input, shape index: {}]   ;;  %s7500_s3 = inlined_call_operand.vmem [shape: bf16[576,128], index: 3, kind: input, shape index: {}]   ;;  %s7501_s4 = inlined_call_operand.vmem [shape: bf16[384,128], index: 4, kind: input, shape index: {}]   ;;  %s7502_s6 = inlined_call_operand.vmem [shape: f32[16,128], index: 6, kind: output, shape index: {}]  }
   0x1   :  { %v83_v0 = vld [vmem:[%s7496_s0 + $0x1] sm:$0xff]  ;;  %v84_v1 = vld [vmem:[%s7496_s0 + $0x9] sm:$0xff]  ;;  %v85_v7 = vld [vmem:[%s7496_s0 + $0x11] sm:$0xff]  ;;  %vm685_vm4 = vcmask 1046528   ;;  %s5115_s26 = smov 116   ;;  %vm29_vm5 = vcmask 650240  }
   0x2   :  { %v99_v2 = vld [vmem:[%s7496_s0 + $0x2] sm:$0xff]  ;;  %v91_v3 = vpack.c.bf16 %v83_v0, %v83_v0  ;;  %v92_v4 = vpack.c.bf16 %v84_v1, %v84_v1  ;;  %v100_v5 = vld [vmem:[%s7496_s0 + $0xa] sm:$0xff]  ;;  %v86_v8 = vld [vmem:[%s7496_s0 + $0x19] sm:$0xff]  ;;  %v93_v10 = vpack.c.bf16 %v85_v7, %v85_v7  ;;  %vm891_vm6 = vcmask 949248   ;;  %s5117_s16 = smov 80   ;;  %s5118_s7 = smov 32  }
   0x3   :  { %v107_v6 = vpack.c.bf16 %v99_v2, %v99_v2  ;;  %v108_v9 = vpack.c.bf16 %v100_v5, %v100_v5  ;;  %v94_v11 = vpack.c.bf16 %v86_v8, %v86_v8  ;;  %v101_v12 = vld [vmem:[%s7496_s0 + $0x12] sm:$0xff]  ;;  %v102_v13 = vld [vmem:[%s7496_s0 + $0x1a] sm:$0xff]  ;;  %v88_v18 = vld [vmem:[%s7496_s0 + $0x29] sm:$0xff]  ;;  %vm973_vm7 = vcmask 551936   ;;  %s5119_s20 = smov 112   ;;  %s5120_s25 = smov 64  }
   0x4   :  { %v87_v14 = vld [vmem:[%s7496_s0 + $0x21] sm:$0xff]  ;;  %v143_v15 = vunpack.c.l.b16 %v91_v3  ;;  %v144_v16 = vunpack.c.l.b16 %v92_v4  ;;  %v145_v19 = vunpack.c.l.b16 %v93_v10  ;;  %v109_v21 = vpack.c.bf16 %v101_v12, %v101_v12  ;;  %v89_v27 = vld [vmem:[%s7496_s0 + $0x31] sm:$0xff]  ;;  %v90_v30 = vld [vmem:[%s7496_s0 + $0x39] sm:$0x3f] }
   0x5   :  { %v5185_v17 = vunpack.c.l.b16 %v107_v6  ;;  %v146_v20 = vunpack.c.l.b16 %v94_v11  ;;  %v110_v22 = vpack.c.bf16 %v102_v13, %v102_v13  ;;  %v172_v24 = vunpack.c.l.b16 %v108_v9  ;;  %v103_v28 = vld [vmem:[%s7496_s0 + $0x22] sm:$0xff]  ;;  %v104_v31 = vld [vmem:[%s7496_s0 + $0x2a] sm:$0xff]  ;;  %v3965_v32 = vld [vmem:[%s7497_s1 + $0x78] sm:$0xf] }
   0x6   :  { %v151_v23 = vpack.c.b16 %v144_v16, %v143_v15  ;;  %v95_v25 = vpack.c.bf16 %v87_v14, %v87_v14  ;;  %v96_v26 = vpack.c.bf16 %v88_v18, %v88_v18  ;;  %v4790_v35 = vld [vmem:[%s7497_s1 + $0x80] sm:$0x10]  ;;  %v4789_v36 = vld [vmem:[%s7497_s1 + $0x7c] sm:$0xf]  ;;  %v3967_v37 = vld [vmem:[%s7497_s1 + $0x84] sm:$0x10]  ;;  %v173_v38 = vunpack.c.l.b16 %v109_v21 }
   0x7   :  { %v152_v29 = vpack.c.b16 %v146_v20, %v145_v19  ;;  %v174_v39 = vunpack.c.l.b16 %v110_v22  ;;  %v105_v40 = vld [vmem:[%s7496_s0 + $0x32] sm:$0xff]  ;;  %v111_v41 = vpack.c.bf16 %v103_v28, %v103_v28  ;;  %v3973_v42 = vld [vmem:[%s7497_s1 + $0x80] sm:$0xf]  ;;  %v4791_v43 = vld [vmem:[%s7497_s1 + $0x88] sm:$0x10]  ;;  %v179_v44 = vpack.c.b16 %v172_v24, %v5185_v17 }
   0x8   :  { %155 = vrot.lane.b32.xlu0 %v151_v23, %s5113_s27  ;;  %v147_v33 = vunpack.c.l.b16 %v95_v25  ;;  %v148_v34 = vunpack.c.l.b16 %v96_v26  ;;  %v106_v46 = vld [vmem:[%s7496_s0 + $0x3a] sm:$0x3f]  ;;  %v112_v47 = vpack.c.bf16 %v104_v31, %v104_v31  ;;  %v3953_v48 = vld [vmem:[%s7497_s1 + $0x60] sm:$0xf]  ;;  %v97_v49 = vpack.c.bf16 %v89_v27, %v89_v27  ;;  %v4787_v53 = vld [vmem:[%s7497_s1 + $0x68] sm:$0xf0] }
   0x9   :  { %157 = vrot.lane.b32.xlu1 %v152_v29, %s5113_s27  ;;  %v98_v50 = vpack.c.bf16 %v90_v30, %v90_v30  ;;  %v3966_v51 = vor.u32 %v4790_v35, %v3965_v32  ;;  %v3970_v52 = vor.u32 %v4789_v36, %v3967_v37  ;;  %v4786_v54 = vld [vmem:[%s7497_s1 + $0x64] sm:$0xf]  ;;  %v3955_v55 = vld [vmem:[%s7497_s1 + $0x6c] sm:$0xf0]  ;;  %v113_v56 = vpack.c.bf16 %v105_v40, %v105_v40  ;;  %v3961_v60 = vld [vmem:[%s7497_s1 + $0x68] sm:$0xf] }
   0xa   :  { %v153_v45 = vpack.c.b16 %v148_v34, %v147_v33  ;;  %v175_v57 = vunpack.c.l.b16 %v111_v41  ;;  %v176_v58 = vunpack.c.l.b16 %v112_v47  ;;  %v3974_v59 = vor.u32 %v4791_v43, %v3973_v42  ;;  %v4788_v61 = vld [vmem:[%s7497_s1 + $0x70] sm:$0xf0]  ;;  %v3941_v5 = vld [vmem:[%s7497_s1 + $0x48] sm:$0xf]  ;;  %v4783_v8 = vld [vmem:[%s7497_s1 + $0x4c] sm:$0xf] }
   0xb   :  { %v180_v62 = vpack.c.b16 %v174_v39, %v173_v38  ;;  %v114_v63 = vpack.c.bf16 %v106_v46, %v106_v46  ;;  %v341_v0 = vsel %vm339_vm0, %v3966_v51, 0  ;;  %v344_v1 = vsel %vm339_vm0, %v3970_v52, 0  ;;  %v4784_v7 = vld [vmem:[%s7497_s1 + $0x50] sm:$0xf0]  ;;  %v3943_v9 = vld [vmem:[%s7497_s1 + $0x54] sm:$0xf0] }
   0xc   :  { %159 = vrot.lane.b32.xlu2 %v153_v45, %s5113_s27  ;;  %351 = vmatpush.bf16.msra.mxu0 %v341_v0  ;;  %v347_v2 = vsel %vm339_vm0, %v3974_v59, 0  ;;  %v3954_v3 = vor.u32 %v4787_v53, %v3953_v48  ;;  %v3958_v4 = vor.u32 %v4786_v54, %v3955_v55  ;;  %v3962_v6 = vor.u32 %v4788_v61, %v3961_v60  ;;  %v3949_v13 = vld [vmem:[%s7497_s1 + $0x50] sm:$0xf]  ;;  %v4785_v14 = vld [vmem:[%s7497_s1 + $0x58] sm:$0xf0] }
   0xd   :  { %380 = vmatpush.bf16.msra.mxu1 %v344_v1  ;;  %409 = vmatpush.bf16.msra.mxu2 %v347_v2  ;;  %v149_v10 = vunpack.c.l.b16 %v97_v49  ;;  %v150_v11 = vunpack.c.l.b16 %v98_v50  ;;  %v181_v12 = vpack.c.b16 %v176_v58, %v175_v57  ;;  %v177_v15 = vunpack.c.l.b16 %v113_v56  ;;  %v3929_v19 = vld [vmem:[%s7497_s1 + $0x30] sm:$0xf]  ;;  %v4781_v21 = vld [vmem:[%s7497_s1 + $0x38] sm:$0xf0]  ;;  %v4780_v22 = vld [vmem:[%s7497_s1 + $0x34] sm:$0xf] }
   0xe   :  { %v178_v16 = vunpack.c.l.b16 %v114_v63  ;;  %v3942_v17 = vor.u32 %v4784_v7, %v3941_v5  ;;  %v3946_v18 = vor.u32 %v4783_v8, %v3943_v9  ;;  %v3950_v20 = vor.u32 %v4785_v14, %v3949_v13  ;;  %v3931_v23 = vld [vmem:[%s7497_s1 + $0x3c] sm:$0xf0]  ;;  %v3937_v25 = vld [vmem:[%s7497_s1 + $0x38] sm:$0xf]  ;;  %v4782_v26 = vld [vmem:[%s7497_s1 + $0x40] sm:$0xf0] }
   0xf   :  { %v154_v24 = vpack.c.b16 %v150_v11, %v149_v10  ;;  %v3930_v28 = vor.u32 %v4781_v21, %v3929_v19  ;;  %v3934_v29 = vor.u32 %v4780_v22, %v3931_v23  ;;  %v3938_v30 = vor.u32 %v4782_v26, %v3937_v25  ;;  %v3917_v31 = vld [vmem:[%s7497_s1 + $0x18] sm:$0xf]  ;;  %v4778_v32 = vld [vmem:[%s7497_s1 + $0x20] sm:$0xf0]  ;;  %v4777_v33 = vld [vmem:[%s7497_s1 + $0x1c] sm:$0xf] }
  0x10   :  { %183 = vrot.lane.b32.xlu0 %v179_v44, %s5114_s15  ;;  %352 = vmatpush.bf16.msra.mxu0 %v3954_v3  ;;  %v182_v27 = vpack.c.b16 %v178_v16, %v177_v15  ;;  %v3918_v34 = vor.u32 %v4778_v32, %v3917_v31  ;;  %v3919_v35 = vld [vmem:[%s7497_s1 + $0x24] sm:$0xf0]  ;;  %v3925_v36 = vld [vmem:[%s7497_s1 + $0x20] sm:$0xf]  ;;  %v4779_v37 = vld [vmem:[%s7497_s1 + $0x28] sm:$0xf0] }
  0x11   :  { %185 = vrot.lane.b32.xlu1 %v180_v62, %s5114_s15  ;;  %381 = vmatpush.bf16.msra.mxu1 %v3958_v4  ;;  %v3922_v38 = vor.u32 %v4777_v33, %v3919_v35  ;;  %v3926_v39 = vor.u32 %v4779_v37, %v3925_v36  ;;  %v3905_v40 = vld [vmem:[%s7497_s1] sm:$0xf]  ;;  %v4775_v41 = vld [vmem:[%s7497_s1 + $0x8] sm:$0xf0]  ;;  %v4774_v42 = vld [vmem:[%s7497_s1 + $0x4] sm:$0xf] }
  0x12   :  { %410 = vmatpush.bf16.msra.mxu2 %v3962_v6  ;;  %v3906_v43 = vor.u32 %v4775_v41, %v3905_v40  ;;  %v3907_v44 = vld [vmem:[%s7497_s1 + $0xc] sm:$0xf0]  ;;  %v3913_v45 = vld [vmem:[%s7497_s1 + $0x8] sm:$0xf]  ;;  %v4776_v46 = vld [vmem:[%s7497_s1 + $0x10] sm:$0xf0] }
  0x13   :  { %v3910_v47 = vor.u32 %v4774_v42, %v3907_v44  ;;  %v3914_v48 = vor.u32 %v4776_v46, %v3913_v45  ;;  %v67_v49 = vld [vmem:[%s7496_s0] sm:$0xff]  ;;  %v68_v50 = vld [vmem:[%s7496_s0 + $0x8] sm:$0xff]  ;;  %v69_v57 = vld [vmem:[%s7496_s0 + $0x10] sm:$0xff]  ;;  %vm987_vm8 = vcmask 1042432   ;;  %vm988_vm9 = vsmask.f32 2304 }
  0x14   :  { %187 = vrot.lane.b32.xlu2 %v181_v12, %s5114_s15  ;;  %353 = vmatpush.bf16.msra.mxu0 %v3942_v17  ;;  %v75_v51 = vpack.c.bf16 %v67_v49, %v67_v49  ;;  %v76_v52 = vpack.c.bf16 %v68_v50, %v68_v50  ;;  %v70_v58 = vld [vmem:[%s7496_s0 + $0x18] sm:$0xff]  ;;  %v77_v62 = vpack.c.bf16 %v69_v57, %v69_v57  ;;  %v71_v6 = vld [vmem:[%s7496_s0 + $0x20] sm:$0xff]  ;;  %v72_v7 = vld [vmem:[%s7496_s0 + $0x28] sm:$0xff]  ;;  %vm990_vm10 = vcmask 1046532  }
  0x15   :  { %382 = vmatpush.bf16.msra.mxu1 %v3946_v18  ;;  %v78_v63 = vpack.c.bf16 %v70_v58, %v70_v58  ;;  %v79_v9 = vpack.c.bf16 %v71_v6, %v71_v6  ;;  %v80_v10 = vpack.c.bf16 %v72_v7, %v72_v7  ;;  %v73_v15 = vld [vmem:[%s7496_s0 + $0x30] sm:$0xff]  ;;  %v74_v16 = vld [vmem:[%s7496_s0 + $0x38] sm:$0x3f]  ;;  %vm991_vm11 = vsmask.f32 6400  ;;  %vm5817_vm13 = vmand %vm987_vm8, %vm988_vm9 }
  0x16   :  { %411 = vmatpush.bf16.msra.mxu2 %v3950_v20  ;;  %v123_v54 = vunpack.c.l.b16 %v75_v51  ;;  %v124_v55 = vunpack.c.l.b16 %v76_v52  ;;  %v125_v1 = vunpack.c.l.b16 %v77_v62  ;;  %v81_v19 = vpack.c.bf16 %v73_v15, %v73_v15  ;;  %vm5827_vm14 = vmand %vm990_vm10, %vm991_vm11 }
  0x17   :  { %v126_v2 = vunpack.c.l.b16 %v78_v63  ;;  %v127_v12 = vunpack.c.l.b16 %v79_v9  ;;  %v128_v13 = vunpack.c.l.b16 %v80_v10  ;;  %v82_v20 = vpack.c.bf16 %v74_v16, %v74_v16  ;;  %vm993_vm0 = vmor %vm5827_vm14, %vm5817_vm13 }
  0x18   :  { %161 = vrot.lane.b32.xlu0 %v154_v24, %s5113_s27  ;;  %354 = vmatpush.bf16.msra.mxu0 %v3930_v28  ;;  %v131_v56 = vpack.c.b16 %v124_v55, %v123_v54  ;;  %v129_v22 = vunpack.c.l.b16 %v81_v19  ;;  %vm997_vm12 = vcmask 550912   ;;  %vm2857_vm8 = vcmask 392196  }
  0x19   :  { %189 = vrot.lane.b32.xlu1 %v182_v27, %s5114_s15  ;;  %383 = vmatpush.bf16.msra.mxu1 %v3934_v29  ;;  %v132_v3 = vpack.c.b16 %v126_v2, %v125_v1  ;;  %v133_v14 = vpack.c.b16 %v128_v13, %v127_v12  ;;  %v130_v23 = vunpack.c.l.b16 %v82_v20  ;;  %v436_v29 = vld [vmem:[%s7498_s5] ss:$2 sm:$0x7]  ;;  %vm5838_vm15 = vmand %vm997_vm12, %vm988_vm9  ;;  %vm2866_vm10 = vcmask 1040384  }
  0x1a   :  { %412 = vmatpush.bf16.msra.mxu2 %v3938_v30  ;;  %v3987_v30 = vld [vmem:[%s7498_s5 + $0x1] ss:$2 sm:$0x7]  ;;  %v5378_v31 = vperm.slane %v436_v29, 0  ;;  %v5380_v32 = vperm.slane %v436_v29, 1  ;;  %v5390_v41 = vperm.slane %v436_v29, 2 }
  0x1b   :  { %v134_v24 = vpack.c.b16 %v130_v23, %v129_v22  ;;  %v5382_v33 = vperm.slane %v3987_v30, 0  ;;  %v5392_v44 = vperm.slane %v3987_v30, 2  ;;  %vm2867_vm11 = vcmask 389124  }
  0x1c   :  { %355 = vmatpush.bf16.msra.mxu0 %v3918_v34  ;;  %v5384_v34 = vperm.slane %v3987_v30, 1  ;;  %vm2868_vm12 = vmor %vm2867_vm11, %vm2866_vm10  ;;  %vm2953_vm13 = vcmask 523264   ;;  %vm3592_vm14 = vcmask 781312  }
  0x1d   :  { %384 = vmatpush.bf16.msra.mxu1 %v3922_v38 }
  0x1e   :  { %413 = vmatpush.bf16.msra.mxu2 %v3926_v39 }
  0x20   :  { %356 = vmatpush.bf16.msra.mxu0 %v3906_v43 }
  0x21   :  { %385 = vmatpush.bf16.msra.mxu1 %v3910_v47 }
  0x22   :  { %414 = vmatpush.bf16.msra.mxu2 %v3914_v48 }
  0x66   :  { %v160_v11 = vpop.permute.xlu2 %159 }
  0x67   :  { %v200_v17 = vsel %vm191_vm1, %v133_v14, %v160_v11 }
  0x6e   :  { %v188_v18 = vpop.permute.xlu2 %187 }
  0x6f   :  { %v210_v21 = vsel %vm204_vm2, %v200_v17, %v188_v18 }
  0x7a   :  { %v156_v53 = vpop.permute.xlu0 %155 }
  0x7b   :  { %v194_v59 = vsel %vm191_vm1, %v131_v56, %v156_v53  ;;  %v158_v0 = vpop.permute.xlu1 %157 }
  0x7c   :  { %v197_v4 = vsel %vm191_vm1, %v132_v3, %v158_v0 }
  0x82   :  { %v184_v60 = vpop.permute.xlu0 %183 }
  0x83   :  { %v206_v61 = vsel %vm204_vm2, %v194_v59, %v184_v60  ;;  %v186_v5 = vpop.permute.xlu1 %185 }
  0x84   :  { %3975 = vmatmul.msk.bf16.vlgmr.msra.gmra.mxu0 %vm330_vm3, %v206_v61  ;;  %3979 = vmatmul.msk.bf16.vlgmr.msra.gmra.mxu1 %vm330_vm3, %v206_v61  ;;  %v208_v8 = vsel %vm204_vm2, %v197_v4, %v186_v5 }
  0x85   :  { %3983 = vmatmul.msk.bf16.vlgmr.msra.gmra.mxu2 %vm330_vm3, %v206_v61 }
  0x8a   :  { %v162_v25 = vpop.permute.xlu0 %161 }
  0x8b   :  { %v203_v26 = vsel %vm191_vm1, %v134_v24, %v162_v25  ;;  %v190_v27 = vpop.permute.xlu1 %189  ;;  %vm1181_vm1 = vcmask 1045504  }
  0x8c   :  { %v212_v28 = vsel %vm204_vm2, %v203_v26, %v190_v27  ;;  %vm1148_vm2 = vcmask 654336  }
  0x94   :  { %3976 = vmatmul.msk.bf16.gmra.mxu0 %vm330_vm3, %v208_v8  ;;  %3980 = vmatmul.msk.bf16.gmra.mxu1 %vm330_vm3, %v208_v8 }
  0x95   :  { %3984 = vmatmul.msk.bf16.gmra.mxu2 %vm330_vm3, %v208_v8 }
  0xa4   :  { %3977 = vmatmul.msk.bf16.gmra.mxu0 %vm330_vm3, %v210_v21  ;;  %3981 = vmatmul.msk.bf16.gmra.mxu1 %vm330_vm3, %v210_v21 }
  0xa5   :  { %3985 = vmatmul.msk.bf16.gmra.mxu2 %vm330_vm3, %v210_v21 }
  0xb4   :  { %3978 = vmatmul.msk.bf16.gmra.mxu0 %vm330_vm3, %v212_v28  ;;  %3982 = vmatmul.msk.bf16.gmra.mxu1 %vm330_vm3, %v212_v28 }
  0xb5   :  { %3986 = vmatmul.msk.bf16.gmra.mxu2 %vm330_vm3, %v212_v28  ;;  %vm1227_vm3 = vcmask 261120  }
 0x101   :  { %v358_v35 = vpop.f32.mrf.mxu0  ;;  %v387_v36 = vpop.f32.mrf.mxu1 }
 0x102   :  { %v444_v37 = vmul.f32 %v5378_v31, %v358_v35  ;;  %v445_v38 = vmul.f32 %v5380_v32, %v387_v36 }
 0x104   :  { %v477_v39 = vadd.f32 %v5382_v33, %v444_v37  ;;  %v478_v40 = vadd.f32 %v5384_v34, %v445_v38 }
 0x106   :  { %v501_v42 = vadd.f32 3.0, %v477_v39  ;;  %v502_v43 = vadd.f32 3.0, %v478_v40 }
 0x108   :  { %v525_v45 = vmax.f32 %v501_v42, 0.0  ;;  %v416_v46 = vpop.f32.mrf.mxu2  ;;  %v526_v47 = vmax.f32 %v502_v43, 0.0 }
 0x109   :  { %v446_v48 = vmul.f32 %v5390_v41, %v416_v46  ;;  %v360_v49 = vpop.f32.mrf.mxu0  ;;  %v389_v50 = vpop.f32.mrf.mxu1 }
 0x10a   :  { %v447_v51 = vmul.f32 %v5378_v31, %v360_v49  ;;  %v448_v52 = vmul.f32 %v5380_v32, %v389_v50  ;;  %v549_v53 = vmin.f32 %v525_v45, 6.0  ;;  %v550_v57 = vmin.f32 %v526_v47, 6.0 }
 0x10b   :  { %v479_v54 = vadd.f32 %v5392_v44, %v446_v48 }
 0x10c   :  { %v480_v55 = vadd.f32 %v5382_v33, %v447_v51  ;;  %v481_v56 = vadd.f32 %v5384_v34, %v448_v52  ;;  %v573_v61 = vmul.f32 %v549_v53, %v477_v39  ;;  %v574_v2 = vmul.f32 %v550_v57, %v478_v40 }
 0x10d   :  { %v503_v58 = vadd.f32 3.0, %v479_v54 }
 0x10e   :  { %v504_v59 = vadd.f32 3.0, %v480_v55  ;;  %v505_v60 = vadd.f32 3.0, %v481_v56  ;;  %v597_v11 = vmul.f32 0.16666667, %v573_v61  ;;  %v598_v17 = vmul.f32 0.16666667, %v574_v2 }
 0x10f   :  { %v527_v62 = vmax.f32 %v503_v58, 0.0 }
 0x110   :  { %v528_v63 = vmax.f32 %v504_v59, 0.0  ;;  %v529_v0 = vmax.f32 %v505_v60, 0.0  ;;  %v418_v1 = vpop.f32.mrf.mxu2  ;;  %v686_v24 = vrot.slane %v597_v11, 1  ;;  %v689_v35 = vrot.slane %v598_v17, 1 }
 0x111   :  { %v551_v3 = vmin.f32 %v527_v62, 6.0  ;;  %v449_v4 = vmul.f32 %v5390_v41, %v418_v1  ;;  %v363_v5 = vpop.f32.mrf.mxu0  ;;  %v392_v6 = vpop.f32.mrf.mxu1 }
 0x112   :  { %v552_v7 = vmin.f32 %v528_v63, 6.0  ;;  %v553_v8 = vmin.f32 %v529_v0, 6.0  ;;  %v450_v9 = vmul.f32 %v5378_v31, %v363_v5  ;;  %v451_v10 = vmul.f32 %v5380_v32, %v392_v6 }
 0x113   :  { %v482_v12 = vadd.f32 %v5392_v44, %v449_v4  ;;  %v575_v18 = vmul.f32 %v551_v3, %v479_v54 }
 0x114   :  { %v576_v13 = vmul.f32 %v552_v7, %v480_v55  ;;  %v577_v14 = vmul.f32 %v553_v8, %v481_v56  ;;  %v483_v15 = vadd.f32 %v5382_v33, %v450_v9  ;;  %v484_v16 = vadd.f32 %v5384_v34, %v451_v10 }
 0x115   :  { %v506_v19 = vadd.f32 3.0, %v482_v12  ;;  %v599_v36 = vmul.f32 0.16666667, %v575_v18 }
 0x116   :  { %v5406_v20 = vmul.f32 0.16666667, %v576_v13  ;;  %v5408_v21 = vmul.f32 0.16666667, %v577_v14  ;;  %v507_v22 = vadd.f32 3.0, %v483_v15  ;;  %v508_v23 = vadd.f32 3.0, %v484_v16 }
 0x117   :  { %v530_v25 = vmax.f32 %v506_v19, 0.0  ;;  %v692_v63 = vrot.slane %v599_v36, 1 }
 0x118   :  { %v687_v26 = vrot.slane %v5406_v20, 1  ;;  %v690_v27 = vrot.slane %v5408_v21, 1  ;;  %v531_v28 = vmax.f32 %v507_v22, 0.0  ;;  %v532_v29 = vmax.f32 %v508_v23, 0.0  ;;  %v421_v30 = vpop.f32.mrf.mxu2 }
 0x119   :  { %v554_v37 = vmin.f32 %v530_v25, 6.0  ;;  %v452_v38 = vmul.f32 %v5390_v41, %v421_v30  ;;  %v365_v39 = vpop.f32.mrf.mxu0  ;;  %v394_v40 = vpop.f32.mrf.mxu1 }
 0x11a   :  { %v555_v42 = vmin.f32 %v531_v28, 6.0  ;;  %v556_v43 = vmin.f32 %v532_v29, 6.0  ;;  %v453_v45 = vmul.f32 %v5378_v31, %v365_v39  ;;  %v454_v46 = vmul.f32 %v5380_v32, %v394_v40 }
 0x11b   :  { %v578_v47 = vmul.f32 %v554_v37, %v482_v12  ;;  %v485_v48 = vadd.f32 %v5392_v44, %v452_v38  ;;  %v688_v49 = vsel %vm685_vm4, %v686_v24, %v687_v26  ;;  %v691_v50 = vsel %vm685_vm4, %v689_v35, %v690_v27 }
 0x11c   :  { %v579_v51 = vmul.f32 %v555_v42, %v483_v15  ;;  %v580_v52 = vmul.f32 %v556_v43, %v484_v16  ;;  %v486_v53 = vadd.f32 %v5382_v33, %v453_v45  ;;  %v487_v54 = vadd.f32 %v5384_v34, %v454_v46 }
 0x11d   :  { %v5420_v55 = vmul.f32 0.16666667, %v578_v47  ;;  %v509_v56 = vadd.f32 3.0, %v485_v48  ;;  %v5422_v57 = vmax.f32 %v597_v11, %v688_v49  ;;  %v5424_v58 = vmax.f32 %v598_v17, %v691_v50 }
 0x11e   :  { %v5426_v59 = vmul.f32 0.16666667, %v579_v51  ;;  %v5428_v60 = vmul.f32 0.16666667, %v580_v52  ;;  %v510_v61 = vadd.f32 3.0, %v486_v53  ;;  %v511_v62 = vadd.f32 3.0, %v487_v54 }
 0x11f   :  { %v693_v0 = vrot.slane %v5420_v55, 1  ;;  %v533_v1 = vmax.f32 %v509_v56, 0.0  ;;  %v4994_v17 = vpack.i.bf16 %v5424_v58, %v5422_v57 }
 0x120   :  { %v695_v2 = vrot.slane %v5426_v59, 1  ;;  %v697_v3 = vrot.slane %v5428_v60, 1  ;;  %v534_v4 = vmax.f32 %v510_v61, 0.0  ;;  %v535_v5 = vmax.f32 %v511_v62, 0.0  ;;  %v423_v6 = vpop.f32.mrf.mxu2 }
 0x121   :  { %v557_v7 = vmin.f32 %v533_v1, 6.0  ;;  %v455_v8 = vmul.f32 %v5390_v41, %v423_v6  ;;  %v368_v9 = vpop.f32.mrf.mxu0  ;;  %v397_v10 = vpop.f32.mrf.mxu1  ;;  %v694_v18 = vsel %vm685_vm4, %v692_v63, %v693_v0  ;;  %4995 = vrot.lane.b32.xlu2 %v4994_v17, %s5115_s26 }
 0x122   :  { %v558_v11 = vmin.f32 %v534_v4, 6.0  ;;  %v559_v12 = vmin.f32 %v535_v5, 6.0  ;;  %v456_v13 = vmul.f32 %v5378_v31, %v368_v9  ;;  %v457_v14 = vmul.f32 %v5380_v32, %v397_v10 }
 0x123   :  { %v581_v15 = vmul.f32 %v557_v7, %v485_v48  ;;  %v488_v16 = vadd.f32 %v5392_v44, %v455_v8  ;;  %v696_v29 = vsel %vm685_vm4, %v687_v26, %v695_v2  ;;  %v698_v30 = vsel %vm685_vm4, %v690_v27, %v697_v3 }
 0x124   :  { %v582_v19 = vmul.f32 %v558_v11, %v486_v53  ;;  %v583_v22 = vmul.f32 %v559_v12, %v487_v54  ;;  %v489_v23 = vadd.f32 %v5382_v33, %v456_v13  ;;  %v490_v24 = vadd.f32 %v5384_v34, %v457_v14 }
 0x125   :  { %v5442_v25 = vmul.f32 0.16666667, %v581_v15  ;;  %v512_v28 = vadd.f32 3.0, %v488_v16  ;;  %v5456_v43 = vmax.f32 %v599_v36, %v694_v18  ;;  %v5459_v45 = vmax.f32 %v5406_v20, %v696_v29 }
 0x126   :  { %v5451_v35 = vmul.f32 0.16666667, %v582_v19  ;;  %v5453_v37 = vmul.f32 0.16666667, %v583_v22  ;;  %v513_v38 = vadd.f32 3.0, %v489_v23  ;;  %v514_v39 = vadd.f32 3.0, %v490_v24 }
 0x127   :  { %v699_v40 = vrot.slane %v5442_v25, 1  ;;  %v536_v42 = vmax.f32 %v512_v28, 0.0  ;;  %v5465_v53 = vmax.f32 %v5408_v21, %v698_v30  ;;  %v4999_v14 = vpack.i.bf16 %v5459_v45, %v5456_v43 }
 0x128   :  { %v701_v26 = vrot.slane %v5451_v35, 1  ;;  %v703_v46 = vrot.slane %v5453_v37, 1  ;;  %v537_v47 = vmax.f32 %v513_v38, 0.0  ;;  %v538_v27 = vmax.f32 %v514_v39, 0.0  ;;  %v426_v48 = vpop.f32.mrf.mxu2 }
 0x129   :  { %v560_v49 = vmin.f32 %v536_v42, 6.0  ;;  %v458_v50 = vmul.f32 %v5390_v41, %v426_v48  ;;  %v370_v51 = vpop.f32.mrf.mxu0  ;;  %v399_v52 = vpop.f32.mrf.mxu1  ;;  %v700_v21 = vsel %vm685_vm4, %v693_v0, %v699_v40  ;;  %5000 = vrot.lane.b32.xlu0 %v4999_v14, %s5115_s26 }
 0x12a   :  { %v561_v36 = vmin.f32 %v537_v47, 6.0  ;;  %v562_v54 = vmin.f32 %v538_v27, 6.0  ;;  %v459_v20 = vmul.f32 %v5378_v31, %v370_v51  ;;  %v460_v56 = vmul.f32 %v5380_v32, %v399_v52 }
 0x12b   :  { %v584_v61 = vmul.f32 %v560_v49, %v488_v16  ;;  %v491_v62 = vadd.f32 %v5392_v44, %v458_v50  ;;  %v5485_v15 = vmax.f32 %v5420_v55, %v700_v21  ;;  %v702_v47 = vsel %vm685_vm4, %v695_v2, %v701_v26 }
 0x12c   :  { %v585_v63 = vmul.f32 %v561_v36, %v489_v23  ;;  %v586_v1 = vmul.f32 %v562_v54, %v490_v24  ;;  %v492_v4 = vadd.f32 %v5382_v33, %v459_v20  ;;  %v493_v5 = vadd.f32 %v5384_v34, %v460_v56 }
 0x12d   :  { %v5472_v6 = vmul.f32 0.16666667, %v584_v61  ;;  %v515_v7 = vadd.f32 3.0, %v491_v62  ;;  %v5004_v36 = vpack.i.bf16 %v5485_v15, %v5465_v53  ;;  %v704_v54 = vsel %vm685_vm4, %v697_v3, %v703_v46 }
 0x12e   :  { %v5477_v8 = vmul.f32 0.16666667, %v585_v63  ;;  %v5479_v9 = vmul.f32 0.16666667, %v586_v1  ;;  %v516_v10 = vadd.f32 3.0, %v492_v4  ;;  %v517_v11 = vadd.f32 3.0, %v493_v5 }
 0x12f   :  { %v705_v12 = vrot.slane %v5472_v6, 1  ;;  %v539_v13 = vmax.f32 %v515_v7, 0.0  ;;  %5005 = vrot.lane.b32.xlu1 %v5004_v36, %s5115_s26  ;;  %v5517_v1 = vmax.f32 %v5426_v59, %v702_v47 }
 0x130   :  { %v707_v16 = vrot.slane %v5477_v8, 1  ;;  %v709_v17 = vrot.slane %v5479_v9, 1  ;;  %v540_v0 = vmax.f32 %v516_v10, 0.0  ;;  %v541_v18 = vmax.f32 %v517_v11, 0.0  ;;  %v428_v19 = vpop.f32.mrf.mxu2 }
 0x131   :  { %v563_v22 = vmin.f32 %v539_v13, 6.0  ;;  %v461_v23 = vmul.f32 %v5390_v41, %v428_v19  ;;  %v402_v24 = vpop.f32.mrf.mxu1  ;;  %v373_v28 = vpop.f32.mrf.mxu0  ;;  %v706_v59 = vsel %vm685_vm4, %v699_v40, %v705_v12 }
 0x132   :  { %v564_v29 = vmin.f32 %v540_v0, 6.0  ;;  %v565_v30 = vmin.f32 %v541_v18, 6.0  ;;  %v463_v38 = vmul.f32 %v5380_v32, %v402_v24  ;;  %v462_v55 = vmul.f32 %v5378_v31, %v373_v28 }
 0x133   :  { %v587_v39 = vmul.f32 %v563_v22, %v491_v62  ;;  %v494_v42 = vadd.f32 %v5392_v44, %v461_v23 }
 0x134   :  { %v588_v27 = vmul.f32 %v564_v29, %v492_v4  ;;  %v589_v48 = vmul.f32 %v565_v30, %v493_v5  ;;  %v496_v49 = vadd.f32 %v5384_v34, %v463_v38  ;;  %v495_v50 = vadd.f32 %v5382_v33, %v462_v55 }
 0x135   :  { %v5501_v51 = vmul.f32 0.16666667, %v587_v39  ;;  %v518_v52 = vadd.f32 3.0, %v494_v42  ;;  %v5520_v4 = vmax.f32 %v5428_v60, %v704_v54 }
 0x136   :  { %v5510_v20 = vmul.f32 0.16666667, %v588_v27  ;;  %v5512_v2 = vmul.f32 0.16666667, %v589_v48  ;;  %v520_v56 = vadd.f32 3.0, %v496_v49  ;;  %v519_v61 = vadd.f32 3.0, %v495_v50 }
 0x137   :  { %v711_v62 = vrot.slane %v5501_v51, 1  ;;  %v542_v63 = vmax.f32 %v518_v52, 0.0  ;;  %v5009_v39 = vpack.i.bf16 %v5520_v4, %v5517_v1 }
 0x138   :  { %v713_v5 = vrot.slane %v5510_v20, 1  ;;  %v715_v3 = vrot.slane %v5512_v2, 1  ;;  %v544_v7 = vmax.f32 %v520_v56, 0.0  ;;  %v543_v21 = vmax.f32 %v519_v61, 0.0  ;;  %v431_v10 = vpop.f32.mrf.mxu2 }
 0x139   :  { %v566_v11 = vmin.f32 %v542_v63, 6.0  ;;  %v464_v13 = vmul.f32 %v5390_v41, %v431_v10  ;;  %v375_v14 = vpop.f32.mrf.mxu0  ;;  %v404_v0 = vpop.f32.mrf.mxu1  ;;  %5010 = vrot.lane.b32.xlu2 %v5009_v39, %s5115_s26 }
 0x13a   :  { %v568_v60 = vmin.f32 %v544_v7, 6.0  ;;  %v567_v18 = vmin.f32 %v543_v21, 6.0  ;;  %v465_v19 = vmul.f32 %v5378_v31, %v375_v14  ;;  %v466_v22 = vmul.f32 %v5380_v32, %v404_v0 }
 0x13b   :  { %v590_v23 = vmul.f32 %v566_v11, %v494_v42  ;;  %v497_v24 = vadd.f32 %v5392_v44, %v464_v13  ;;  %v708_v31 = vsel %vm685_vm4, %v701_v26, %v707_v16 }
 0x13c   :  { %v592_v28 = vmul.f32 %v568_v60, %v496_v49  ;;  %v591_v29 = vmul.f32 %v567_v18, %v495_v50  ;;  %v498_v30 = vadd.f32 %v5382_v33, %v465_v19  ;;  %v499_v38 = vadd.f32 %v5384_v34, %v466_v22 }
 0x13d   :  { %v614_v55 = vmul.f32 0.16666667, %v590_v23  ;;  %v521_v40 = vadd.f32 3.0, %v497_v24  ;;  %v710_v34 = vsel %vm685_vm4, %v703_v46, %v709_v17  ;;  %v5549_v49 = vmax.f32 %v5442_v25, %v706_v59 }
 0x13e   :  { %v616_v32 = vmul.f32 0.16666667, %v592_v28  ;;  %v615_v42 = vmul.f32 0.16666667, %v591_v29  ;;  %v522_v47 = vadd.f32 3.0, %v498_v30  ;;  %v523_v27 = vadd.f32 3.0, %v499_v38 }
 0x13f   :  { %v717_v48 = vrot.slane %v614_v55, 1  ;;  %v545_v33 = vmax.f32 %v521_v40, 0.0  ;;  %v5552_v61 = vmax.f32 %v5451_v35, %v708_v31  ;;  %v5555_v63 = vmax.f32 %v5453_v37, %v710_v34 }
 0x140   :  { %v721_v50 = vrot.slane %v616_v32, 1  ;;  %v719_v52 = vrot.slane %v615_v42, 1  ;;  %v546_v26 = vmax.f32 %v522_v47, 0.0  ;;  %v547_v36 = vmax.f32 %v523_v27, 0.0  ;;  %v433_v54 = vpop.f32.mrf.mxu2 }
 0x141   :  { %v569_v56 = vmin.f32 %v545_v33, 6.0  ;;  %v467_v10 = vmul.f32 %v5390_v41, %v433_v54  ;;  %v712_v25 = vsel %vm685_vm4, %v705_v12, %v711_v62  ;;  %v714_v41 = vsel %vm685_vm4, %v707_v16, %v713_v5  ;;  %v4813_v54 = vld [vmem:[%s7499_s2 + $0x74] sm:$0xf0] }
 0x142   :  { %v570_v7 = vmin.f32 %v546_v26, 6.0  ;;  %v571_v21 = vmin.f32 %v547_v36, 6.0  ;;  %v5564_v11 = vmax.f32 %v5472_v6, %v712_v25  ;;  %v716_v6 = vsel %vm685_vm4, %v709_v17, %v715_v3  ;;  %v4070_v36 = vld [vmem:[%s7499_s2 + $0x70] sm:$0xf]  ;;  %v4062_v25 = vld [vmem:[%s7499_s2 + $0x60] sm:$0xf] }
 0x143   :  { %v593_v46 = vmul.f32 %v569_v56, %v497_v24  ;;  %v500_v14 = vadd.f32 %v5392_v44, %v467_v10  ;;  %v5014_v44 = vpack.i.bf16 %v5552_v61, %v5549_v49  ;;  %v5580_v18 = vmax.f32 %v5477_v8, %v714_v41  ;;  %v4134_v56 = vld [vmem:[%s7499_s2 + $0xf0] sm:$0xf] }
 0x144   :  { %v594_v13 = vmul.f32 %v570_v7, %v498_v30  ;;  %v595_v35 = vmul.f32 %v571_v21, %v499_v38  ;;  %v5583_v23 = vmax.f32 %v5479_v9, %v716_v6  ;;  %v5019_v24 = vpack.i.bf16 %v5564_v11, %v5555_v63  ;;  %v4829_v21 = vld [vmem:[%s7499_s2 + $0xf4] sm:$0xf0]  ;;  %v4118_v6 = vld [vmem:[%s7499_s2 + $0xd0] sm:$0xf] }
 0x145   :  { %v617_v37 = vmul.f32 0.16666667, %v593_v46  ;;  %v524_v60 = vadd.f32 3.0, %v500_v14  ;;  %5015 = vrot.lane.b32.xlu0 %v5014_v44, %s5115_s26  ;;  %v718_v17 = vsel %vm685_vm4, %v711_v62, %v717_v48  ;;  %v720_v8 = vsel %vm685_vm4, %v713_v5, %v719_v52  ;;  %v4811_v46 = vld [vmem:[%s7499_s2 + $0x64] sm:$0xf0] }
 0x146   :  { %v618_v0 = vmul.f32 0.16666667, %v594_v13  ;;  %v619_v59 = vmul.f32 0.16666667, %v595_v35  ;;  %v722_v28 = vsel %vm685_vm4, %v715_v3, %v721_v50  ;;  %5020 = vrot.lane.b32.xlu1 %v5019_v24, %s5115_s26  ;;  %v5603_v38 = vmax.f32 %v5501_v51, %v718_v17  ;;  %v4126_v13 = vld [vmem:[%s7499_s2 + $0xe0] sm:$0xf] }
 0x147   :  { %v723_v12 = vrot.slane %v617_v37, 1  ;;  %v548_v16 = vmax.f32 %v524_v60, 0.0  ;;  %v5606_v62 = vmax.f32 %v5510_v20, %v720_v8  ;;  %v5609_v39 = vmax.f32 %v5512_v2, %v722_v28  ;;  %v4110_v24 = vld [vmem:[%s7499_s2 + $0xc0] sm:$0xf]  ;;  %v4823_v17 = vld [vmem:[%s7499_s2 + $0xc4] sm:$0xf0] }
 0x148   :  { %v725_v19 = vrot.slane %v618_v0, 1  ;;  %v727_v22 = vrot.slane %v619_v59, 1  ;;  %v5024_v27 = vpack.i.bf16 %v5583_v23, %v5580_v18  ;;  %v4071_v7 = vor.u32 %v4813_v54, %v4070_v36  ;;  %v4038_v28 = vld [vmem:[%s7499_s2 + $0x30] sm:$0xf]  ;;  %v4817_v54 = vld [vmem:[%s7499_s2 + $0x94] sm:$0xf0] }
 0x149   :  { %v572_v30 = vmin.f32 %v548_v16, 6.0  ;;  %v724_v5 = vsel %vm685_vm4, %v717_v48, %v723_v12  ;;  %v5029_v2 = vpack.i.bf16 %v5606_v62, %v5603_v38  ;;  %v4135_v10 = vor.u32 %v4829_v21, %v4134_v56  ;;  %v4799_v21 = vld [vmem:[%s7499_s2 + $0x4] sm:$0xf0] }
 0x14a   :  { %v5597_v29 = vmax.f32 %v618_v0, %v725_v19  ;;  %v5599_v9 = vmax.f32 %v619_v59, %v727_v22  ;;  %v5612_v3 = vmax.f32 %v614_v55, %v724_v5  ;;  %v726_v31 = vsel %vm685_vm4, %v719_v52, %v725_v19  ;;  %5025 = vrot.lane.b32.xlu2 %v5024_v27, %s5115_s26  ;;  %v4054_v0 = vld [vmem:[%s7499_s2 + $0x50] sm:$0xf]  ;;  %v4809_v59 = vld [vmem:[%s7499_s2 + $0x54] sm:$0xf0]  ;;  %v4046_v19 = vld [vmem:[%s7499_s2 + $0x40] sm:$0xf] }
 0x14b   :  { %v596_v40 = vmul.f32 %v572_v30, %v500_v14  ;;  %v728_v51 = vsel %vm685_vm4, %v721_v50, %v727_v22  ;;  %v5619_v20 = vmax.f32 %v615_v42, %v726_v31  ;;  %2043 = vmatpush.bf16.msra.mxu3 %v4071_v7  ;;  %v4063_v35 = vor.u32 %v4811_v46, %v4062_v25  ;;  %v4827_v14 = vld [vmem:[%s7499_s2 + $0xe4] sm:$0xf0]  ;;  %v4805_v30 = vld [vmem:[%s7499_s2 + $0x34] sm:$0xf0]  ;;  %v4030_v27 = vld [vmem:[%s7499_s2 + $0x20] sm:$0xf] }
 0x14c   :  { %v5623_v48 = vmax.f32 %v616_v32, %v728_v51  ;;  %v5034_v55 = vpack.i.bf16 %v5612_v3, %v5609_v39  ;;  %v5039_v42 = vpack.i.bf16 %v5599_v9, %v5597_v29  ;;  %2072 = vmatpush.bf16.msrb.mxu0 %v4135_v10  ;;  %v4127_v41 = vor.u32 %v4827_v14, %v4126_v13  ;;  %v4807_v22 = vld [vmem:[%s7499_s2 + $0x44] sm:$0xf0]  ;;  %v4821_v31 = vld [vmem:[%s7499_s2 + $0xb4] sm:$0xf0]  ;;  %v4014_v7 = vld [vmem:[%s7499_s2] sm:$0xf] }
 0x14d   :  { %v620_v47 = vmul.f32 0.16666667, %v596_v40  ;;  %5030 = vrot.lane.b32.xlu0 %v5029_v2, %s5115_s26  ;;  %v4055_v60 = vor.u32 %v4809_v59, %v4054_v0  ;;  %v4047_v16 = vor.u32 %v4807_v22, %v4046_v19  ;;  %v4111_v8 = vor.u32 %v4823_v17, %v4110_v24  ;;  %v4102_v40 = vld [vmem:[%s7499_s2 + $0xb0] sm:$0xf]  ;;  %v4803_v51 = vld [vmem:[%s7499_s2 + $0x24] sm:$0xf0] }
 0x14e   :  { %5035 = vrot.lane.b32.xlu1 %v5034_v55, %s5115_s26  ;;  %v4039_v5 = vor.u32 %v4805_v30, %v4038_v28  ;;  %v4094_v2 = vld [vmem:[%s7499_s2 + $0xa0] sm:$0xf]  ;;  %v4819_v55 = vld [vmem:[%s7499_s2 + $0xa4] sm:$0xf0]  ;;  %v4015_v25 = vor.u32 %v4799_v21, %v4014_v7 }
 0x14f   :  { %v729_v33 = vrot.slane %v620_v47, 1  ;;  %2044 = vmatpush.bf16.msra.mxu3 %v4063_v35  ;;  %v4078_v10 = vld [vmem:[%s7499_s2 + $0x80] sm:$0xf]  ;;  %v4815_v46 = vld [vmem:[%s7499_s2 + $0x84] sm:$0xf0] }
 0x150   :  { %2073 = vmatpush.bf16.msrb.mxu0 %v4127_v41  ;;  %v4079_v13 = vor.u32 %v4815_v46, %v4078_v10 }
 0x151   :  { %v5627_v34 = vmax.f32 %v620_v47, %v729_v33  ;;  %v730_v52 = vsel %vm685_vm4, %v723_v12, %v729_v33  ;;  %v4825_v12 = vld [vmem:[%s7499_s2 + $0xd4] sm:$0xf0]  ;;  %v4103_v47 = vor.u32 %v4821_v31, %v4102_v40  ;;  %v4031_v33 = vor.u32 %v4803_v51, %v4030_v27 }
 0x152   :  { %v5631_v50 = vmax.f32 %v617_v37, %v730_v52  ;;  %5040 = vrot.lane.b32.xlu2 %v5039_v42, %s5115_s26  ;;  %v5116_v37 = vmov 0   ;;  %v4119_v44 = vor.u32 %v4825_v12, %v4118_v6  ;;  %v4095_v52 = vor.u32 %v4819_v55, %v4094_v2  ;;  %v4022_v42 = vld [vmem:[%s7499_s2 + $0x10] sm:$0xf] }
 0x153   :  { %v5044_v32 = vpack.i.bf16 %v5619_v20, %v5627_v34  ;;  %30 = vst.msk [vmem:[#allocation2 + $0x8] sm:$0xf] %vm29_vm5, %v5116_v37  ;;  %2045 = vmatpush.bf16.msra.mxu3 %v4055_v60 }
 0x154   :  { %v5049_v26 = vpack.i.bf16 %v5631_v50, %v5623_v48  ;;  %32 = vst.msk [vmem:[#allocation2 + $0x14] sm:$0xf] %vm29_vm5, %v5116_v37  ;;  %2074 = vmatpush.bf16.msrb.mxu0 %v4119_v44 }
 0x155   :  { %5045 = vrot.lane.b32.xlu0 %v5044_v32, %s5115_s26  ;;  %34 = vst.msk [vmem:[#allocation2 + $0x20] sm:$0xf] %vm29_vm5, %v5116_v37  ;;  %v4801_v32 = vld [vmem:[%s7499_s2 + $0x14] sm:$0xf0] }
 0x156   :  { %5050 = vrot.lane.b32.xlu1 %v5049_v26, %s5115_s26  ;;  %36 = vst.msk [vmem:[#allocation2 + $0x2c] sm:$0xf] %vm29_vm5, %v5116_v37  ;;  %v4086_v26 = vld [vmem:[%s7499_s2 + $0x90] sm:$0xf]  ;;  %v4023_v36 = vor.u32 %v4801_v32, %v4022_v42 }
 0x157   :  { %38 = vst.msk [vmem:[#allocation2 + $0x38] sm:$0xf] %vm29_vm5, %v5116_v37  ;;  %2046 = vmatpush.bf16.msra.mxu3 %v4047_v16  ;;  %v4087_v56 = vor.u32 %v4817_v54, %v4086_v26 }
 0x158   :  { %40 = vst.msk [vmem:[#allocation2 + $0x44] sm:$0xf] %vm29_vm5, %v5116_v37  ;;  %2075 = vmatpush.bf16.msrb.mxu0 %v4111_v8 }
 0x159   :  { %42 = vst.msk [vmem:[#allocation2 + $0x50] sm:$0xf] %vm29_vm5, %v5116_v37 }
 0x15a   :  { %43 = vst [vmem:[#allocation2 + $0x54] sm:$0xff] %v5116_v37 }
 0x15b   :  { %44 = vst.msk [vmem:[#allocation2 + $0x5c] sm:$0xf] %vm29_vm5, %v5116_v37  ;;  %2047 = vmatpush.bf16.msra.mxu3 %v4039_v5  ;;  %vm45_vm5 = vcmask 1043456  }
 0x15c   :  { %56 = vst [vmem:[#allocation4] sm:$0xf] %v5116_v37  ;;  %2076 = vmatpush.bf16.msrb.mxu0 %v4103_v47  ;;  %vm7113_vm9 = vmor %vm2857_vm8, %vm45_vm5 }
 0x15d   :  { %57 = vst [vmem:[#allocation4 + $0x4] sm:$0xf] %v5116_v37 }
 0x15e   :  { %60 = vst [vmem:[#allocation4 + $0x10] sm:$0xf] %v5116_v37 }
 0x15f   :  { %61 = vst [vmem:[#allocation4 + $0x14] sm:$0xf] %v5116_v37  ;;  %2048 = vmatpush.bf16.msra.mxu3 %v4031_v33 }
 0x160   :  { %2077 = vmatpush.bf16.msrb.mxu0 %v4095_v52 }
 0x163   :  { %2049 = vmatpush.bf16.msra.mxu3 %v4023_v36 }
 0x164   :  { %2078 = vmatpush.bf16.msrb.mxu0 %v4087_v56 }
 0x167   :  { %2050 = vmatpush.bf16.msra.mxu3 %v4015_v25 }
 0x168   :  { %2079 = vmatpush.bf16.msrb.mxu0 %v4079_v13 }
 0x17b   :  { %v4996_v35 = vpop.permute.xlu2 %4995 }
 0x17c   :  { %v4998_v14 = vunpack.i.h.bf16 %v4996_v35  ;;  %v4997_v41 = vunpack.i.l.bf16 %v4996_v35 }
 0x17e   :  { %v892_v59 = vsel %vm891_vm6, %v4997_v41, %v4998_v14 }
 0x17f   :  { %v932_v44 = vmax.f32 %v5422_v57, %v892_v59 }
 0x193   :  { %v5011_v2 = vpop.permute.xlu2 %5010 }
 0x19b   :  { %v5001_v0 = vpop.permute.xlu0 %5000 }
 0x19c   :  { %v5002_v60 = vunpack.i.l.bf16 %v5001_v0  ;;  %v5003_v17 = vunpack.i.h.bf16 %v5001_v0 }
 0x19e   :  { %v893_v6 = vsel %vm891_vm6, %v4998_v14, %v5002_v60  ;;  %v934_v12 = vmax.f32 %v5456_v43, %v5002_v60 }
 0x19f   :  { %v933_v19 = vmax.f32 %v5424_v58, %v893_v6 }
 0x1a0   :  { %v957_v22 = vpack.c.bf16 %v934_v12, %v934_v12 }
 0x1a1   :  { %v956_v16 = vpack.c.bf16 %v933_v19, %v932_v44  ;;  %v5006_v24 = vpop.permute.xlu1 %5005 }
 0x1a2   :  { %974 = vst.msk [vmem:[#allocation2 + $0x8] sm:$0xf] %vm973_vm7, %v957_v22  ;;  %v5008_v8 = vunpack.i.h.bf16 %v5006_v24  ;;  %v5007_v28 = vunpack.i.l.bf16 %v5006_v24 }
 0x1a3   :  { %972 = vst [vmem:[#allocation2] sm:$0xff] %v956_v16  ;;  %v1042_v47 = vunpack.c.l.b16 %v956_v16  ;;  %v1043_v27 = vunpack.c.h.b16 %v956_v16 }
 0x1a4   :  { %v937_v30 = vmax.f32 %v5485_v15, %v5008_v8  ;;  %v894_v5 = vsel %vm891_vm6, %v5003_v17, %v5007_v28  ;;  %v895_v43 = vsel %vm891_vm6, %v5007_v28, %v5008_v8  ;;  %v5026_v52 = vpop.permute.xlu2 %5025 }
 0x1a5   :  { %v935_v57 = vmax.f32 %v5459_v45, %v894_v5  ;;  %v936_v40 = vmax.f32 %v5465_v53, %v895_v43  ;;  %v5013_v45 = vunpack.i.h.bf16 %v5011_v2  ;;  %v5012_v53 = vunpack.i.l.bf16 %v5011_v2 }
 0x1a6   :  { %v959_v58 = vpack.c.bf16 %v937_v30, %v937_v30  ;;  %v5028_v36 = vunpack.i.h.bf16 %v5026_v52  ;;  %v5027_v54 = vunpack.i.l.bf16 %v5026_v52 }
 0x1a7   :  { %v958_v31 = vpack.c.bf16 %v936_v40, %v935_v57  ;;  %v896_v32 = vsel %vm891_vm6, %v5012_v53, %v5013_v45 }
 0x1a8   :  { %976 = vst.msk [vmem:[#allocation2 + $0x14] sm:$0xf] %vm973_vm7, %v959_v58  ;;  %v938_v13 = vmax.f32 %v5517_v1, %v896_v32 }
 0x1a9   :  { %v5772_v51 = vunpack.c.l.b16 %v958_v31  ;;  %v5774_v33 = vunpack.c.h.b16 %v958_v31 }
 0x1aa   :  { %v1018_v44 = vld [vmem:[#allocation2] sm:$0xee] }
 0x1ab   :  { %v5777_v15 = vpack.c.b16 %v5772_v51, %v1042_v47  ;;  %v5780_v55 = vpack.c.b16 %v5774_v33, %v1043_v27 }
 0x1ac   :  { %v5041_v19 = vpop.permute.xlu2 %5040 }
 0x1ad   :  { %2051 = vmatmul.bf16.vlgmr.msra.gmra.mxu3 %v5777_v15  ;;  %2080 = vmatmul.bf16.vlgmr.msrb.gmra.mxu0 %v5780_v55  ;;  %v5043_v17 = vunpack.i.h.bf16 %v5041_v19  ;;  %v5042_v5 = vunpack.i.l.bf16 %v5041_v19 }
 0x1b7   :  { %v5016_v42 = vpop.permute.xlu0 %5015 }
 0x1b8   :  { %v5017_v26 = vunpack.i.l.bf16 %v5016_v42  ;;  %v5018_v56 = vunpack.i.h.bf16 %v5016_v42  ;;  %v5021_v7 = vpop.permute.xlu1 %5020 }
 0x1b9   :  { %v5023_v25 = vunpack.i.h.bf16 %v5021_v7  ;;  %v5022_v46 = vunpack.i.l.bf16 %v5021_v7 }
 0x1ba   :  { %v897_v21 = vsel %vm891_vm6, %v5013_v45, %v5017_v26  ;;  %v940_v10 = vmax.f32 %v5549_v49, %v5017_v26  ;;  %v900_v49 = vsel %vm891_vm6, %v5027_v54, %v5028_v36 }
 0x1bb   :  { %v939_v35 = vmax.f32 %v5520_v4, %v897_v21  ;;  %v943_v41 = vmax.f32 %v5564_v11, %v5023_v25  ;;  %v898_v0 = vsel %vm891_vm6, %v5018_v56, %v5022_v46  ;;  %v899_v59 = vsel %vm891_vm6, %v5022_v46, %v5023_v25 }
 0x1bc   :  { %v961_v14 = vpack.c.bf16 %v940_v10, %v940_v10  ;;  %v941_v6 = vmax.f32 %v5552_v61, %v898_v0  ;;  %v942_v12 = vmax.f32 %v5555_v63, %v899_v59  ;;  %v1090_v11 = vunpack.c.l.b16 %v1018_v44 }
 0x1bd   :  { %v960_v60 = vpack.c.bf16 %v939_v35, %v938_v13  ;;  %v963_v1 = vpack.c.bf16 %v943_v41, %v943_v41  ;;  %v944_v22 = vmax.f32 %v5580_v18, %v900_v49  ;;  %v1091_v63 = vunpack.c.h.b16 %v1018_v44  ;;  %v4843_v49 = vld [vmem:[%s7499_s2 + $0x164] sm:$0xf0] }
 0x1be   :  { %978 = vst.msk [vmem:[#allocation2 + $0x20] sm:$0xf] %vm973_vm7, %v961_v14  ;;  %v962_v4 = vpack.c.bf16 %v942_v12, %v941_v6  ;;  %v1096_v40 = vpack.c.b16 %v5772_v51, %v1090_v11 }
 0x1bf   :  { %977 = vst [vmem:[#allocation2 + $0x18] sm:$0xff] %v960_v60  ;;  %v5031_v16 = vpop.permute.xlu0 %5030  ;;  %v1097_v53 = vpack.c.b16 %v5774_v33, %v1091_v63 }
 0x1c0   :  { %980 = vst.msk [vmem:[#allocation2 + $0x2c] sm:$0xf] %vm973_vm7, %v963_v1  ;;  %v5032_v61 = vunpack.i.l.bf16 %v5031_v16  ;;  %v5036_v24 = vpop.permute.xlu1 %5035  ;;  %v5033_v8 = vunpack.i.h.bf16 %v5031_v16  ;;  %v1103_v56 = vrot.slane %v1096_v40, 1  ;;  %v999_v1 = vld [vmem:[#allocation2 + $0x5c] sm:$0x7] }
 0x1c1   :  { %979 = vst [vmem:[#allocation2 + $0x24] sm:$0xff] %v962_v4  ;;  %v5038_v28 = vunpack.i.h.bf16 %v5036_v24  ;;  %v5037_v30 = vunpack.i.l.bf16 %v5036_v24  ;;  %v1106_v7 = vrot.slane %v1097_v53, 1 }
 0x1c2   :  { %v901_v43 = vsel %vm891_vm6, %v5028_v36, %v5032_v61  ;;  %v946_v57 = vmax.f32 %v5603_v38, %v5032_v61  ;;  %v906_v36 = vsel %vm891_vm6, %v5042_v5, %v5043_v17 }
 0x1c3   :  { %v945_v18 = vmax.f32 %v5583_v23, %v901_v43  ;;  %v949_v58 = vmax.f32 %v5612_v3, %v5038_v28  ;;  %v902_v31 = vsel %vm891_vm6, %v5033_v8, %v5037_v30  ;;  %v903_v47 = vsel %vm891_vm6, %v5037_v30, %v5038_v28 }
 0x1c4   :  { %v965_v27 = vpack.c.bf16 %v946_v57, %v946_v57  ;;  %v947_v2 = vmax.f32 %v5606_v62, %v902_v31  ;;  %v948_v45 = vmax.f32 %v5609_v39, %v903_v47  ;;  %v953_v59 = vmax.f32 %v5597_v29, %v906_v36  ;;  %v994_v29 = vld [vmem:[#allocation2 + $0x54] sm:$0x77]  ;;  %v5867_v31 = vld [vmem:[#allocation2] sm:$0xcc]  ;;  %v4262_v47 = vld [vmem:[%s7499_s2 + $0x1f0] sm:$0xf] }
 0x1c5   :  { %v964_v52 = vpack.c.bf16 %v945_v18, %v944_v22  ;;  %v967_v42 = vpack.c.bf16 %v949_v58, %v949_v58 }
 0x1c6   :  { %v3990_v38 = vld [vmem:[#allocation2 + $0x18] sm:$0xf]  ;;  %v4792_v32 = vld [vmem:[#allocation2 + $0x1c] sm:$0xf]  ;;  %982 = vst.msk [vmem:[#allocation2 + $0x38] sm:$0xf] %vm973_vm7, %v965_v27  ;;  %v966_v23 = vpack.c.bf16 %v948_v45, %v947_v2 }
 0x1c7   :  { %981 = vst [vmem:[#allocation2 + $0x30] sm:$0xff] %v964_v52  ;;  %v5046_v39 = vpop.permute.xlu0 %5045  ;;  %v4861_v52 = vld [vmem:[%s7499_s2 + $0x1f4] sm:$0xf0] }
 0x1c8   :  { %v4793_v3 = vld [vmem:[#allocation2 + $0x20] sm:$0xf0]  ;;  %v3992_v26 = vld [vmem:[#allocation2 + $0x24] sm:$0xf0]  ;;  %984 = vst.msk [vmem:[#allocation2 + $0x44] sm:$0xf] %vm973_vm7, %v967_v42  ;;  %v5048_v10 = vunpack.i.h.bf16 %v5046_v39  ;;  %v5047_v25 = vunpack.i.l.bf16 %v5046_v39  ;;  %v5051_v46 = vpop.permute.xlu1 %5050  ;;  %v1170_v39 = vunpack.c.h.b16 %v5867_v31 }
 0x1c9   :  { %v5810_v54 = vor.u32 %v4793_v3, %v3990_v38  ;;  %v5812_v62 = vor.u32 %v4792_v32, %v3992_v26  ;;  %983 = vst [vmem:[#allocation2 + $0x3c] sm:$0xff] %v966_v23  ;;  %v5053_v41 = vunpack.i.h.bf16 %v5051_v46  ;;  %v5052_v0 = vunpack.i.l.bf16 %v5051_v46  ;;  %v4198_v42 = vld [vmem:[%s7499_s2 + $0x170] sm:$0xf]  ;;  %v4845_v38 = vld [vmem:[%s7499_s2 + $0x174] sm:$0xf0] }
 0x1ca   :  { %v907_v60 = vsel %vm891_vm6, %v5043_v17, %v5047_v25  ;;  %v955_v6 = vmax.f32 %v5627_v34, %v5047_v25  ;;  %v1005_v32 = vld [vmem:[#allocation2 + $0x14] sm:$0xf]  ;;  %v4263_v23 = vor.u32 %v4861_v52, %v4262_v47  ;;  %v4199_v3 = vor.u32 %v4845_v38, %v4198_v42  ;;  %v3998_v46 = vld [vmem:[#allocation2 + $0x20] sm:$0xf] }
 0x1cb   :  { %2056 = vmatmul.bf16.gmra.mxu3 %v5810_v54  ;;  %2085 = vmatmul.bf16.gmra.mxu0 %v5812_v62  ;;  %v1104_v13 = vrot.slane %v5810_v54, 1  ;;  %v1107_v35 = vrot.slane %v5812_v62, 1  ;;  %v954_v4 = vmax.f32 %v5599_v9, %v907_v60  ;;  %v952_v19 = vmax.f32 %v5631_v50, %v5053_v41  ;;  %v4254_v60 = vld [vmem:[%s7499_s2 + $0x1e0] sm:$0xf] }
 0x1cc   :  { %v971_v34 = vpack.c.bf16 %v955_v6, %v955_v6  ;;  %v904_v11 = vsel %vm891_vm6, %v5048_v10, %v5052_v0  ;;  %v905_v22 = vsel %vm891_vm6, %v5052_v0, %v5053_v41  ;;  %2130 = vmatpush.bf16.msrb.mxu2 %v4263_v23  ;;  %2101 = vmatpush.bf16.msrb.mxu1 %v4199_v3  ;;  %v5890_v25 = vunpack.c.l.b16 %v1005_v32 }
 0x1cd   :  { %v1105_v12 = vsel %vm685_vm4, %v1103_v56, %v1104_v13  ;;  %v1108_v44 = vsel %vm685_vm4, %v1106_v7, %v1107_v35  ;;  %v970_v16 = vpack.c.bf16 %v954_v4, %v953_v59  ;;  %v969_v9 = vpack.c.bf16 %v952_v19, %v952_v19  ;;  %v4794_v56 = vld [vmem:[#allocation2 + $0x28] sm:$0xf0]  ;;  %v1019_v7 = vld [vmem:[#allocation2 + $0x8] sm:$0xe] }
 0x1ce   :  { %1124 = vrot.lane.b32.xlu2 %v1105_v12, %s5117_s16  ;;  %1126 = vrot.lane.b32.xlu0 %v1108_v44, %s5117_s16  ;;  %v950_v50 = vmax.f32 %v5619_v20, %v904_v11  ;;  %v951_v61 = vmax.f32 %v5623_v48, %v905_v22  ;;  %v1000_v24 = vsel %vm5838_vm15, %v971_v34, %v999_v1  ;;  %v4002_v8 = vld [vmem:[#allocation2 + $0x30] sm:$0xf]  ;;  %v4795_v28 = vld [vmem:[#allocation2 + $0x34] sm:$0xf]  ;;  %v1092_v41 = vunpack.c.l.b16 %v1019_v7  ;;  %v4859_v12 = vld [vmem:[%s7499_s2 + $0x1e4] sm:$0xf0] }
 0x1cf   :  { %v995_v63 = vsel %vm993_vm0, %v970_v16, %v994_v29  ;;  %1001 = vst [vmem:[#allocation2 + $0x5c] sm:$0x7] %v1000_v24  ;;  %v5895_v14 = vor.u32 %v4794_v56, %v3998_v46  ;;  %v1176_v59 = vpack.c.b16 %v5774_v33, %v1170_v39  ;;  %v4190_v44 = vld [vmem:[%s7499_s2 + $0x160] sm:$0xf]  ;;  %v1186_v33 = vrot.slane %v5812_v62, 2 }
 0x1d0   :  { %v968_v17 = vpack.c.bf16 %v951_v61, %v950_v50  ;;  %996 = vst [vmem:[#allocation2 + $0x54] sm:$0x77] %v995_v63  ;;  %v4796_v30 = vld [vmem:[#allocation2 + $0x38] sm:$0xf0]  ;;  %v4004_v5 = vld [vmem:[#allocation2 + $0x3c] sm:$0xf0]  ;;  %v1098_v6 = vpack.c.b16 %v5890_v25, %v1092_v41  ;;  %v4255_v1 = vor.u32 %v4859_v12, %v4254_v60  ;;  %v4191_v29 = vor.u32 %v4843_v49, %v4190_v44 }
 0x1d1   :  { %986 = vst.msk [vmem:[#allocation2 + $0x50] sm:$0xf] %vm973_vm7, %v969_v9  ;;  %v5857_v43 = vor.u32 %v4796_v30, %v4002_v8  ;;  %v5859_v57 = vor.u32 %v4795_v28, %v4004_v5  ;;  %v1110_v4 = vrot.slane %v5895_v14, 1  ;;  %v4797_v19 = vld [vmem:[#allocation2 + $0x40] sm:$0xf0]  ;;  %v1185_v22 = vrot.slane %v1176_v59, 2 }
 0x1d2   :  { %v5872_v27 = vunpack.c.l.b16 %v968_v17  ;;  %v5874_v2 = vunpack.c.h.b16 %v968_v17  ;;  %v1023_v16 = vld [vmem:[#allocation2 + $0x8] sm:$0xc]  ;;  %2131 = vmatpush.bf16.msrb.mxu2 %v4255_v1  ;;  %v1109_v9 = vrot.slane %v1098_v6, 1  ;;  %v4010_v50 = vld [vmem:[#allocation2 + $0x38] sm:$0xf]  ;;  %v1169_v61 = vunpack.c.l.b16 %v5867_v31  ;;  %2102 = vmatpush.bf16.msrb.mxu1 %v4191_v29 }
 0x1d3   :  { %v1114_v20 = vrot.slane %v5859_v57, 1  ;;  %v1112_v48 = vrot.slane %v5857_v43, 1  ;;  %v1187_v24 = vsel %vm1181_vm1, %v1185_v22, %v1186_v33  ;;  %v5919_v63 = vor.u32 %v4797_v19, %v4010_v50  ;;  %v4246_v5 = vld [vmem:[%s7499_s2 + $0x1d0] sm:$0xf]  ;;  %v4841_v31 = vld [vmem:[%s7499_s2 + $0x154] sm:$0xf0] }
 0x1d4   :  { %v1111_v17 = vsel %vm685_vm4, %v1109_v9, %v1110_v4  ;;  %v1171_v8 = vunpack.c.l.b16 %v1023_v16  ;;  %v1183_v52 = vrot.slane %v5810_v54, 2  ;;  %v1189_v42 = vrot.slane %v5895_v14, 2  ;;  %v4837_v59 = vld [vmem:[%s7499_s2 + $0x134] sm:$0xf0]  ;;  %v4158_v60 = vld [vmem:[%s7499_s2 + $0x120] sm:$0xf] }
 0x1d5   :  { %v1115_v40 = vsel %vm685_vm4, %v1107_v35, %v1114_v20  ;;  %v1113_v18 = vsel %vm685_vm4, %v1104_v13, %v1112_v48  ;;  %v1116_v47 = vrot.slane %v5919_v63, 1  ;;  %v4835_v49 = vld [vmem:[%s7499_s2 + $0x124] sm:$0xf0]  ;;  %v4230_v1 = vld [vmem:[%s7499_s2 + $0x1b0] sm:$0xf]  ;;  %v1193_v19 = vrot.slane %v5859_v57, 2 }
 0x1d6   :  { %1132 = vrot.lane.b32.xlu2 %v1115_v40, %s5117_s16  ;;  %1130 = vrot.lane.b32.xlu1 %v1113_v18, %s5117_s16  ;;  %v1177_v40 = vpack.c.b16 %v5890_v25, %v1171_v8  ;;  %v1025_v7 = vld [vmem:[#allocation2 + $0x5c] sm:$0xf]  ;;  %v4159_v22 = vor.u32 %v4835_v49, %v4158_v60  ;;  %v4390_v60 = vld [vmem:[%s7499_s2 + $0x2f0] sm:$0xf]  ;;  %vm46_vm6 = vcmask 523268  }
 0x1d7   :  { %v1020_v58 = vld [vmem:[#allocation2 + $0x54] sm:$0x77]  ;;  %v1117_v3 = vsel %vm685_vm4, %v1110_v4, %v1116_v47  ;;  %v1174_v12 = vunpack.c.l.b16 %v1025_v7  ;;  %vm7030_vm7 = vmor %vm46_vm6, %vm45_vm5 }
 0x1d8   :  { %v1093_v45 = vunpack.c.l.b16 %v1020_v58  ;;  %v1094_v53 = vunpack.c.h.b16 %v1020_v58  ;;  %v1016_v0 = vld [vmem:[#allocation2 + $0x54] sm:$0x33]  ;;  %v4182_v58 = vld [vmem:[%s7499_s2 + $0x150] sm:$0xf]  ;;  %v1188_v32 = vrot.slane %v1177_v40, 2  ;;  %48 = vst.msk [vmem:[#allocation3] sm:$0xff] %vm7030_vm7, %v5116_v37 }
 0x1d9   :  { %v1063_v34 = vunpack.c.l.b16 %v1016_v0  ;;  %v1064_v11 = vunpack.c.h.b16 %v1016_v0  ;;  %v1015_v56 = vld [vmem:[#allocation2 + $0x50] sm:$0xf]  ;;  %v1024_v46 = vld [vmem:[#allocation2 + $0x54] sm:$0xff]  ;;  %v4142_v40 = vld [vmem:[%s7499_s2 + $0x100] sm:$0xf]  ;;  %49 = vst.msk [vmem:[#allocation3 + $0x8] sm:$0xff] %vm7030_vm7, %v5116_v37 }
 0x1da   :  { %v1099_v26 = vpack.c.b16 %v1093_v45, %v5872_v27  ;;  %v1100_v36 = vpack.c.b16 %v1094_v53, %v5874_v2  ;;  %v4183_v45 = vor.u32 %v4841_v31, %v4182_v58  ;;  %v4839_v53 = vld [vmem:[%s7499_s2 + $0x144] sm:$0xf0]  ;;  %v1190_v39 = vsel %vm1181_vm1, %v1188_v32, %v1189_v42  ;;  %v4166_v0 = vld [vmem:[%s7499_s2 + $0x130] sm:$0xf]  ;;  %v4853_v4 = vld [vmem:[%s7499_s2 + $0x1b4] sm:$0xf0] }
 0x1db   :  { %2061 = vmatmul.bf16.gmra.mxu3 %v5857_v43  ;;  %2090 = vmatmul.bf16.gmra.mxu0 %v5859_v57  ;;  %v5924_v28 = vpack.c.b16 %v1063_v34, %v5872_v27  ;;  %v5927_v30 = vpack.c.b16 %v1064_v11, %v5874_v2  ;;  %v5981_v6 = vunpack.c.l.b16 %v1015_v56  ;;  %v4167_v44 = vor.u32 %v4837_v59, %v4166_v0  ;;  %v4326_v56 = vld [vmem:[%s7499_s2 + $0x270] sm:$0xf]  ;;  %v4875_v59 = vld [vmem:[%s7499_s2 + $0x264] sm:$0xf0] }
 0x1dc   :  { %v1118_v21 = vrot.slane %v1099_v26, 1  ;;  %v1120_v10 = vrot.slane %v1100_v36, 1  ;;  %2103 = vmatpush.bf16.msrb.mxu1 %v4183_v45  ;;  %v1195_v26 = vrot.slane %v5919_v63, 2  ;;  %v1173_v29 = vunpack.c.h.b16 %v1024_v46  ;;  %50 = vst.msk [vmem:[#allocation3 + $0x10] sm:$0xff] %vm7030_vm7, %v5116_v37 }
 0x1dd   :  { %v4231_v11 = vor.u32 %v4853_v4, %v4230_v1  ;;  %v1180_v50 = vpack.c.b16 %v1174_v12, %v5981_v6  ;;  %v1172_v58 = vunpack.c.l.b16 %v1024_v46  ;;  %v1003_v46 = vld [vmem:[#allocation2 + $0x8] sm:$0xf]  ;;  %v4893_v12 = vld [vmem:[%s7499_s2 + $0x2f4] sm:$0xf0]  ;;  %v4454_v1 = vld [vmem:[%s7499_s2 + $0x370] sm:$0xf] }
 0x1de   :  { %1142 = vrot.lane.b32.xlu2 %v1118_v21, %s5117_s16  ;;  %v1121_v13 = vsel %vm685_vm4, %v1114_v20, %v1120_v10  ;;  %v1119_v35 = vsel %vm685_vm4, %v1112_v48, %v1118_v21  ;;  %v4857_v20 = vld [vmem:[%s7499_s2 + $0x1d4] sm:$0xf0]  ;;  %v1175_v48 = vpack.c.b16 %v5772_v51, %v1169_v61  ;;  %v4174_v51 = vld [vmem:[%s7499_s2 + $0x140] sm:$0xf]  ;;  %v1021_v21 = vld [vmem:[#allocation2 + $0x5c] sm:$0x7]  ;;  %v1196_v9 = vsel %vm1181_vm1, %v1189_v42, %v1195_v26 }
 0x1df   :  { %1138 = vrot.lane.b32.xlu1 %v1121_v13, %s5117_s16  ;;  %1136 = vrot.lane.b32.xlu0 %v1119_v35, %s5117_s16  ;;  %v4247_v18 = vor.u32 %v4857_v20, %v4246_v5  ;;  %v4175_v23 = vor.u32 %v4839_v53, %v4174_v51  ;;  %v4238_v13 = vld [vmem:[%s7499_s2 + $0x1c0] sm:$0xf]  ;;  %v4855_v35 = vld [vmem:[%s7499_s2 + $0x1c4] sm:$0xf0]  ;;  %v1095_v34 = vunpack.c.l.b16 %v1021_v21  ;;  %v1179_v8 = vpack.c.b16 %v1173_v29, %v5874_v2 }
 0x1e0   :  { %v1182_v38 = vrot.slane %v1175_v48, 2  ;;  %v4239_v41 = vor.u32 %v4855_v35, %v4238_v13  ;;  %v4150_v61 = vld [vmem:[%s7499_s2 + $0x110] sm:$0xf]  ;;  %v1201_v48 = vrot.slane %v1180_v50, 2  ;;  %v4877_v21 = vld [vmem:[%s7499_s2 + $0x274] sm:$0xf0]  ;;  %v4391_v49 = vor.u32 %v4893_v12, %v4390_v60 }
 0x1e1   :  { %2132 = vmatpush.bf16.msrb.mxu2 %v4247_v18  ;;  %2104 = vmatpush.bf16.msrb.mxu1 %v4175_v23  ;;  %v1101_v5 = vpack.c.b16 %v1095_v34, %v5981_v6  ;;  %v1199_v18 = vrot.slane %v1179_v8, 2  ;;  %v4214_v23 = vld [vmem:[%s7499_s2 + $0x190] sm:$0xf]  ;;  %v4510_v13 = vld [vmem:[%s7499_s2 + $0x3e0] sm:$0xf]  ;;  %51 = vst.msk [vmem:[#allocation3 + $0x18] sm:$0xff] %vm7030_vm7, %v5116_v37 }
 0x1e2   :  { %v1184_v36 = vsel %vm1181_vm1, %v1182_v38, %v1183_v52  ;;  %v1202_v45 = vsel %vm1181_vm1, %v1195_v26, %v1201_v48  ;;  %v4923_v35 = vld [vmem:[%s7499_s2 + $0x3e4] sm:$0xf0]  ;;  %v4909_v4 = vld [vmem:[%s7499_s2 + $0x374] sm:$0xf0]  ;;  %2188 = vmatpush.bf16.msra.mxu0 %v4391_v49  ;;  %52 = vst.msk [vmem:[#allocation3 + $0x20] sm:$0xff] %vm7030_vm7, %v5116_v37 }
 0x1e3   :  { %v1122_v2 = vrot.slane %v1101_v5, 1  ;;  %v1200_v51 = vsel %vm1181_vm1, %v1193_v19, %v1199_v18  ;;  %v4511_v0 = vor.u32 %v4923_v35, %v4510_v13  ;;  %v4455_v29 = vor.u32 %v4909_v4, %v4454_v1  ;;  %v4865_v13 = vld [vmem:[%s7499_s2 + $0x214] sm:$0xf0]  ;;  %v4903_v12 = vld [vmem:[%s7499_s2 + $0x344] sm:$0xf0]  ;;  %53 = vst.msk [vmem:[#allocation3 + $0x28] sm:$0xff] %vm7030_vm7, %v5116_v37 }
 0x1e4   :  { %v4917_v49 = vld [vmem:[%s7499_s2 + $0x3b4] sm:$0xf0]  ;;  %54 = vst.msk [vmem:[#allocation3 + $0x30] sm:$0xff] %vm7030_vm7, %v5116_v37 }
 0x1e5   :  { %2133 = vmatpush.bf16.msrb.mxu2 %v4239_v41  ;;  %2105 = vmatpush.bf16.msrb.mxu1 %v4167_v44  ;;  %v1123_v53 = vsel %vm685_vm4, %v1116_v47, %v1122_v2  ;;  %v4222_v47 = vld [vmem:[%s7499_s2 + $0x1a0] sm:$0xf]  ;;  %vm2030_vm4 = vcmask 916480   ;;  %55 = vst.msk [vmem:[#allocation3 + $0x38] sm:$0xff] %vm7030_vm7, %v5116_v37 }
 0x1e6   :  { %1205 = vrot.lane.b32.xlu2 %v1187_v24, %s5118_s7  ;;  %v4833_v24 = vld [vmem:[%s7499_s2 + $0x114] sm:$0xf0]  ;;  %v4318_v41 = vld [vmem:[%s7499_s2 + $0x260] sm:$0xf] }
 0x1e7   :  { %1128 = vrot.lane.b32.xlu1 %v1111_v17, %s5117_s16  ;;  %1144 = vrot.lane.b32.xlu0 %v1120_v10, %s5117_s16  ;;  %v1191_v10 = vrot.slane %v5857_v43, 2  ;;  %v1194_v17 = vsel %vm1181_vm1, %v1186_v33, %v1193_v19  ;;  %v4151_v20 = vor.u32 %v4833_v24, %v4150_v61  ;;  %v4831_v33 = vld [vmem:[%s7499_s2 + $0x104] sm:$0xf0]  ;;  %v4319_v44 = vor.u32 %v4875_v59, %v4318_v41  ;;  %v4502_v24 = vld [vmem:[%s7499_s2 + $0x3d0] sm:$0xf] }
 0x1e8   :  { %v4143_v31 = vor.u32 %v4831_v33, %v4142_v40  ;;  %v1044_v19 = vunpack.c.l.b16 %v1003_v46  ;;  %v4891_v61 = vld [vmem:[%s7499_s2 + $0x2e4] sm:$0xf0]  ;;  %v4302_v33 = vld [vmem:[%s7499_s2 + $0x240] sm:$0xf]  ;;  %v4278_v46 = vld [vmem:[%s7499_s2 + $0x210] sm:$0xf] }
 0x1e9   :  { %v1192_v16 = vsel %vm1181_vm1, %v1183_v52, %v1191_v10  ;;  %2134 = vmatpush.bf16.msrb.mxu2 %v4231_v11  ;;  %2106 = vmatpush.bf16.msrb.mxu1 %v4159_v22  ;;  %v1178_v52 = vpack.c.b16 %v1172_v58, %v5872_v27  ;;  %v4851_v27 = vld [vmem:[%s7499_s2 + $0x1a4] sm:$0xf0]  ;;  %v4310_v22 = vld [vmem:[%s7499_s2 + $0x250] sm:$0xf]  ;;  %v4430_v59 = vld [vmem:[%s7499_s2 + $0x340] sm:$0xf]  ;;  %v4279_v60 = vor.u32 %v4865_v13, %v4278_v46 }
 0x1ea   :  { %v4223_v32 = vor.u32 %v4851_v27, %v4222_v47  ;;  %v1068_v34 = vpack.c.b16 %v5890_v25, %v1044_v19  ;;  %v4374_v58 = vld [vmem:[%s7499_s2 + $0x2d0] sm:$0xf]  ;;  %v4431_v4 = vor.u32 %v4903_v12, %v4430_v59  ;;  %v4897_v46 = vld [vmem:[%s7499_s2 + $0x314] sm:$0xf0]  ;;  %v4462_v59 = vld [vmem:[%s7499_s2 + $0x380] sm:$0xf] }
 0x1eb   :  { %2066 = vmatmul.bf16.gmra.mxu3 %v5924_v28  ;;  %2095 = vmatmul.bf16.gmra.mxu0 %v5927_v30  ;;  %v1197_v42 = vrot.slane %v1178_v52, 2  ;;  %v4494_v52 = vld [vmem:[%s7499_s2 + $0x3c0] sm:$0xf]  ;;  %v4358_v41 = vld [vmem:[%s7499_s2 + $0x2b0] sm:$0xf] }
 0x1ec   :  { %v4812_v12 = vld [vmem:[%s7499_s2 + $0x74] sm:$0xf] }
 0x1ed   :  { %2107 = vmatpush.bf16.msrb.mxu1 %v4151_v20  ;;  %v1198_v38 = vsel %vm1181_vm1, %v1191_v10, %v1197_v42  ;;  %2135 = vmatpush.bf16.msrb.mxu2 %v4223_v32  ;;  %v4327_v10 = vor.u32 %v4877_v21, %v4326_v56  ;;  %v4446_v20 = vld [vmem:[%s7499_s2 + $0x360] sm:$0xf]  ;;  %v4867_v56 = vld [vmem:[%s7499_s2 + $0x224] sm:$0xf0] }
 0x1ee   :  { %1134 = vrot.lane.b32.xlu2 %v1117_v3, %s5117_s16  ;;  %v4849_v3 = vld [vmem:[%s7499_s2 + $0x194] sm:$0xf0] }
 0x1ef   :  { %1203 = vrot.lane.b32.xlu1 %v1184_v36, %s5118_s7  ;;  %1207 = vrot.lane.b32.xlu0 %v1190_v39, %s5118_s7  ;;  %v4215_v26 = vor.u32 %v4849_v3, %v4214_v23  ;;  %v4206_v36 = vld [vmem:[%s7499_s2 + $0x180] sm:$0xf]  ;;  %v4847_v39 = vld [vmem:[%s7499_s2 + $0x184] sm:$0xf0] }
 0x1f0   :  { %v4207_v7 = vor.u32 %v4847_v39, %v4206_v36  ;;  %2159 = vmatpush.bf16.msrb.mxu3 %v4327_v10  ;;  %v4438_v23 = vld [vmem:[%s7499_s2 + $0x350] sm:$0xf]  ;;  %v4905_v3 = vld [vmem:[%s7499_s2 + $0x354] sm:$0xf0]  ;;  %v4286_v39 = vld [vmem:[%s7499_s2 + $0x220] sm:$0xf] }
 0x1f1   :  { %2108 = vmatpush.bf16.msrb.mxu1 %v4143_v31  ;;  %2136 = vmatpush.bf16.msrb.mxu2 %v4215_v26  ;;  %v4889_v31 = vld [vmem:[%s7499_s2 + $0x2d4] sm:$0xf0]  ;;  %v4439_v36 = vor.u32 %v4905_v3, %v4438_v23  ;;  %v4287_v21 = vor.u32 %v4867_v56, %v4286_v39  ;;  %v4887_v10 = vld [vmem:[%s7499_s2 + $0x2c4] sm:$0xf0]  ;;  %v4470_v39 = vld [vmem:[%s7499_s2 + $0x390] sm:$0xf] }
 0x1f4   :  { %2160 = vmatpush.bf16.msrb.mxu3 %v4319_v44  ;;  %v4486_v44 = vld [vmem:[%s7499_s2 + $0x3b0] sm:$0xf] }
 0x1f5   :  { %2137 = vmatpush.bf16.msrb.mxu2 %v4207_v7  ;;  %2217 = vmatpush.bf16.msra.mxu1 %v4455_v29  ;;  %v4366_v7 = vld [vmem:[%s7499_s2 + $0x2c0] sm:$0xf]  ;;  %v4487_v19 = vor.u32 %v4917_v49, %v4486_v44  ;;  %v4072_v49 = vld [vmem:[%s7499_s2 + $0x78] sm:$0xf0] }
 0x1f6   :  { %1209 = vrot.lane.b32.xlu2 %v1192_v16, %s5118_s7  ;;  %v4873_v16 = vld [vmem:[%s7499_s2 + $0x254] sm:$0xf0]  ;;  %v4367_v35 = vor.u32 %v4887_v10, %v4366_v7  ;;  %v4270_v29 = vld [vmem:[%s7499_s2 + $0x200] sm:$0xf]  ;;  %v4406_v10 = vld [vmem:[%s7499_s2 + $0x310] sm:$0xf] }
 0x1f7   :  { %1213 = vrot.lane.b32.xlu1 %v1196_v9, %s5118_s7  ;;  %1211 = vrot.lane.b32.xlu0 %v1194_v17, %s5118_s7  ;;  %v4382_v9 = vld [vmem:[%s7499_s2 + $0x2e0] sm:$0xf]  ;;  %v4311_v25 = vor.u32 %v4873_v16, %v4310_v22  ;;  %v4921_v17 = vld [vmem:[%s7499_s2 + $0x3d4] sm:$0xf0] }
 0x1f8   :  { %v4383_v8 = vor.u32 %v4891_v61, %v4382_v9  ;;  %v4503_v5 = vor.u32 %v4921_v17, %v4502_v24  ;;  %v4350_v22 = vld [vmem:[%s7499_s2 + $0x2a0] sm:$0xf]  ;;  %v4883_v61 = vld [vmem:[%s7499_s2 + $0x2a4] sm:$0xf0] }
 0x1f9   :  { %2247 = vmatpush.bf16.msra.mxu2 %v4511_v0  ;;  %2161 = vmatpush.bf16.msrb.mxu3 %v4311_v25  ;;  %v4885_v0 = vld [vmem:[%s7499_s2 + $0x2b4] sm:$0xf0]  ;;  %v4351_v17 = vor.u32 %v4883_v61, %v4350_v22  ;;  %v4264_v22 = vld [vmem:[%s7499_s2 + $0x1f8] sm:$0xf0] }
 0x1fa   :  { %2189 = vmatpush.bf16.msra.mxu0 %v4383_v8  ;;  %v4359_v1 = vor.u32 %v4885_v0, %v4358_v41  ;;  %v4342_v8 = vld [vmem:[%s7499_s2 + $0x290] sm:$0xf]  ;;  %v4407_v41 = vor.u32 %v4897_v46, %v4406_v10 }
 0x1fd   :  { %2248 = vmatpush.bf16.msra.mxu2 %v4503_v5  ;;  %v4881_v5 = vld [vmem:[%s7499_s2 + $0x294] sm:$0xf0] }
 0x1fe   :  { %1219 = vrot.lane.b32.xlu2 %v1202_v45, %s5118_s7  ;;  %v4294_v45 = vld [vmem:[%s7499_s2 + $0x230] sm:$0xf] }
 0x1ff   :  { %1217 = vrot.lane.b32.xlu1 %v1200_v51, %s5118_s7  ;;  %1140 = vrot.lane.b32.xlu0 %v1123_v53, %s5117_s16  ;;  %v4375_v51 = vor.u32 %v4889_v31, %v4374_v58  ;;  %v4869_v53 = vld [vmem:[%s7499_s2 + $0x234] sm:$0xf0]  ;;  %v4334_v31 = vld [vmem:[%s7499_s2 + $0x280] sm:$0xf] }
 0x200   :  { %v4295_v27 = vor.u32 %v4869_v53, %v4294_v45  ;;  %v4879_v45 = vld [vmem:[%s7499_s2 + $0x284] sm:$0xf0] }
 0x201   :  { %2190 = vmatpush.bf16.msra.mxu0 %v4375_v51 }
 0x205   :  { %2191 = vmatpush.bf16.msra.mxu0 %v4367_v35 }
 0x206   :  { %1223 = vrot.lane.b32.xlu2 %v1199_v18, %s5118_s7  ;;  %v4871_v18 = vld [vmem:[%s7499_s2 + $0x244] sm:$0xf0] }
 0x207   :  { %1146 = vrot.lane.b32.xlu1 %v1122_v2, %s5117_s16  ;;  %1215 = vrot.lane.b32.xlu0 %v1198_v38, %s5118_s7  ;;  %v4303_v2 = vor.u32 %v4871_v18, %v4302_v33  ;;  %v4915_v33 = vld [vmem:[%s7499_s2 + $0x3a4] sm:$0xf0] }
 0x209   :  { %2162 = vmatpush.bf16.msrb.mxu3 %v4303_v2  ;;  %2192 = vmatpush.bf16.msra.mxu0 %v4359_v1  ;;  %v4398_v1 = vld [vmem:[%s7499_s2 + $0x300] sm:$0xf] }
 0x20d   :  { %2163 = vmatpush.bf16.msrb.mxu3 %v4295_v27  ;;  %2193 = vmatpush.bf16.msra.mxu0 %v4351_v17 }
 0x20f   :  { %1221 = vrot.lane.b32.xlu1 %v1197_v42, %s5118_s7  ;;  %1225 = vrot.lane.b32.xlu0 %v1201_v48, %s5118_s7  ;;  %v4907_v48 = vld [vmem:[%s7499_s2 + $0x364] sm:$0xf0] }
 0x210   :  { %v4447_v40 = vor.u32 %v4907_v48, %v4446_v20  ;;  %v4919_v42 = vld [vmem:[%s7499_s2 + $0x3c4] sm:$0xf0]  ;;  %v4422_v20 = vld [vmem:[%s7499_s2 + $0x330] sm:$0xf]  ;;  %v4343_v48 = vor.u32 %v4881_v5, %v4342_v8 }
 0x211   :  { %v4495_v32 = vor.u32 %v4919_v42, %v4494_v52  ;;  %2164 = vmatpush.bf16.msrb.mxu3 %v4287_v21  ;;  %v4335_v52 = vor.u32 %v4879_v45, %v4334_v31  ;;  %v4414_v42 = vld [vmem:[%s7499_s2 + $0x320] sm:$0xf] }
 0x212   :  { %2218 = vmatpush.bf16.msra.mxu1 %v4447_v40  ;;  %v4478_v40 = vld [vmem:[%s7499_s2 + $0x3a0] sm:$0xf]  ;;  %2194 = vmatpush.bf16.msra.mxu0 %v4343_v48 }
 0x213   :  { %2249 = vmatpush.bf16.msra.mxu2 %v4495_v32  ;;  %v4479_v2 = vor.u32 %v4915_v33, %v4478_v40  ;;  %v1017_v33 = vld [vmem:[#allocation2 + $0x5c] sm:$0x3] }
 0x215   :  { %2165 = vmatpush.bf16.msrb.mxu3 %v4279_v60  ;;  %v4911_v60 = vld [vmem:[%s7499_s2 + $0x384] sm:$0xf0] }
 0x216   :  { %2219 = vmatpush.bf16.msra.mxu1 %v4439_v36  ;;  %2195 = vmatpush.bf16.msra.mxu0 %v4335_v52  ;;  %v4463_v44 = vor.u32 %v4911_v60, %v4462_v59  ;;  %v4136_v52 = vld [vmem:[%s7499_s2 + $0xf8] sm:$0xf0]  ;;  %v4826_v59 = vld [vmem:[%s7499_s2 + $0xe4] sm:$0xf] }
 0x217   :  { %2250 = vmatpush.bf16.msra.mxu2 %v4487_v19  ;;  %v4075_v19 = vor.u32 %v4812_v12, %v4072_v49  ;;  %v4842_v49 = vld [vmem:[%s7499_s2 + $0x164] sm:$0xf] }
 0x21a   :  { %2220 = vmatpush.bf16.msra.mxu1 %v4431_v4  ;;  %v4895_v4 = vld [vmem:[%s7499_s2 + $0x304] sm:$0xf0] }
 0x21b   :  { %2251 = vmatpush.bf16.msra.mxu2 %v4479_v2  ;;  %v4828_v2 = vld [vmem:[%s7499_s2 + $0xf4] sm:$0xf] }
 0x228   :  { %v6080_v11 = vpop.permute.xlu2 %1124 }
 0x229   :  { %v6093_v50 = vsel %vm1148_vm2, %v1068_v34, %v6080_v11  ;;  %v4863_v34 = vld [vmem:[%s7499_s2 + $0x204] sm:$0xf0] }
 0x22a   :  { %2109 = vmatmul.bf16.vlgmr.msrb.gmra.mxu1 %v6093_v50  ;;  %v2081_v38 = vpop.f32.mrf.mxu0  ;;  %v4271_v25 = vor.u32 %v4863_v34, %v4270_v29  ;;  %v4399_v29 = vor.u32 %v4895_v4, %v4398_v1  ;;  %v4860_v34 = vld [vmem:[%s7499_s2 + $0x1f4] sm:$0xf]  ;;  %v4192_v1 = vld [vmem:[%s7499_s2 + $0x168] sm:$0xf0] }
 0x22b   :  { %v4267_v61 = vor.u32 %v4860_v34, %v4264_v22  ;;  %v4806_v34 = vld [vmem:[%s7499_s2 + $0x44] sm:$0xf]  ;;  %v4048_v22 = vld [vmem:[%s7499_s2 + $0x48] sm:$0xf0] }
 0x22c   :  { %2166 = vmatpush.bf16.msrb.mxu3 %v4271_v25 }
 0x230   :  { %v2052_v47 = vpop.f32.mrf.mxu3  ;;  %v6227_v51 = vpop.permute.xlu2 %1132  ;;  %2275 = vmatpush.bf16.msra.mxu3 %v4075_v19 }
 0x231   :  { %v6141_v26 = vadd.f32 %v2081_v38, %v2052_v47  ;;  %v4899_v38 = vld [vmem:[%s7499_s2 + $0x324] sm:$0xf0] }
 0x232   :  { %v6190_v9 = vpop.f32.mrf.mxu0  ;;  %v4415_v47 = vor.u32 %v4899_v38, %v4414_v42  ;;  %v4844_v42 = vld [vmem:[%s7499_s2 + $0x174] sm:$0xf]  ;;  %v4200_v38 = vld [vmem:[%s7499_s2 + $0x178] sm:$0xf0] }
 0x233   :  { %v4203_v10 = vor.u32 %v4844_v42, %v4200_v38  ;;  %v4824_v42 = vld [vmem:[%s7499_s2 + $0xd4] sm:$0xf] }
 0x238   :  { %v6219_v58 = vpop.f32.mrf.mxu3  ;;  %v6254_v21 = vpop.permute.xlu2 %1142 }
 0x240   :  { %v6188_v16 = vpop.permute.xlu0 %1126  ;;  %v6302_v48 = vpop.permute.xlu2 %1205 }
 0x241   :  { %v6198_v24 = vsel %vm1148_vm2, %v6080_v11, %v6188_v16  ;;  %v4901_v11 = vld [vmem:[%s7499_s2 + $0x334] sm:$0xf0] }
 0x242   :  { %2138 = vmatmul.bf16.vlgmr.msrb.gmra.mxu2 %v6198_v24  ;;  %v4423_v18 = vor.u32 %v4901_v11, %v4422_v20 }
 0x244   :  { %2221 = vmatpush.bf16.msra.mxu1 %v4423_v18  ;;  %v4064_v18 = vld [vmem:[%s7499_s2 + $0x68] sm:$0xf0] }
 0x248   :  { %v2086_v53 = vpop.f32.mrf.mxu0  ;;  %v1131_v27 = vpop.permute.xlu1 %1130  ;;  %2222 = vmatpush.bf16.msra.mxu1 %v4415_v47 }
 0x249   :  { %v6237_v32 = vsel %vm1148_vm2, %v5895_v14, %v1131_v27  ;;  %v6244_v36 = vsel %vm1148_vm2, %v1131_v27, %v6227_v51  ;;  %v4913_v14 = vld [vmem:[%s7499_s2 + $0x394] sm:$0xf0]  ;;  %v1135_v4 = vpop.permute.xlu2 %1134 }
 0x24a   :  { %2114 = vmatmul.bf16.gmra.mxu1 %v6237_v32  ;;  %v4471_v7 = vor.u32 %v4913_v14, %v4470_v39  ;;  %v4858_v39 = vld [vmem:[%s7499_s2 + $0x1e4] sm:$0xf]  ;;  %v4256_v14 = vld [vmem:[%s7499_s2 + $0x1e8] sm:$0xf0] }
 0x24b   :  { %v4259_v46 = vor.u32 %v4858_v39, %v4256_v14  ;;  %v4804_v39 = vld [vmem:[%s7499_s2 + $0x34] sm:$0xf]  ;;  %v4040_v14 = vld [vmem:[%s7499_s2 + $0x38] sm:$0xf0] }
 0x24c   :  { %2252 = vmatpush.bf16.msra.mxu2 %v4471_v7  ;;  %2223 = vmatpush.bf16.msra.mxu1 %v4407_v41  ;;  %v1065_v7 = vunpack.c.l.b16 %v1017_v33  ;;  %v4056_v41 = vld [vmem:[%s7499_s2 + $0x58] sm:$0xf0] }
 0x24e   :  { %v2057_v23 = vpop.f32.mrf.mxu3 }
 0x24f   :  { %v6240_v3 = vadd.f32 %v2086_v53, %v2057_v23  ;;  %v4139_v23 = vor.u32 %v4828_v2, %v4136_v52  ;;  %v4248_v52 = vld [vmem:[%s7499_s2 + $0x1d8] sm:$0xf0] }
 0x250   :  { %v6252_v56 = vpop.f32.mrf.mxu0  ;;  %2253 = vmatpush.bf16.msra.mxu2 %v4463_v44  ;;  %2224 = vmatpush.bf16.msra.mxu1 %v4399_v29  ;;  %v4128_v44 = vld [vmem:[%s7499_s2 + $0xe8] sm:$0xf0]  ;;  %v4195_v29 = vor.u32 %v4842_v49, %v4192_v1  ;;  %v4822_v49 = vld [vmem:[%s7499_s2 + $0xc4] sm:$0xf] }
 0x251   :  { %v6263_v13 = vpop.permute.xlu1 %1138  ;;  %v1137_v35 = vpop.permute.xlu0 %1136  ;;  %2304 = vmatpush.bf16.msrb.mxu0 %v4139_v23  ;;  %v4131_v19 = vor.u32 %v4826_v59, %v4128_v44  ;;  %v4802_v59 = vld [vmem:[%s7499_s2 + $0x24] sm:$0xf]  ;;  %v4032_v44 = vld [vmem:[%s7499_s2 + $0x28] sm:$0xf0] }
 0x252   :  { %2143 = vmatmul.bf16.gmra.mxu2 %v6244_v36  ;;  %v6293_v8 = vsel %vm1148_vm2, %v5919_v63, %v1137_v35  ;;  %v6309_v63 = vsel %vm1148_vm2, %v1137_v35, %v6263_v13  ;;  %v4808_v35 = vld [vmem:[%s7499_s2 + $0x54] sm:$0xf]  ;;  %v6388_v2 = vpop.permute.xlu2 %1209  ;;  %v4112_v1 = vld [vmem:[%s7499_s2 + $0xc8] sm:$0xf0] }
 0x253   :  { %v4059_v12 = vor.u32 %v4808_v35, %v4056_v41  ;;  %v4840_v35 = vld [vmem:[%s7499_s2 + $0x154] sm:$0xf]  ;;  %v4184_v41 = vld [vmem:[%s7499_s2 + $0x158] sm:$0xf0] }
 0x254   :  { %2362 = vmatpush.bf16.msrb.mxu2 %v4267_v61  ;;  %2333 = vmatpush.bf16.msrb.mxu1 %v4203_v10  ;;  %v4051_v61 = vor.u32 %v4806_v34, %v4048_v22  ;;  %v4240_v34 = vld [vmem:[%s7499_s2 + $0x1c8] sm:$0xf0]  ;;  %v4800_v22 = vld [vmem:[%s7499_s2 + $0x14] sm:$0xf] }
 0x255   :  { %2305 = vmatpush.bf16.msrb.mxu0 %v4131_v19  ;;  %v4115_v19 = vor.u32 %v4822_v49, %v4112_v1  ;;  %v4852_v1 = vld [vmem:[%s7499_s2 + $0x1b4] sm:$0xf] }
 0x256   :  { %v6265_v0 = vpop.f32.mrf.mxu3 }
 0x258   :  { %v2091_v25 = vpop.f32.mrf.mxu0  ;;  %2363 = vmatpush.bf16.msrb.mxu2 %v4259_v46  ;;  %2334 = vmatpush.bf16.msrb.mxu1 %v4195_v29  ;;  %v4043_v46 = vor.u32 %v4804_v39, %v4040_v14  ;;  %v4854_v29 = vld [vmem:[%s7499_s2 + $0x1c4] sm:$0xf] }
 0x259   :  { %v1129_v17 = vpop.permute.xlu1 %1128  ;;  %v6295_v5 = vpop.permute.xlu0 %1144 }
 0x25a   :  { %2119 = vmatmul.bf16.gmra.mxu1 %v6293_v8  ;;  %v6300_v20 = vsel %vm1148_vm2, %v6188_v16, %v1129_v17  ;;  %v4810_v16 = vld [vmem:[%s7499_s2 + $0x64] sm:$0xf] }
 0x25b   :  { %2167 = vmatmul.bf16.vlgmr.msrb.gmra.mxu3 %v6300_v20  ;;  %v4067_v53 = vor.u32 %v4810_v16, %v4064_v18 }
 0x25d   :  { %2276 = vmatpush.bf16.msra.mxu3 %v4067_v53  ;;  %v6393_v53 = vsel %vm1148_vm2, %v6254_v21, %v6295_v5 }
 0x25e   :  { %v2062_v11 = vpop.f32.mrf.mxu3 }
 0x25f   :  { %v6305_v40 = vadd.f32 %v2091_v25, %v2062_v11  ;;  %v1077_v25 = vpack.c.b16 %v1065_v7, %v5981_v6  ;;  %v6381_v11 = vsel %vm1148_vm2, %v6227_v51, %v1135_v4  ;;  %v4856_v51 = vld [vmem:[%s7499_s2 + $0x1d4] sm:$0xf]  ;;  %v6418_v7 = vsel %vm1227_vm3, %v1135_v4, %v6388_v2 }
 0x260   :  { %v6334_v47 = vpop.f32.mrf.mxu0  ;;  %v4251_v23 = vor.u32 %v4856_v51, %v4248_v52  ;;  %v4035_v4 = vor.u32 %v4802_v59, %v4032_v44  ;;  %v4104_v51 = vld [vmem:[%s7499_s2 + $0xb8] sm:$0xf0]  ;;  %v4838_v52 = vld [vmem:[%s7499_s2 + $0x144] sm:$0xf] }
 0x261   :  { %v6321_v31 = vpop.permute.xlu1 %1203  ;;  %v6323_v45 = vpop.permute.xlu0 %1207  ;;  %2277 = vmatpush.bf16.msra.mxu3 %v4059_v12  ;;  %v4187_v12 = vor.u32 %v4840_v35, %v4184_v41  ;;  %v4096_v41 = vld [vmem:[%s7499_s2 + $0xa8] sm:$0xf0] }
 0x262   :  { %2148 = vmatmul.bf16.gmra.mxu2 %v6309_v63  ;;  %v6338_v27 = vsel %vm1227_vm3, %v1129_v17, %v6321_v31  ;;  %v6376_v17 = vsel %vm1148_vm2, %v1077_v25, %v6254_v21  ;;  %v4120_v21 = vld [vmem:[%s7499_s2 + $0xd8] sm:$0xf0]  ;;  %v6466_v14 = vsel %vm1227_vm3, %v6321_v31, %v6302_v48  ;;  %v4818_v31 = vld [vmem:[%s7499_s2 + $0xa4] sm:$0xf] }
 0x263   :  { %2196 = vmatmul.bf16.vlgmr.msra.gmra.mxu0 %v6338_v27  ;;  %v4123_v10 = vor.u32 %v4824_v42, %v4120_v21  ;;  %2364 = vmatpush.bf16.msrb.mxu2 %v4251_v23  ;;  %v4176_v42 = vld [vmem:[%s7499_s2 + $0x148] sm:$0xf0]  ;;  %v4099_v44 = vor.u32 %v4818_v31, %v4096_v41 }
 0x264   :  { %2335 = vmatpush.bf16.msrb.mxu1 %v4187_v12  ;;  %v4179_v23 = vor.u32 %v4838_v52, %v4176_v42  ;;  %v4080_v52 = vld [vmem:[%s7499_s2 + $0x88] sm:$0xf0] }
 0x265   :  { %2278 = vmatpush.bf16.msra.mxu3 %v4051_v61  ;;  %2306 = vmatpush.bf16.msrb.mxu0 %v4123_v10  ;;  %v4243_v61 = vor.u32 %v4854_v29, %v4240_v34  ;;  %v4798_v10 = vld [vmem:[%s7499_s2 + $0x4] sm:$0xf]  ;;  %v4836_v29 = vld [vmem:[%s7499_s2 + $0x134] sm:$0xf]  ;;  %v4168_v34 = vld [vmem:[%s7499_s2 + $0x138] sm:$0xf0] }
 0x266   :  { %v6356_v60 = vpop.f32.mrf.mxu3 }
 0x267   :  { %2365 = vmatpush.bf16.msrb.mxu2 %v4243_v61 }
 0x268   :  { %v2096_v16 = vpop.f32.mrf.mxu0  ;;  %2336 = vmatpush.bf16.msrb.mxu1 %v4179_v23  ;;  %v4224_v23 = vld [vmem:[%s7499_s2 + $0x1a8] sm:$0xf0] }
 0x269   :  { %v6383_v33 = vpop.permute.xlu0 %1211  ;;  %v6405_v38 = vpop.permute.xlu1 %1213  ;;  %2279 = vmatpush.bf16.msra.mxu3 %v4043_v46  ;;  %2307 = vmatpush.bf16.msrb.mxu0 %v4115_v19  ;;  %v4016_v46 = vld [vmem:[%s7499_s2 + $0x8] sm:$0xf0]  ;;  %v4816_v19 = vld [vmem:[%s7499_s2 + $0x94] sm:$0xf] }
 0x26a   :  { %2124 = vmatmul.bf16.gmra.mxu1 %v6376_v17  ;;  %v4019_v12 = vor.u32 %v4798_v10, %v4016_v46  ;;  %v6538_v31 = vsel %vm1227_vm3, %v6388_v2, %v6383_v33  ;;  %v4848_v2 = vld [vmem:[%s7499_s2 + $0x194] sm:$0xf] }
 0x26b   :  { %2172 = vmatmul.bf16.gmra.mxu3 %v6381_v11 }
 0x26d   :  { %2280 = vmatpush.bf16.msra.mxu3 %v4035_v4  ;;  %v4232_v4 = vld [vmem:[%s7499_s2 + $0x1b8] sm:$0xf0] }
 0x26e   :  { %v2067_v6 = vpop.f32.mrf.mxu3 }
 0x26f   :  { %v6386_v18 = vadd.f32 %v2096_v16, %v2067_v6  ;;  %v4024_v16 = vld [vmem:[%s7499_s2 + $0x18] sm:$0xf0]  ;;  %v4820_v6 = vld [vmem:[%s7499_s2 + $0xb4] sm:$0xf] }
 0x270   :  { %v4027_v21 = vor.u32 %v4800_v22, %v4024_v16  ;;  %v4107_v39 = vor.u32 %v4820_v6, %v4104_v51  ;;  %v4171_v16 = vor.u32 %v4836_v29, %v4168_v34  ;;  %v4814_v51 = vld [vmem:[%s7499_s2 + $0x84] sm:$0xf]  ;;  %v4876_v34 = vld [vmem:[%s7499_s2 + $0x274] sm:$0xf] }
 0x271   :  { %v1141_v25 = vpop.permute.xlu0 %1140  ;;  %v6485_v59 = vpop.permute.xlu1 %1217  ;;  %v4083_v42 = vor.u32 %v4814_v51, %v4080_v52  ;;  %v4144_v51 = vld [vmem:[%s7499_s2 + $0x108] sm:$0xf0] }
 0x272   :  { %2153 = vmatmul.bf16.gmra.mxu2 %v6393_v53  ;;  %v6477_v35 = vsel %vm1148_vm2, %v6263_v13, %v1141_v25  ;;  %2281 = vmatpush.bf16.msra.mxu3 %v4027_v21  ;;  %v6491_v13 = vsel %vm1227_vm3, %v6302_v48, %v6323_v45  ;;  %v4235_v48 = vor.u32 %v4852_v1, %v4232_v4  ;;  %v4088_v45 = vld [vmem:[%s7499_s2 + $0x98] sm:$0xf0]  ;;  %v4834_v21 = vld [vmem:[%s7499_s2 + $0x124] sm:$0xf]  ;;  %v4832_v1 = vld [vmem:[%s7499_s2 + $0x114] sm:$0xf] }
 0x273   :  { %2201 = vmatmul.bf16.gmra.mxu0 %v6418_v7  ;;  %v4091_v61 = vor.u32 %v4816_v19, %v4088_v45  ;;  %2337 = vmatpush.bf16.msrb.mxu1 %v4171_v16  ;;  %v4208_v19 = vld [vmem:[%s7499_s2 + $0x188] sm:$0xf0]  ;;  %v4830_v16 = vld [vmem:[%s7499_s2 + $0x104] sm:$0xf] }
 0x274   :  { %2308 = vmatpush.bf16.msrb.mxu0 %v4107_v39  ;;  %2366 = vmatpush.bf16.msrb.mxu2 %v4235_v48  ;;  %v4160_v39 = vld [vmem:[%s7499_s2 + $0x128] sm:$0xf0]  ;;  %v4147_v52 = vor.u32 %v4830_v16, %v4144_v51  ;;  %v4504_v51 = vld [vmem:[%s7499_s2 + $0x3d8] sm:$0xf0] }
 0x275   :  { %v4163_v46 = vor.u32 %v4834_v21, %v4160_v39  ;;  %v4922_v21 = vld [vmem:[%s7499_s2 + $0x3e4] sm:$0xf] }
 0x276   :  { %2282 = vmatpush.bf16.msra.mxu3 %v4019_v12 }
 0x277   :  { %2338 = vmatpush.bf16.msrb.mxu1 %v4163_v46  ;;  %v4392_v46 = vld [vmem:[%s7499_s2 + $0x2f8] sm:$0xf0] }
 0x278   :  { %2309 = vmatpush.bf16.msrb.mxu0 %v4099_v44  ;;  %v6551_v44 = vsel %vm1227_vm3, %v6383_v33, %v6405_v38  ;;  %v4152_v33 = vld [vmem:[%s7499_s2 + $0x118] sm:$0xf0]  ;;  %v4846_v38 = vld [vmem:[%s7499_s2 + $0x184] sm:$0xf] }
 0x279   :  { %v1216_v49 = vpop.permute.xlu0 %1215  ;;  %v1147_v6 = vpop.permute.xlu1 %1146  ;;  %v4155_v45 = vor.u32 %v4832_v1, %v4152_v33  ;;  %v4211_v29 = vor.u32 %v4846_v38, %v4208_v19  ;;  %v4908_v1 = vld [vmem:[%s7499_s2 + $0x374] sm:$0xf] }
 0x27a   :  { %2225 = vmatmul.bf16.vlgmr.msra.gmra.mxu1 %v6466_v14  ;;  %v6514_v22 = vsel %vm1227_vm3, %v1141_v25, %v1216_v49  ;;  %v4850_v25 = vld [vmem:[%s7499_s2 + $0x1a4] sm:$0xf]  ;;  %v6543_v41 = vsel %vm1148_vm2, %v6295_v5, %v1147_v6  ;;  %v4216_v5 = vld [vmem:[%s7499_s2 + $0x198] sm:$0xf0]  ;;  %v4872_v33 = vld [vmem:[%s7499_s2 + $0x254] sm:$0xf] }
 0x27b   :  { %2177 = vmatmul.bf16.gmra.mxu3 %v6477_v35  ;;  %v4227_v10 = vor.u32 %v4850_v25, %v4224_v23  ;;  %v4219_v4 = vor.u32 %v4848_v2, %v4216_v5  ;;  %2339 = vmatpush.bf16.msrb.mxu1 %v4155_v45  ;;  %v6592_v25 = vsel %vm1227_vm3, %v1216_v49, %v6485_v59  ;;  %v4512_v49 = vld [vmem:[%s7499_s2 + $0x3e8] sm:$0xf0]  ;;  %v4890_v45 = vld [vmem:[%s7499_s2 + $0x2e4] sm:$0xf] }
 0x27c   :  { %2310 = vmatpush.bf16.msrb.mxu0 %v4091_v61  ;;  %v4328_v61 = vld [vmem:[%s7499_s2 + $0x278] sm:$0xf0]  ;;  %v4515_v39 = vor.u32 %v4922_v21, %v4512_v49  ;;  %v4906_v49 = vld [vmem:[%s7499_s2 + $0x364] sm:$0xf] }
 0x27d   :  { %2367 = vmatpush.bf16.msrb.mxu2 %v4227_v10  ;;  %v4892_v10 = vld [vmem:[%s7499_s2 + $0x2f4] sm:$0xf] }
 0x27e   :  { %v4395_v5 = vor.u32 %v4892_v10, %v4392_v46  ;;  %v4888_v46 = vld [vmem:[%s7499_s2 + $0x2d4] sm:$0xf] }
 0x27f   :  { %2340 = vmatpush.bf16.msrb.mxu1 %v4147_v52 }
 0x280   :  { %2311 = vmatpush.bf16.msrb.mxu0 %v4083_v42  ;;  %v1220_v42 = vpop.permute.xlu2 %1219 }
 0x281   :  { %v6546_v12 = vpop.permute.xlu1 %1221  ;;  %2368 = vmatpush.bf16.msrb.mxu2 %v4219_v4  ;;  %v6598_v23 = vsel %vm1227_vm3, %v6485_v59, %v1220_v42  ;;  %v4320_v59 = vld [vmem:[%s7499_s2 + $0x268] sm:$0xf0]  ;;  %v4456_v4 = vld [vmem:[%s7499_s2 + $0x378] sm:$0xf0] }
 0x282   :  { %4516 = vmatmul.msk.bf16.vlgmr.msra.gmra.mxu2 %vm2030_vm4, %v6491_v13  ;;  %v6575_v48 = vsel %vm1227_vm3, %v1147_v6, %v6546_v12  ;;  %v4331_v6 = vor.u32 %v4876_v34, %v4328_v61  ;;  %v4459_v19 = vor.u32 %v4908_v1, %v4456_v4  ;;  %v4868_v1 = vld [vmem:[%s7499_s2 + $0x234] sm:$0xf]  ;;  %v4296_v4 = vld [vmem:[%s7499_s2 + $0x238] sm:$0xf0] }
 0x283   :  { %2206 = vmatmul.bf16.gmra.mxu0 %v6514_v22 }
 0x284   :  { %2391 = vmatpush.bf16.msrb.mxu3 %v4331_v6  ;;  %2420 = vmatpush.bf16.msra.mxu0 %v4395_v5  ;;  %v4920_v6 = vld [vmem:[%s7499_s2 + $0x3d4] sm:$0xf] }
 0x285   :  { %2369 = vmatpush.bf16.msrb.mxu2 %v4211_v29  ;;  %v4384_v29 = vld [vmem:[%s7499_s2 + $0x2e8] sm:$0xf0]  ;;  %2449 = vmatpush.bf16.msra.mxu1 %v4459_v19  ;;  %v4507_v52 = vor.u32 %v4920_v6, %v4504_v51  ;;  %v4886_v6 = vld [vmem:[%s7499_s2 + $0x2c4] sm:$0xf] }
 0x286   :  { %v4387_v16 = vor.u32 %v4890_v45, %v4384_v29  ;;  %v4496_v19 = vld [vmem:[%s7499_s2 + $0x3c8] sm:$0xf0] }
 0x287   :  { %v4368_v51 = vld [vmem:[%s7499_s2 + $0x2c8] sm:$0xf0] }
 0x288   :  { %v1224_v42 = vpop.permute.xlu2 %1223  ;;  %2421 = vmatpush.bf16.msra.mxu0 %v4387_v16  ;;  %v4288_v16 = vld [vmem:[%s7499_s2 + $0x228] sm:$0xf0] }
 0x289   :  { %2479 = vmatpush.bf16.msra.mxu2 %v4515_v39  ;;  %v6650_v21 = vsel %vm1227_vm3, %v6546_v12, %v1224_v42  ;;  %v4870_v39 = vld [vmem:[%s7499_s2 + $0x244] sm:$0xf] }
 0x28a   :  { %2230 = vmatmul.bf16.gmra.mxu1 %v6538_v31 }
 0x28b   :  { %2182 = vmatmul.bf16.gmra.mxu3 %v6543_v41 }
 0x28d   :  { %2480 = vmatpush.bf16.msra.mxu2 %v4507_v52 }
 0x292   :  { %4517 = vmatmul.msk.bf16.gmra.mxu2 %vm2030_vm4, %v6551_v44 }
 0x293   :  { %2211 = vmatmul.bf16.gmra.mxu0 %v6575_v48 }
 0x29a   :  { %2235 = vmatmul.bf16.gmra.mxu1 %v6592_v25 }
 0x29b   :  { %2283 = vmatmul.bf16.vlgmr.msra.gmra.mxu3 %v5777_v15  ;;  %v4874_v15 = vld [vmem:[%s7499_s2 + $0x264] sm:$0xf] }
 0x29c   :  { %v4323_v2 = vor.u32 %v4874_v15, %v4320_v59  ;;  %v4448_v15 = vld [vmem:[%s7499_s2 + $0x368] sm:$0xf0] }
 0x29d   :  { %v4451_v12 = vor.u32 %v4906_v49, %v4448_v15  ;;  %v4304_v59 = vld [vmem:[%s7499_s2 + $0x248] sm:$0xf0]  ;;  %v4280_v49 = vld [vmem:[%s7499_s2 + $0x218] sm:$0xf0]  ;;  %v4884_v15 = vld [vmem:[%s7499_s2 + $0x2b4] sm:$0xf] }
 0x29e   :  { %2392 = vmatpush.bf16.msrb.mxu3 %v4323_v2  ;;  %v4307_v10 = vor.u32 %v4870_v39, %v4304_v59  ;;  %v4376_v2 = vld [vmem:[%s7499_s2 + $0x2d8] sm:$0xf0] }
 0x29f   :  { %2450 = vmatpush.bf16.msra.mxu1 %v4451_v12  ;;  %v4379_v5 = vor.u32 %v4888_v46, %v4376_v2  ;;  %v4432_v12 = vld [vmem:[%s7499_s2 + $0x348] sm:$0xf0]  ;;  %v4916_v46 = vld [vmem:[%s7499_s2 + $0x3b4] sm:$0xf]  ;;  %v4488_v2 = vld [vmem:[%s7499_s2 + $0x3b8] sm:$0xf0] }
 0x2a1   :  { %2422 = vmatpush.bf16.msra.mxu0 %v4379_v5  ;;  %v4862_v5 = vld [vmem:[%s7499_s2 + $0x204] sm:$0xf] }
 0x2a2   :  { %4518 = vmatmul.msk.bf16.gmra.mxu2 %vm2030_vm4, %v6598_v23 }
 0x2a3   :  { %2312 = vmatmul.bf16.vlgmr.msrb.gmra.mxu0 %v5780_v55  ;;  %v4312_v55 = vld [vmem:[%s7499_s2 + $0x258] sm:$0xf0] }
 0x2a4   :  { %v4315_v61 = vor.u32 %v4872_v33, %v4312_v55  ;;  %v4918_v33 = vld [vmem:[%s7499_s2 + $0x3c4] sm:$0xf]  ;;  %v4440_v55 = vld [vmem:[%s7499_s2 + $0x358] sm:$0xf0] }
 0x2a5   :  { %v4499_v45 = vor.u32 %v4918_v33, %v4496_v19  ;;  %v4272_v33 = vld [vmem:[%s7499_s2 + $0x208] sm:$0xf0] }
 0x2a6   :  { %2393 = vmatpush.bf16.msrb.mxu3 %v4315_v61  ;;  %v4866_v61 = vld [vmem:[%s7499_s2 + $0x224] sm:$0xf]  ;;  %v4352_v19 = vld [vmem:[%s7499_s2 + $0x2a8] sm:$0xf0] }
 0x2a7   :  { %v2110_v38 = vpop.f32.mrf.mxu1  ;;  %2481 = vmatpush.bf16.msra.mxu2 %v4499_v45  ;;  %v4291_v52 = vor.u32 %v4866_v61, %v4288_v16  ;;  %v4880_v61 = vld [vmem:[%s7499_s2 + $0x294] sm:$0xf] }
 0x2a8   :  { %v6640_v34 = vadd.f32 %v2110_v38, %v6141_v26  ;;  %v1226_v26 = vpop.permute.xlu0 %1225  ;;  %v4299_v38 = vor.u32 %v4868_v1, %v4296_v4  ;;  %v4491_v4 = vor.u32 %v4916_v46, %v4488_v2  ;;  %v4900_v16 = vld [vmem:[%s7499_s2 + $0x334] sm:$0xf] }
 0x2aa   :  { %2240 = vmatmul.bf16.gmra.mxu1 %v6650_v21  ;;  %2394 = vmatpush.bf16.msrb.mxu3 %v4307_v10 }
 0x2ab   :  { %2288 = vmatmul.bf16.gmra.mxu3 %v5810_v54  ;;  %v6667_v54 = vsel %vm1227_vm3, %v1224_v42, %v1226_v26  ;;  %v4371_v42 = vor.u32 %v4886_v6, %v4368_v51  ;;  %v4864_v26 = vld [vmem:[%s7499_s2 + $0x214] sm:$0xf]  ;;  %2482 = vmatpush.bf16.msra.mxu2 %v4491_v4  ;;  %v4480_v51 = vld [vmem:[%s7499_s2 + $0x3a8] sm:$0xf0] }
 0x2ac   :  { %v4283_v39 = vor.u32 %v4864_v26, %v4280_v49  ;;  %v4878_v26 = vld [vmem:[%s7499_s2 + $0x284] sm:$0xf]  ;;  %v4336_v49 = vld [vmem:[%s7499_s2 + $0x288] sm:$0xf0]  ;;  %v4896_v4 = vld [vmem:[%s7499_s2 + $0x314] sm:$0xf] }
 0x2ad   :  { %2423 = vmatpush.bf16.msra.mxu0 %v4371_v42 }
 0x2ae   :  { %2395 = vmatpush.bf16.msrb.mxu3 %v4299_v38  ;;  %v4882_v38 = vld [vmem:[%s7499_s2 + $0x2a4] sm:$0xf] }
 0x2af   :  { %v6737_v1 = vpop.f32.mrf.mxu1 }
 0x2b2   :  { %4519 = vmatmul.msk.bf16.gmra.mxu2 %vm2030_vm4, %v6667_v54  ;;  %2396 = vmatpush.bf16.msrb.mxu3 %v4291_v52 }
 0x2b3   :  { %2317 = vmatmul.bf16.gmra.mxu0 %v5812_v62  ;;  %v4904_v62 = vld [vmem:[%s7499_s2 + $0x354] sm:$0xf] }
 0x2b4   :  { %v4443_v29 = vor.u32 %v4904_v62, %v4440_v55  ;;  %v4275_v62 = vor.u32 %v4862_v5, %v4272_v33  ;;  %v4355_v55 = vor.u32 %v4882_v38, %v4352_v19  ;;  %v4408_v33 = vld [vmem:[%s7499_s2 + $0x318] sm:$0xf0]  ;;  %v4910_v38 = vld [vmem:[%s7499_s2 + $0x384] sm:$0xf] }
 0x2b5   :  { %v4411_v19 = vor.u32 %v4896_v4, %v4408_v33 }
 0x2b6   :  { %2451 = vmatpush.bf16.msra.mxu1 %v4443_v29  ;;  %2397 = vmatpush.bf16.msrb.mxu3 %v4283_v39 }
 0x2ba   :  { %2341 = vmatmul.bf16.vlgmr.msrb.gmra.mxu1 %v6093_v50  ;;  %v4360_v50 = vld [vmem:[%s7499_s2 + $0x2b8] sm:$0xf0]  ;;  %2398 = vmatpush.bf16.msrb.mxu3 %v4275_v62  ;;  %v2069_v62 = vpop.f32.mrf.mxu3 }
 0x2bb   :  { %2293 = vmatmul.bf16.gmra.mxu3 %v5857_v43  ;;  %v4902_v43 = vld [vmem:[%s7499_s2 + $0x344] sm:$0xf]  ;;  %v4363_v59 = vor.u32 %v4884_v15, %v4360_v50  ;;  %v4339_v50 = vor.u32 %v4878_v26, %v4336_v49 }
 0x2bc   :  { %v4435_v10 = vor.u32 %v4902_v43, %v4432_v12  ;;  %v4898_v12 = vld [vmem:[%s7499_s2 + $0x324] sm:$0xf] }
 0x2bd   :  { %2424 = vmatpush.bf16.msra.mxu0 %v4363_v59  ;;  %v4416_v59 = vld [vmem:[%s7499_s2 + $0x328] sm:$0xf0] }
 0x2be   :  { %2452 = vmatpush.bf16.msra.mxu1 %v4435_v10  ;;  %v4419_v10 = vor.u32 %v4898_v12, %v4416_v59 }
 0x2c1   :  { %2425 = vmatpush.bf16.msra.mxu0 %v4355_v55 }
 0x2c2   :  { %2370 = vmatmul.bf16.vlgmr.msrb.gmra.mxu2 %v6198_v24  ;;  %v4344_v24 = vld [vmem:[%s7499_s2 + $0x298] sm:$0xf0] }
 0x2c3   :  { %2322 = vmatmul.bf16.gmra.mxu0 %v5859_v57  ;;  %v4347_v6 = vor.u32 %v4880_v61, %v4344_v24  ;;  %v4424_v57 = vld [vmem:[%s7499_s2 + $0x338] sm:$0xf0]  ;;  %v2098_v61 = vpop.f32.mrf.mxu0 }
 0x2c4   :  { %v4427_v52 = vor.u32 %v4900_v16, %v4424_v57 }
 0x2c5   :  { %v2139_v45 = vpop.f32.mrf.mxu2  ;;  %2426 = vmatpush.bf16.msra.mxu0 %v4347_v6 }
 0x2c6   :  { %v2140_v29 = vadd.f32 %v2139_v45, %v6640_v34  ;;  %v4914_v34 = vld [vmem:[%s7499_s2 + $0x3a4] sm:$0xf]  ;;  %2453 = vmatpush.bf16.msra.mxu1 %v4427_v52  ;;  %v2089_v45 = vadd.f32 %v6252_v56, %v6265_v0  ;;  %v4400_v56 = vld [vmem:[%s7499_s2 + $0x308] sm:$0xf0] }
 0x2c7   :  { %v4483_v42 = vor.u32 %v4914_v34, %v4480_v51  ;;  %v2115_v15 = vpop.f32.mrf.mxu1  ;;  %v4894_v34 = vld [vmem:[%s7499_s2 + $0x304] sm:$0xf] }
 0x2c8   :  { %v2116_v39 = vadd.f32 %v2115_v15, %v6240_v3  ;;  %v4912_v3 = vld [vmem:[%s7499_s2 + $0x394] sm:$0xf]  ;;  %v4403_v0 = vor.u32 %v4894_v34, %v4400_v56 }
 0x2c9   :  { %2483 = vmatpush.bf16.msra.mxu2 %v4483_v42  ;;  %2427 = vmatpush.bf16.msra.mxu0 %v4339_v50 }
 0x2ca   :  { %2346 = vmatmul.bf16.gmra.mxu1 %v6237_v32  ;;  %v4472_v32 = vld [vmem:[%s7499_s2 + $0x398] sm:$0xf0] }
 0x2cb   :  { %2298 = vmatmul.bf16.gmra.mxu3 %v5924_v28  ;;  %v4475_v46 = vor.u32 %v4912_v3, %v4472_v32  ;;  %2454 = vmatpush.bf16.msra.mxu1 %v4419_v10 }
 0x2cd   :  { %v6777_v43 = vpop.f32.mrf.mxu2  ;;  %2484 = vmatpush.bf16.msra.mxu2 %v4475_v46 }
 0x2cf   :  { %v2117_v28 = vpop.f32.mrf.mxu1  ;;  %2455 = vmatpush.bf16.msra.mxu1 %v4411_v19 }
 0x2d0   :  { %v2118_v16 = vadd.f32 %v2117_v28, %v2089_v45 }
 0x2d2   :  { %2375 = vmatmul.bf16.gmra.mxu2 %v6244_v36  ;;  %v4464_v36 = vld [vmem:[%s7499_s2 + $0x388] sm:$0xf0]  ;;  %s5121_s2 = smov 96  }
 0x2d3   :  { %2327 = vmatmul.bf16.gmra.mxu0 %v5927_v30  ;;  %v4467_v30 = vor.u32 %v4910_v38, %v4464_v36  ;;  %2456 = vmatpush.bf16.msra.mxu1 %v4403_v0 }
 0x2d5   :  { %v2144_v2 = vpop.f32.mrf.mxu2  ;;  %2485 = vmatpush.bf16.msra.mxu2 %v4467_v30 }
 0x2d6   :  { %v2145_v5 = vadd.f32 %v2144_v2, %v2116_v39  ;;  %v2094_v39 = vadd.f32 %v6334_v47, %v6356_v60  ;;  %v2099_v2 = vadd.f32 %v2098_v61, %v2069_v62 }
 0x2d7   :  { %v2120_v55 = vpop.f32.mrf.mxu1 }
 0x2d8   :  { %v2121_v24 = vadd.f32 %v2120_v55, %v6305_v40 }
 0x2da   :  { %2351 = vmatmul.bf16.gmra.mxu1 %v6293_v8 }
 0x2db   :  { %2399 = vmatmul.bf16.vlgmr.msrb.gmra.mxu3 %v6300_v20 }
 0x2dd   :  { %v2146_v6 = vpop.f32.mrf.mxu2 }
 0x2de   :  { %v6811_v57 = vadd.f32 %v2146_v6, %v2118_v16  ;;  %v2168_v51 = vpop.f32.mrf.mxu3 }
 0x2df   :  { %v2122_v40 = vpop.f32.mrf.mxu1  ;;  %v2169_v52 = vadd.f32 %v2168_v51, %v2140_v29 }
 0x2e0   :  { %v2197_v8 = vpop.f32.mrf.mxu0  ;;  %v2123_v59 = vadd.f32 %v2122_v40, %v2094_v39 }
 0x2e1   :  { %v2198_v42 = vadd.f32 %v2197_v8, %v2169_v52 }
 0x2e2   :  { %2380 = vmatmul.bf16.gmra.mxu2 %v6309_v63 }
 0x2e3   :  { %2428 = vmatmul.bf16.vlgmr.msra.gmra.mxu0 %v6338_v27 }
 0x2e5   :  { %v2149_v20 = vpop.f32.mrf.mxu2 }
 0x2e6   :  { %v2150_v26 = vadd.f32 %v2149_v20, %v2121_v24  ;;  %v2170_v49 = vpop.f32.mrf.mxu3 }
 0x2e7   :  { %v2125_v15 = vpop.f32.mrf.mxu1 }
 0x2e8   :  { %v2126_v50 = vadd.f32 %v2125_v15, %v6386_v18  ;;  %v2199_v12 = vpop.f32.mrf.mxu0 }
 0x2ea   :  { %2356 = vmatmul.bf16.gmra.mxu1 %v6376_v17 }
 0x2eb   :  { %2404 = vmatmul.bf16.gmra.mxu3 %v6381_v11 }
 0x2ed   :  { %v2151_v29 = vpop.f32.mrf.mxu2 }
 0x2ee   :  { %v6826_v63 = vadd.f32 %v2151_v29, %v2123_v59  ;;  %v2173_v3 = vpop.f32.mrf.mxu3 }
 0x2ef   :  { %v2127_v10 = vpop.f32.mrf.mxu1  ;;  %v2174_v27 = vadd.f32 %v2173_v3, %v2145_v5 }
 0x2f0   :  { %v2202_v32 = vpop.f32.mrf.mxu0  ;;  %v2128_v33 = vadd.f32 %v2127_v10, %v2099_v2 }
 0x2f1   :  { %v2203_v46 = vadd.f32 %v2202_v32, %v2174_v27 }
 0x2f2   :  { %2385 = vmatmul.bf16.gmra.mxu2 %v6393_v53  ;;  %v2084_v53 = vadd.f32 %v6190_v9, %v6219_v58 }
 0x2f3   :  { %2433 = vmatmul.bf16.gmra.mxu0 %v6418_v7  ;;  %v6839_v7 = vld [vmem:[%s7498_s5 + $0x6] ss:$2 sm:$0x3] }
 0x2f4   :  { %v2113_v62 = vadd.f32 %v6737_v1, %v2084_v53  ;;  %v6851_v30 = vperm.slane %v6839_v7, 0 }
 0x2f5   :  { %v2154_v28 = vpop.f32.mrf.mxu2 }
 0x2f6   :  { %v2155_v47 = vadd.f32 %v2154_v28, %v2126_v50  ;;  %v2175_v60 = vpop.f32.mrf.mxu3  ;;  %v2142_v58 = vadd.f32 %v6777_v43, %v2113_v62 }
 0x2f7   :  { %v2226_v18 = vpop.f32.mrf.mxu1 }
 0x2f8   :  { %v2227_v17 = vadd.f32 %v2226_v18, %v2198_v42  ;;  %v2204_v4 = vpop.f32.mrf.mxu0  ;;  %v2171_v45 = vadd.f32 %v2170_v49, %v2142_v58 }
 0x2fa   :  { %2457 = vmatmul.bf16.vlgmr.msra.gmra.mxu1 %v6466_v14  ;;  %v2200_v6 = vadd.f32 %v2199_v12, %v2171_v45 }
 0x2fb   :  { %2409 = vmatmul.bf16.gmra.mxu3 %v6477_v35  ;;  %v6847_v35 = vld [vmem:[%s7498_s5 + $0x7] ss:$2 sm:$0x3] }
 0x2fc   :  { %v6855_v61 = vperm.slane %v6847_v35, 0 }
 0x2fd   :  { %v2156_v11 = vpop.f32.mrf.mxu2 }
 0x2fe   :  { %v6832_v5 = vadd.f32 %v2156_v11, %v2128_v33  ;;  %v2178_v38 = vpop.f32.mrf.mxu3 }
 0x2ff   :  { %v2179_v19 = vadd.f32 %v2178_v38, %v2150_v26  ;;  %v2228_v36 = vpop.f32.mrf.mxu1 }
 0x300   :  { %v2207_v14 = vpop.f32.mrf.mxu0  ;;  %v2229_v51 = vadd.f32 %v2228_v36, %v2200_v6 }
 0x301   :  { %v2208_v9 = vadd.f32 %v2207_v14, %v2179_v19 }
 0x302   :  { %4520 = vmatmul.msk.bf16.vlgmr.msra.gmra.mxu2 %vm2030_vm4, %v6491_v13 }
 0x303   :  { %2438 = vmatmul.bf16.gmra.mxu0 %v6514_v22 }
 0x305   :  { %v2255_v55 = vpop.f32.mrf.mxu2 }
 0x306   :  { %v2256_v1 = vadd.f32 %v2255_v55, %v2227_v17  ;;  %v2180_v24 = vpop.f32.mrf.mxu3 }
 0x307   :  { %v2231_v16 = vpop.f32.mrf.mxu1 }
 0x308   :  { %v2514_v13 = vmul.f32 %v6851_v30, %v2256_v1  ;;  %v2232_v56 = vadd.f32 %v2231_v16, %v2203_v46  ;;  %v6859_v43 = vpop.f32.mrf.mxu0 }
 0x30a   :  { %v2537_v34 = vadd.f32 %v6855_v61, %v2514_v13  ;;  %2462 = vmatmul.bf16.gmra.mxu1 %v6538_v31  ;;  %v2176_v31 = vadd.f32 %v2175_v60, %v6811_v57 }
 0x30b   :  { %2414 = vmatmul.bf16.gmra.mxu3 %v6543_v41 }
 0x30c   :  { %v2553_v0 = vadd.f32 3.0, %v2537_v34  ;;  %v2205_v46 = vadd.f32 %v2204_v4, %v2176_v31 }
 0x30d   :  { %v2257_v22 = vpop.f32.mrf.mxu2 }
 0x30e   :  { %v2569_v40 = vmax.f32 %v2553_v0, 0.0  ;;  %v2258_v52 = vadd.f32 %v2257_v22, %v2229_v51  ;;  %v2183_v42 = vpop.f32.mrf.mxu3 }
 0x30f   :  { %v2184_v20 = vadd.f32 %v2183_v42, %v2155_v47  ;;  %v2233_v26 = vpop.f32.mrf.mxu1 }
 0x310   :  { %v2516_v8 = vmul.f32 %v6851_v30, %v2258_v52  ;;  %v2585_v49 = vmin.f32 %v2569_v40, 6.0  ;;  %v2212_v39 = vpop.f32.mrf.mxu0 }
 0x311   :  { %v2213_v50 = vadd.f32 %v2212_v39, %v2184_v20 }
 0x312   :  { %v2539_v15 = vadd.f32 %v6855_v61, %v2516_v8  ;;  %4521 = vmatmul.msk.bf16.gmra.mxu2 %vm2030_vm4, %v6551_v44  ;;  %v2601_v41 = vmul.f32 %v2585_v49, %v2537_v34  ;;  %v2181_v34 = vadd.f32 %v2180_v24, %v6826_v63 }
 0x313   :  { %2443 = vmatmul.bf16.gmra.mxu0 %v6575_v48  ;;  %v2234_v48 = vadd.f32 %v2233_v26, %v2205_v46 }
 0x314   :  { %v2555_v12 = vadd.f32 3.0, %v2539_v15  ;;  %v2617_v47 = vmul.f32 0.16666667, %v2601_v41 }
 0x315   :  { %v2260_v59 = vpop.f32.mrf.mxu2 }
 0x316   :  { %v2571_v29 = vmax.f32 %v2555_v12, 0.0  ;;  %v2261_v3 = vadd.f32 %v2260_v59, %v2232_v56  ;;  %v6870_v32 = vpop.f32.mrf.mxu3  ;;  %v2674_v11 = vrot.slane %v2617_v47, 2 }
 0x317   :  { %v2236_v28 = vpop.f32.mrf.mxu1 }
 0x318   :  { %v2587_v10 = vmin.f32 %v2571_v29, 6.0  ;;  %v2518_v27 = vmul.f32 %v6851_v30, %v2261_v3  ;;  %v2237_v2 = vadd.f32 %v2236_v28, %v2208_v9  ;;  %v6873_v17 = vpop.f32.mrf.mxu0 }
 0x31a   :  { %v2603_v44 = vmul.f32 %v2587_v10, %v2539_v15  ;;  %v2541_v18 = vadd.f32 %v6855_v61, %v2518_v27  ;;  %2467 = vmatmul.bf16.gmra.mxu1 %v6592_v25 }
 0x31c   :  { %v2619_v57 = vmul.f32 0.16666667, %v2603_v44  ;;  %v2557_v60 = vadd.f32 3.0, %v2541_v18 }
 0x31d   :  { %v2262_v33 = vpop.f32.mrf.mxu2 }
 0x31e   :  { %v2675_v53 = vrot.slane %v2619_v57, 2  ;;  %v2573_v38 = vmax.f32 %v2557_v60, 0.0  ;;  %v2263_v19 = vadd.f32 %v2262_v33, %v2234_v48  ;;  %v2284_v62 = vpop.f32.mrf.mxu3 }
 0x31f   :  { %v2238_v58 = vpop.f32.mrf.mxu1 }
 0x320   :  { %v2589_v36 = vmin.f32 %v2573_v38, 6.0  ;;  %v2520_v4 = vmul.f32 %v6851_v30, %v2263_v19  ;;  %v2676_v14 = vsel %vm1181_vm1, %v2674_v11, %v2675_v53  ;;  %v2313_v25 = vpop.f32.mrf.mxu0 }
 0x321   :  { %v6878_v9 = vmax.f32 %v2617_v47, %v2676_v14  ;;  %v2314_v1 = vadd.f32 %v2313_v25, %v2284_v62 }
 0x322   :  { %v2605_v55 = vmul.f32 %v2589_v36, %v2541_v18  ;;  %v2543_v45 = vadd.f32 %v6855_v61, %v2520_v4  ;;  %4522 = vmatmul.msk.bf16.gmra.mxu2 %vm2030_vm4, %v6598_v23  ;;  %v2210_v23 = vadd.f32 %v6859_v43, %v2181_v34 }
 0x324   :  { %v2621_v13 = vmul.f32 0.16666667, %v2605_v55  ;;  %v2559_v16 = vadd.f32 3.0, %v2543_v45  ;;  %v2239_v12 = vadd.f32 %v2238_v58, %v2210_v23 }
 0x325   :  { %v2265_v6 = vpop.f32.mrf.mxu2 }
 0x326   :  { %v2680_v56 = vrot.slane %v2621_v13, 2  ;;  %v2575_v0 = vmax.f32 %v2559_v16, 0.0  ;;  %v2266_v51 = vadd.f32 %v2265_v6, %v2237_v2  ;;  %v6885_v52 = vpop.f32.mrf.mxu3 }
 0x327   :  { %v2241_v42 = vpop.f32.mrf.mxu1 }
 0x328   :  { %v2591_v22 = vmin.f32 %v2575_v0, 6.0  ;;  %v2522_v40 = vmul.f32 %v6851_v30, %v2266_v51  ;;  %v2681_v8 = vsel %vm1181_vm1, %v2675_v53, %v2680_v56  ;;  %v2242_v15 = vadd.f32 %v2241_v42, %v2213_v50  ;;  %v6892_v63 = vpop.f32.mrf.mxu0 }
 0x329   :  { %v6888_v20 = vmax.f32 %v2619_v57, %v2681_v8  ;;  %v2186_v57 = vadd.f32 %v6870_v32, %v6832_v5 }
 0x32a   :  { %v2607_v26 = vmul.f32 %v2591_v22, %v2543_v45  ;;  %v2545_v49 = vadd.f32 %v6855_v61, %v2522_v40  ;;  %2472 = vmatmul.bf16.gmra.mxu1 %v6650_v21 }
 0x32c   :  { %v2623_v24 = vmul.f32 0.16666667, %v2607_v26  ;;  %v2561_v39 = vadd.f32 3.0, %v2545_v49 }
 0x32d   :  { %v2267_v31 = vpop.f32.mrf.mxu2 }
 0x32e   :  { %v2684_v59 = vrot.slane %v2623_v24, 2  ;;  %v2577_v41 = vmax.f32 %v2561_v39, 0.0  ;;  %v2268_v29 = vadd.f32 %v2267_v31, %v2239_v12  ;;  %v6897_v46 = vpop.f32.mrf.mxu3 }
 0x32f   :  { %v2243_v27 = vpop.f32.mrf.mxu1 }
 0x330   :  { %v2593_v3 = vmin.f32 %v2577_v41, 6.0  ;;  %v2524_v10 = vmul.f32 %v6851_v30, %v2268_v29  ;;  %v2685_v43 = vsel %vm1181_vm1, %v2680_v56, %v2684_v59  ;;  %v6904_v2 = vpop.f32.mrf.mxu0 }
 0x331   :  { %v6899_v50 = vmax.f32 %v2621_v13, %v2685_v43 }
 0x332   :  { %v2609_v28 = vmul.f32 %v2593_v3, %v2545_v49  ;;  %v2547_v47 = vadd.f32 %v6855_v61, %v2524_v10  ;;  %4523 = vmatmul.msk.bf16.gmra.mxu2 %vm2030_vm4, %v6667_v54  ;;  %v2215_v54 = vadd.f32 %v6873_v17, %v2186_v57 }
 0x334   :  { %v2625_v21 = vmul.f32 0.16666667, %v2609_v28  ;;  %v2563_v44 = vadd.f32 3.0, %v2547_v47  ;;  %v2244_v55 = vadd.f32 %v2243_v27, %v2215_v54 }
 0x335   :  { %v2270_v18 = vpop.f32.mrf.mxu2 }
 0x336   :  { %v2688_v60 = vrot.slane %v2625_v21, 2  ;;  %v2579_v48 = vmax.f32 %v2563_v44, 0.0  ;;  %v2271_v33 = vadd.f32 %v2270_v18, %v2242_v15  ;;  %v6914_v58 = vpop.f32.mrf.mxu3 }
 0x337   :  { %v2342_v19 = vpop.f32.mrf.mxu1 }
 0x338   :  { %v2595_v11 = vmin.f32 %v2579_v48, 6.0  ;;  %v2526_v53 = vmul.f32 %v6851_v30, %v2271_v33  ;;  %v2689_v38 = vsel %vm1181_vm1, %v2684_v59, %v2688_v60  ;;  %v2343_v14 = vadd.f32 %v2342_v19, %v2314_v1  ;;  %v6916_v6 = vpop.f32.mrf.mxu0 }
 0x339   :  { %v6910_v36 = vmax.f32 %v2623_v24, %v2689_v38 }
 0x33a   :  { %v2611_v4 = vmul.f32 %v2595_v11, %v2547_v47  ;;  %v2549_v62 = vadd.f32 %v6855_v61, %v2526_v53 }
 0x33c   :  { %v2627_v5 = vmul.f32 0.16666667, %v2611_v4  ;;  %v2565_v32 = vadd.f32 3.0, %v2549_v62 }
 0x33d   :  { %v2272_v45 = vpop.f32.mrf.mxu2 }
 0x33e   :  { %v2692_v25 = vrot.slane %v2627_v5, 2  ;;  %v2581_v13 = vmax.f32 %v2565_v32, 0.0  ;;  %v2273_v16 = vadd.f32 %v2272_v45, %v2244_v55  ;;  %v6923_v23 = vpop.f32.mrf.mxu3 }
 0x33f   :  { %v2344_v0 = vpop.f32.mrf.mxu1 }
 0x340   :  { %v2597_v34 = vmin.f32 %v2581_v13, 6.0  ;;  %v2528_v56 = vmul.f32 %v6851_v30, %v2273_v16  ;;  %v2693_v17 = vsel %vm1181_vm1, %v2688_v60, %v2692_v25  ;;  %v6926_v30 = vpop.f32.mrf.mxu0 }
 0x341   :  { %v6920_v51 = vmax.f32 %v2625_v21, %v2693_v17 }
 0x342   :  { %v2613_v1 = vmul.f32 %v2597_v34, %v2549_v62  ;;  %v2551_v22 = vadd.f32 %v6855_v61, %v2528_v56 }
 0x344   :  { %v2629_v40 = vmul.f32 0.16666667, %v2613_v1  ;;  %v2567_v8 = vadd.f32 3.0, %v2551_v22 }
 0x345   :  { %v2371_v42 = vpop.f32.mrf.mxu2 }
 0x346   :  { %v2696_v26 = vrot.slane %v2629_v40, 2  ;;  %v2583_v49 = vmax.f32 %v2567_v8, 0.0  ;;  %v2372_v15 = vadd.f32 %v2371_v42, %v2343_v14  ;;  %v6933_v3 = vpop.f32.mrf.mxu3 }
 0x347   :  { %v2347_v12 = vpop.f32.mrf.mxu1 }
 0x348   :  { %v2599_v24 = vmin.f32 %v2583_v49, 6.0  ;;  %v2697_v39 = vsel %vm1181_vm1, %v2692_v25, %v2696_v26  ;;  %v6940_v28 = vpop.f32.mrf.mxu0  ;;  %v2316_v25 = vadd.f32 %v6892_v63, %v6885_v52  ;;  %v6972_v49 = vperm.slane %v6847_v35, 1 }
 0x349   :  { %v6928_v31 = vmax.f32 %v2627_v5, %v2697_v39 }
 0x34a   :  { %v2615_v59 = vmul.f32 %v2599_v24, %v2551_v22  ;;  %v2345_v34 = vadd.f32 %v2344_v0, %v2316_v25  ;;  %v6969_v22 = vperm.slane %v6839_v7, 1 }
 0x34c   :  { %v6930_v41 = vmul.f32 0.16666667, %v2615_v59 }
 0x34d   :  { %v2373_v61 = vpop.f32.mrf.mxu2 }
 0x34e   :  { %v2700_v29 = vrot.slane %v6930_v41, 2  ;;  %v6942_v21 = vpop.f32.mrf.mxu3  ;;  %v2374_v17 = vadd.f32 %v2373_v61, %v2345_v34 }
 0x34f   :  { %v2349_v43 = vpop.f32.mrf.mxu1 }
 0x350   :  { %v2701_v10 = vsel %vm1181_vm1, %v2696_v26, %v2700_v29  ;;  %v6946_v18 = vpop.f32.mrf.mxu0 }
 0x351   :  { %v6938_v27 = vmax.f32 %v2629_v40, %v2701_v10 }
 0x355   :  { %v2376_v47 = vpop.f32.mrf.mxu2 }
 0x356   :  { %v6950_v48 = vpop.f32.mrf.mxu3 }
 0x357   :  { %v6944_v44 = vpop.f32.mrf.mxu1 }
 0x358   :  { %v6954_v11 = vpop.f32.mrf.mxu0 }
 0x35d   :  { %v2378_v57 = vpop.f32.mrf.mxu2 }
 0x35e   :  { %v2400_v38 = vpop.f32.mrf.mxu3 }
 0x35f   :  { %v6948_v60 = vpop.f32.mrf.mxu1  ;;  %v2401_v45 = vadd.f32 %v2400_v38, %v2372_v15  ;;  %v2319_v15 = vadd.f32 %v6904_v2, %v6897_v46 }
 0x360   :  { %v2429_v54 = vpop.f32.mrf.mxu0 }
 0x361   :  { %v2430_v56 = vadd.f32 %v2429_v54, %v2401_v45  ;;  %v2348_v0 = vadd.f32 %v2347_v12, %v2319_v15  ;;  %v2321_v45 = vadd.f32 %v6916_v6, %v6914_v58  ;;  %v2324_v58 = vadd.f32 %v6926_v30, %v6923_v23 }
 0x363   :  { %v2377_v7 = vadd.f32 %v2376_v47, %v2348_v0  ;;  %v2350_v25 = vadd.f32 %v2349_v43, %v2321_v45  ;;  %v2353_v43 = vadd.f32 %v6944_v44, %v2324_v58  ;;  %v2326_v44 = vadd.f32 %v6940_v28, %v6933_v3 }
 0x365   :  { %v6952_v33 = vpop.f32.mrf.mxu2 }
 0x366   :  { %v2402_v14 = vpop.f32.mrf.mxu3 }
 0x367   :  { %v6956_v53 = vpop.f32.mrf.mxu1  ;;  %v2403_v42 = vadd.f32 %v2402_v14, %v2374_v17 }
 0x368   :  { %v2431_v32 = vpop.f32.mrf.mxu0 }
 0x369   :  { %v2432_v24 = vadd.f32 %v2431_v32, %v2403_v42 }
 0x36d   :  { %v6958_v19 = vpop.f32.mrf.mxu2 }
 0x36e   :  { %v2405_v13 = vpop.f32.mrf.mxu3 }
 0x36f   :  { %v6960_v4 = vpop.f32.mrf.mxu1  ;;  %v2406_v54 = vadd.f32 %v2405_v13, %v2377_v7 }
 0x370   :  { %v2434_v40 = vpop.f32.mrf.mxu0 }
 0x371   :  { %v2435_v12 = vadd.f32 %v2434_v40, %v2406_v54 }
 0x375   :  { %v6962_v62 = vpop.f32.mrf.mxu2 }
 0x376   :  { %v2407_v59 = vpop.f32.mrf.mxu3 }
 0x377   :  { %v2458_v5 = vpop.f32.mrf.mxu1 }
 0x378   :  { %v2459_v1 = vadd.f32 %v2458_v5, %v2430_v56  ;;  %v2436_v35 = vpop.f32.mrf.mxu0  ;;  %v2379_v56 = vadd.f32 %v2378_v57, %v2350_v25  ;;  %v2355_v25 = vadd.f32 %v6948_v60, %v2326_v44  ;;  %v2329_v60 = vadd.f32 %v6946_v18, %v6942_v21 }
 0x37a   :  { %v2408_v13 = vadd.f32 %v2407_v59, %v2379_v56  ;;  %v2384_v56 = vadd.f32 %v6958_v19, %v2355_v25 }
 0x37d   :  { %v6964_v55 = vpop.f32.mrf.mxu2 }
 0x37f   :  { %v2460_v16 = vpop.f32.mrf.mxu1 }
 0x380   :  { %v2461_v10 = vadd.f32 %v2460_v16, %v2432_v24  ;;  %v2410_v16 = vpop.f32.mrf.mxu3  ;;  %v2439_v40 = vpop.f32.mrf.mxu0  ;;  %v2382_v24 = vadd.f32 %v6952_v33, %v2353_v43 }
 0x385   :  { %v2487_v8 = vpop.f32.mrf.mxu2 }
 0x386   :  { %v2488_v26 = vadd.f32 %v2487_v8, %v2459_v1 }
 0x387   :  { %v2463_v63 = vpop.f32.mrf.mxu1 }
 0x388   :  { %v2515_v52 = vmul.f32 %v6969_v22, %v2488_v26  ;;  %v2464_v17 = vadd.f32 %v2463_v63, %v2435_v12 }
 0x38a   :  { %v2538_v39 = vadd.f32 %v6972_v49, %v2515_v52  ;;  %v2437_v52 = vadd.f32 %v2436_v35, %v2408_v13 }
 0x38c   :  { %v2554_v61 = vadd.f32 3.0, %v2538_v39 }
 0x38d   :  { %v2489_v38 = vpop.f32.mrf.mxu2 }
 0x38e   :  { %v2570_v14 = vmax.f32 %v2554_v61, 0.0  ;;  %v2490_v5 = vadd.f32 %v2489_v38, %v2461_v10  ;;  %v2411_v10 = vadd.f32 %v2410_v16, %v2382_v24 }
 0x38f   :  { %v2465_v2 = vpop.f32.mrf.mxu1 }
 0x390   :  { %v2517_v46 = vmul.f32 %v6969_v22, %v2490_v5  ;;  %v2586_v32 = vmin.f32 %v2570_v14, 6.0  ;;  %v2466_v61 = vadd.f32 %v2465_v2, %v2437_v52  ;;  %v2412_v5 = vpop.f32.mrf.mxu3  ;;  %v2440_v2 = vadd.f32 %v2439_v40, %v2411_v10 }
 0x391   :  { %v2358_v40 = vadd.f32 %v6956_v53, %v2329_v60  ;;  %v2331_v53 = vadd.f32 %v6954_v11, %v6950_v48  ;;  %v4949_v60 = vld [vmem:[%s7500_s3 + $0xc8] sm:$0xff] }
 0x392   :  { %v2540_v34 = vadd.f32 %v6972_v49, %v2517_v46  ;;  %v2602_v8 = vmul.f32 %v2586_v32, %v2538_v39 }
 0x393   :  { %v2360_v44 = vadd.f32 %v6960_v4, %v2331_v53 }
 0x394   :  { %v2556_v47 = vadd.f32 3.0, %v2540_v34  ;;  %v2618_v0 = vmul.f32 0.16666667, %v2602_v8 }
 0x395   :  { %v2492_v1 = vpop.f32.mrf.mxu2 }
 0x396   :  { %v2572_v42 = vmax.f32 %v2556_v47, 0.0  ;;  %v2493_v26 = vadd.f32 %v2492_v1, %v2464_v17  ;;  %v2677_v23 = vrot.slane %v2618_v0, 2  ;;  %v2413_v1 = vadd.f32 %v2412_v5, %v2384_v56 }
 0x397   :  { %v2468_v59 = vpop.f32.mrf.mxu1 }
 0x398   :  { %v2588_v6 = vmin.f32 %v2572_v42, 6.0  ;;  %v2519_v15 = vmul.f32 %v6969_v22, %v2493_v26  ;;  %v2469_v16 = vadd.f32 %v2468_v59, %v2440_v2  ;;  %v2389_v2 = vadd.f32 %v6964_v55, %v2360_v44 }
 0x399   :  { %v7079_v44 = vmax.f32 %v6930_v41, %v2700_v29  ;;  %v4931_v41 = vld [vmem:[%s7500_s3 + $0x38] sm:$0xff]  ;;  %v4930_v29 = vld [vmem:[%s7500_s3 + $0x30] sm:$0xff] }
 0x39a   :  { %v2604_v57 = vmul.f32 %v2588_v6, %v2540_v34  ;;  %v2542_v63 = vadd.f32 %v6972_v49, %v2519_v15  ;;  %v2441_v34 = vpop.f32.mrf.mxu0  ;;  %v2415_v15 = vpop.f32.mrf.mxu3  ;;  %3294 = vmatpush.bf16.msra.mxu3 %v4931_v41 }
 0x39b   :  { %v2442_v52 = vadd.f32 %v2441_v34, %v2413_v1 }
 0x39c   :  { %v2620_v39 = vmul.f32 0.16666667, %v2604_v57  ;;  %v2558_v7 = vadd.f32 3.0, %v2542_v63 }
 0x39d   :  { %v2494_v38 = vpop.f32.mrf.mxu2 }
 0x39e   :  { %v2678_v30 = vrot.slane %v2620_v39, 2  ;;  %v2574_v54 = vmax.f32 %v2558_v7, 0.0  ;;  %v2495_v14 = vadd.f32 %v2494_v38, %v2466_v61  ;;  %3295 = vmatpush.bf16.msra.mxu3 %v4930_v29 }
 0x39f   :  { %v2470_v28 = vpop.f32.mrf.mxu1 }
 0x3a0   :  { %v2590_v35 = vmin.f32 %v2574_v54, 6.0  ;;  %v2521_v45 = vmul.f32 %v6969_v22, %v2495_v14  ;;  %v2679_v46 = vsel %vm1181_vm1, %v2677_v23, %v2678_v30  ;;  %v2471_v24 = vadd.f32 %v2470_v28, %v2442_v52 }
 0x3a1   :  { %v6992_v33 = vmax.f32 %v2618_v0, %v2679_v46 }
 0x3a2   :  { %v2606_v12 = vmul.f32 %v2590_v35, %v2542_v63  ;;  %v2544_v32 = vadd.f32 %v6972_v49, %v2521_v45  ;;  %v2387_v63 = vadd.f32 %v6962_v62, %v2358_v40  ;;  %v2444_v59 = vpop.f32.mrf.mxu0  ;;  %v2417_v25 = vpop.f32.mrf.mxu3 }
 0x3a3   :  { %v5054_v26 = vpack.i.bf16 %v6992_v33, %v6878_v9  ;;  %v2418_v34 = vadd.f32 %v2417_v25, %v2389_v2  ;;  %v4929_v2 = vld [vmem:[%s7500_s3 + $0x28] sm:$0xff] }
 0x3a4   :  { %v2622_v47 = vmul.f32 0.16666667, %v2606_v12  ;;  %v2560_v17 = vadd.f32 3.0, %v2544_v32  ;;  %v2416_v61 = vadd.f32 %v2415_v15, %v2387_v63  ;;  %3296 = vmatpush.bf16.msra.mxu3 %v4929_v2 }
 0x3a5   :  { %v2497_v3 = vpop.f32.mrf.mxu2  ;;  %5055 = vrot.lane.b32.xlu2 %v5054_v26, %s5119_s20 }
 0x3a6   :  { %v2682_v13 = vrot.slane %v2622_v47, 2  ;;  %v2576_v8 = vmax.f32 %v2560_v17, 0.0  ;;  %v2498_v42 = vadd.f32 %v2497_v3, %v2469_v16  ;;  %v2445_v35 = vadd.f32 %v2444_v59, %v2416_v61 }
 0x3a8   :  { %v2592_v58 = vmin.f32 %v2576_v8, 6.0  ;;  %v2523_v6 = vmul.f32 %v6969_v22, %v2498_v42  ;;  %v2683_v19 = vsel %vm1181_vm1, %v2678_v30, %v2682_v13  ;;  %v2473_v30 = vpop.f32.mrf.mxu1 }
 0x3a9   :  { %v7004_v43 = vmax.f32 %v2620_v39, %v2683_v19  ;;  %v2474_v11 = vadd.f32 %v2473_v30, %v2445_v35 }
 0x3aa   :  { %v2608_v0 = vmul.f32 %v2592_v58, %v2544_v32  ;;  %v2546_v57 = vadd.f32 %v6972_v49, %v2523_v6  ;;  %v2446_v3 = vpop.f32.mrf.mxu0 }
 0x3ab   :  { %v5059_v39 = vpack.i.bf16 %v7004_v43, %v6888_v20  ;;  %v2447_v8 = vadd.f32 %v2446_v3, %v2418_v34 }
 0x3ac   :  { %v2624_v21 = vmul.f32 0.16666667, %v2608_v0  ;;  %v2562_v18 = vadd.f32 3.0, %v2546_v57 }
 0x3ad   :  { %v2499_v7 = vpop.f32.mrf.mxu2  ;;  %5060 = vrot.lane.b32.xlu0 %v5059_v39, %s5119_s20 }
 0x3ae   :  { %v2686_v10 = vrot.slane %v2624_v21, 2  ;;  %v2578_v38 = vmax.f32 %v2562_v18, 0.0  ;;  %v2500_v23 = vadd.f32 %v2499_v7, %v2471_v24 }
 0x3b0   :  { %v2594_v54 = vmin.f32 %v2578_v38, 6.0  ;;  %v2525_v14 = vmul.f32 %v6969_v22, %v2500_v23  ;;  %v2687_v62 = vsel %vm1181_vm1, %v2682_v13, %v2686_v10  ;;  %v2475_v13 = vpop.f32.mrf.mxu1 }
 0x3b1   :  { %v7016_v5 = vmax.f32 %v2622_v47, %v2687_v62  ;;  %v2476_v19 = vadd.f32 %v2475_v13, %v2447_v8  ;;  %v4925_v13 = vld [vmem:[%s7500_s3 + $0x8] sm:$0xff]  ;;  %v4951_v8 = vld [vmem:[%s7500_s3 + $0xd8] sm:$0xff] }
 0x3b2   :  { %v2610_v45 = vmul.f32 %v2594_v54, %v2546_v57  ;;  %v2548_v46 = vadd.f32 %v6972_v49, %v2525_v14 }
 0x3b3   :  { %v5064_v47 = vpack.i.bf16 %v7016_v5, %v6899_v50 }
 0x3b4   :  { %v2626_v12 = vmul.f32 0.16666667, %v2610_v45  ;;  %v2564_v48 = vadd.f32 3.0, %v2548_v46 }
 0x3b5   :  { %v2502_v32 = vpop.f32.mrf.mxu2  ;;  %5065 = vrot.lane.b32.xlu1 %v5064_v47, %s5119_s20  ;;  %v4957_v47 = vld [vmem:[%s7500_s3 + $0x108] sm:$0xff] }
 0x3b6   :  { %v2690_v56 = vrot.slane %v2626_v12, 2  ;;  %v2580_v17 = vmax.f32 %v2564_v48, 0.0  ;;  %v2503_v16 = vadd.f32 %v2502_v32, %v2474_v11 }
 0x3b8   :  { %v2596_v4 = vmin.f32 %v2580_v17, 6.0  ;;  %v2527_v28 = vmul.f32 %v6969_v22, %v2503_v16  ;;  %v2691_v1 = vsel %vm1181_vm1, %v2686_v10, %v2690_v56  ;;  %v4928_v17 = vld [vmem:[%s7500_s3 + $0x20] sm:$0xff]  ;;  %v4954_v16 = vld [vmem:[%s7500_s3 + $0xf0] sm:$0xff] }
 0x3b9   :  { %v7026_v55 = vmax.f32 %v2624_v21, %v2691_v1  ;;  %3297 = vmatpush.bf16.msra.mxu3 %v4928_v17  ;;  %v4952_v1 = vld [vmem:[%s7500_s3 + $0xe0] sm:$0xff] }
 0x3ba   :  { %v2612_v42 = vmul.f32 %v2596_v4, %v2548_v46  ;;  %v2550_v26 = vadd.f32 %v6972_v49, %v2527_v28  ;;  %v4927_v4 = vld [vmem:[%s7500_s3 + $0x18] sm:$0xff]  ;;  %v4953_v28 = vld [vmem:[%s7500_s3 + $0xe8] sm:$0xff] }
 0x3bb   :  { %v5069_v57 = vpack.i.bf16 %v7026_v55, %v6910_v36 }
 0x3bc   :  { %v2628_v58 = vmul.f32 0.16666667, %v2612_v42  ;;  %v2566_v6 = vadd.f32 3.0, %v2550_v26  ;;  %v4924_v42 = vld [vmem:[%s7500_s3] sm:$0xff] }
 0x3bd   :  { %v2504_v15 = vpop.f32.mrf.mxu2  ;;  %5070 = vrot.lane.b32.xlu2 %v5069_v57, %s5119_s20  ;;  %3298 = vmatpush.bf16.msra.mxu3 %v4927_v4 }
 0x3be   :  { %v2694_v40 = vrot.slane %v2628_v58, 2  ;;  %v2582_v52 = vmax.f32 %v2566_v6, 0.0  ;;  %v2505_v0 = vadd.f32 %v2504_v15, %v2476_v19 }
 0x3c0   :  { %v2598_v63 = vmin.f32 %v2582_v52, 6.0  ;;  %v2529_v21 = vmul.f32 %v6969_v22, %v2505_v0  ;;  %v2695_v18 = vsel %vm1181_vm1, %v2690_v56, %v2694_v40  ;;  %v4948_v52 = vld [vmem:[%s7500_s3 + $0xc0] sm:$0xff] }
 0x3c1   :  { %v7057_v24 = vmax.f32 %v2626_v12, %v2695_v18  ;;  %v4955_v12 = vld [vmem:[%s7500_s3 + $0xf8] sm:$0xff] }
 0x3c2   :  { %v2614_v59 = vmul.f32 %v2598_v63, %v2550_v26  ;;  %v2552_v7 = vadd.f32 %v6972_v49, %v2529_v21  ;;  %3378 = vmatpush.bf16.msrb.mxu2 %v4955_v12  ;;  %v4950_v26 = vld [vmem:[%s7500_s3 + $0xd0] sm:$0xff] }
 0x3c3   :  { %v5074_v23 = vpack.i.bf16 %v7057_v24, %v6920_v51 }
 0x3c4   :  { %v2630_v22 = vmul.f32 0.16666667, %v2614_v59  ;;  %v2568_v61 = vadd.f32 3.0, %v2552_v7 }
 0x3c5   :  { %5075 = vrot.lane.b32.xlu0 %v5074_v23, %s5119_s20 }
 0x3c6   :  { %v2698_v10 = vrot.slane %v2630_v22, 2  ;;  %v2584_v38 = vmax.f32 %v2568_v61, 0.0  ;;  %3379 = vmatpush.bf16.msrb.mxu2 %v4954_v16 }
 0x3c8   :  { %v2600_v30 = vmin.f32 %v2584_v38, 6.0  ;;  %v2699_v39 = vsel %vm1181_vm1, %v2694_v40, %v2698_v10 }
 0x3c9   :  { %v7070_v53 = vmax.f32 %v2628_v58, %v2699_v39 }
 0x3ca   :  { %v2616_v54 = vmul.f32 %v2600_v30, %v2552_v7  ;;  %3380 = vmatpush.bf16.msrb.mxu2 %v4953_v28 }
 0x3cb   :  { %v5079_v37 = vpack.i.bf16 %v7070_v53, %v6928_v31 }
 0x3cc   :  { %v2632_v49 = vmul.f32 0.16666667, %v2616_v54 }
 0x3cd   :  { %5080 = vrot.lane.b32.xlu1 %v5079_v37, %s5119_s20 }
 0x3ce   :  { %v2702_v14 = vrot.slane %v2632_v49, 2  ;;  %3381 = vmatpush.bf16.msrb.mxu2 %v4952_v1 }
 0x3d0   :  { %v7074_v62 = vmax.f32 %v2632_v49, %v2702_v14  ;;  %v2703_v35 = vsel %vm1181_vm1, %v2698_v10, %v2702_v14 }
 0x3d1   :  { %v7083_v45 = vmax.f32 %v2630_v22, %v2703_v35 }
 0x3d2   :  { %v5089_v46 = vpack.i.bf16 %v7074_v62, %v7079_v44  ;;  %3382 = vmatpush.bf16.msrb.mxu2 %v4951_v8 }
 0x3d3   :  { %v5084_v25 = vpack.i.bf16 %v7083_v45, %v6938_v27 }
 0x3d4   :  { %5090 = vrot.lane.b32.xlu0 %v5089_v46, %s5119_s20 }
 0x3d5   :  { %5085 = vrot.lane.b32.xlu2 %v5084_v25, %s5119_s20 }
 0x3d6   :  { %3383 = vmatpush.bf16.msrb.mxu2 %v4950_v26 }
 0x3da   :  { %3384 = vmatpush.bf16.msrb.mxu2 %v4949_v60 }
 0x3de   :  { %3385 = vmatpush.bf16.msrb.mxu2 %v4948_v52 }
 0x3ff   :  { %v5056_v48 = vpop.permute.xlu2 %5055 }
 0x400   :  { %v5058_v11 = vunpack.i.h.bf16 %v5056_v48  ;;  %v5057_v32 = vunpack.i.l.bf16 %v5056_v48 }
 0x402   :  { %v2833_v34 = vmax.f32 %v6992_v33, %v5058_v11  ;;  %v2808_v56 = vsel %vm2030_vm4, %v5057_v32, %v5058_v11 }
 0x403   :  { %v2832_v3 = vmax.f32 %v6878_v9, %v2808_v56  ;;  %v4926_v9 = vld [vmem:[%s7500_s3 + $0x10] sm:$0xff] }
 0x404   :  { %3299 = vmatpush.bf16.msra.mxu3 %v4926_v9 }
 0x405   :  { %v2848_v33 = vpack.c.bf16 %v2833_v34, %v2832_v3 }
 0x407   :  { %2859 = vst.msk [vmem:[#allocation3] sm:$0xff] %vm7113_vm9, %v2848_v33 }
 0x408   :  { %3300 = vmatpush.bf16.msra.mxu3 %v4925_v13 }
 0x40c   :  { %3301 = vmatpush.bf16.msra.mxu3 %v4924_v42 }
 0x40e   :  { %v2870_v39 = vld [vmem:[#allocation3] sm:$0xff] }
 0x40f   :  { %v2887_v49 = vunpack.c.l.b16 %v2870_v39  ;;  %v2888_v35 = vunpack.c.h.b16 %v2870_v39 }
 0x417   :  { %v5071_v58 = vpop.permute.xlu2 %5070 }
 0x418   :  { %v5073_v6 = vunpack.i.h.bf16 %v5071_v58  ;;  %v5072_v19 = vunpack.i.l.bf16 %v5071_v58 }
 0x41a   :  { %v2839_v15 = vmax.f32 %v7026_v55, %v5073_v6  ;;  %v2811_v40 = vsel %vm2030_vm4, %v5072_v19, %v5073_v6 }
 0x41b   :  { %v2838_v0 = vmax.f32 %v6910_v36, %v2811_v40 }
 0x41d   :  { %v2851_v57 = vpack.c.bf16 %v2839_v15, %v2838_v0 }
 0x41f   :  { %2862 = vst.msk [vmem:[#allocation3 + $0x18] sm:$0xff] %vm7113_vm9, %v2851_v57  ;;  %v5061_v63 = vpop.permute.xlu0 %5060 }
 0x420   :  { %v5063_v21 = vunpack.i.h.bf16 %v5061_v63  ;;  %v5062_v18 = vunpack.i.l.bf16 %v5061_v63 }
 0x422   :  { %v2835_v59 = vmax.f32 %v7004_v43, %v5063_v21  ;;  %v2809_v55 = vsel %vm2030_vm4, %v5062_v18, %v5063_v21 }
 0x423   :  { %v2834_v7 = vmax.f32 %v6888_v20, %v2809_v55 }
 0x425   :  { %v2849_v22 = vpack.c.bf16 %v2835_v59, %v2834_v7  ;;  %v4959_v59 = vld [vmem:[%s7500_s3 + $0x118] sm:$0xff]  ;;  %v4958_v7 = vld [vmem:[%s7500_s3 + $0x110] sm:$0xff] }
 0x426   :  { %v7172_v48 = vld [vmem:[#allocation3 + $0x18] sm:$0xff]  ;;  %3410 = vmatpush.bf16.msrb.mxu3 %v4959_v59 }
 0x427   :  { %2860 = vst.msk [vmem:[#allocation3 + $0x8] sm:$0xff] %vm7113_vm9, %v2849_v22  ;;  %v5066_v61 = vpop.permute.xlu1 %5065  ;;  %v2893_v17 = vunpack.c.l.b16 %v7172_v48 }
 0x428   :  { %v5068_v36 = vunpack.i.h.bf16 %v5066_v61  ;;  %v5067_v10 = vunpack.i.l.bf16 %v5066_v61 }
 0x42a   :  { %v2837_v38 = vmax.f32 %v7016_v5, %v5068_v36  ;;  %v2810_v23 = vsel %vm2030_vm4, %v5067_v10, %v5068_v36  ;;  %v2877_v5 = vld [vmem:[#allocation3] sm:$0xcc]  ;;  %3411 = vmatpush.bf16.msrb.mxu3 %v4958_v7 }
 0x42b   :  { %v2836_v30 = vmax.f32 %v6899_v50, %v2810_v23  ;;  %v2915_v11 = vunpack.c.l.b16 %v2877_v5  ;;  %v2916_v34 = vunpack.c.h.b16 %v2877_v5  ;;  %v4947_v5 = vld [vmem:[%s7500_s3 + $0xb8] sm:$0xff] }
 0x42c   :  { %3350 = vmatpush.bf16.msrb.mxu1 %v4947_v5 }
 0x42d   :  { %v2850_v54 = vpack.c.bf16 %v2837_v38, %v2836_v30 }
 0x42e   :  { %v2871_v43 = vld [vmem:[#allocation3 + $0x8] sm:$0xff]  ;;  %3412 = vmatpush.bf16.msrb.mxu3 %v4957_v47 }
 0x42f   :  { %2861 = vst.msk [vmem:[#allocation3 + $0x10] sm:$0xff] %vm7113_vm9, %v2850_v54  ;;  %v5086_v20 = vpop.permute.xlu2 %5085  ;;  %v2889_v14 = vunpack.c.l.b16 %v2871_v43  ;;  %v7164_v37 = vunpack.c.h.b16 %v2871_v43  ;;  %v4956_v54 = vld [vmem:[%s7500_s3 + $0x100] sm:$0xff] }
 0x430   :  { %v5088_v46 = vunpack.i.h.bf16 %v5086_v20  ;;  %v5087_v25 = vunpack.i.l.bf16 %v5086_v20 }
 0x431   :  { %v2901_v41 = vpack.c.b16 %v2889_v14, %v2887_v49  ;;  %v7167_v29 = vpack.c.b16 %v7164_v37, %v2888_v35  ;;  %v2919_v16 = vpack.c.b16 %v2889_v14, %v2915_v11  ;;  %v2920_v4 = vpack.c.b16 %v7164_v37, %v2916_v34  ;;  %v4938_v11 = vld [vmem:[%s7500_s3 + $0x70] sm:$0xff] }
 0x432   :  { %v2845_v50 = vmax.f32 %v7083_v45, %v5088_v46  ;;  %v2814_v2 = vsel %vm2030_vm4, %v5087_v25, %v5088_v46  ;;  %3413 = vmatpush.bf16.msrb.mxu3 %v4956_v54 }
 0x433   :  { %v2844_v12 = vmax.f32 %v6938_v27, %v2814_v2  ;;  %3302 = vmatmul.bf16.vlgmr.msra.gmra.mxu3 %v2901_v41  ;;  %v2894_v27 = vunpack.c.h.b16 %v7172_v48  ;;  %v2923_v60 = vrot.slane %v2919_v16, 2  ;;  %v2926_v19 = vrot.slane %v2920_v4, 2  ;;  %v4939_v41 = vld [vmem:[%s7500_s3 + $0x78] sm:$0xff]  ;;  %v4932_v48 = vld [vmem:[%s7500_s3 + $0x40] sm:$0xff] }
 0x434   :  { %3322 = vmatpush.bf16.msrb.mxu0 %v4939_v41 }
 0x435   :  { %v2854_v32 = vpack.c.bf16 %v2845_v50, %v2844_v12 }
 0x436   :  { %v7174_v56 = vld [vmem:[#allocation3 + $0x10] sm:$0xff] }
 0x437   :  { %2865 = vst.msk [vmem:[#allocation3 + $0x30] sm:$0xff] %vm7113_vm9, %v2854_v32  ;;  %v5076_v3 = vpop.permute.xlu0 %5075  ;;  %v2891_v45 = vunpack.c.l.b16 %v7174_v56  ;;  %v2892_v33 = vunpack.c.h.b16 %v7174_v56 }
 0x438   :  { %v5078_v28 = vunpack.i.h.bf16 %v5076_v3  ;;  %v5077_v9 = vunpack.i.l.bf16 %v5076_v3  ;;  %3323 = vmatpush.bf16.msrb.mxu0 %v4938_v11 }
 0x439   :  { %v2965_v1 = vpack.c.b16 %v2891_v45, %v2889_v14  ;;  %v7183_v13 = vpack.c.b16 %v2893_v17, %v2891_v45  ;;  %v7189_v8 = vpack.c.b16 %v2894_v27, %v2892_v33 }
 0x43a   :  { %v2841_v42 = vmax.f32 %v7057_v24, %v5078_v28  ;;  %v2812_v26 = vsel %vm2030_vm4, %v5077_v9, %v5078_v28 }
 0x43b   :  { %v2840_v58 = vmax.f32 %v6920_v51, %v2812_v26  ;;  %3386 = vmatmul.bf16.vlgmr.msrb.gmra.mxu2 %v2965_v1  ;;  %v2924_v6 = vrot.slane %v7183_v13, 2  ;;  %v2927_v15 = vrot.slane %v7189_v8, 2 }
 0x43d   :  { %v2852_v40 = vpack.c.bf16 %v2841_v42, %v2840_v58  ;;  %v2925_v52 = vsel %vm1181_vm1, %v2923_v60, %v2924_v6  ;;  %v2928_v0 = vsel %vm1181_vm1, %v2926_v19, %v2927_v15  ;;  %v4946_v60 = vld [vmem:[%s7500_s3 + $0xb0] sm:$0xff]  ;;  %v4937_v58 = vld [vmem:[%s7500_s3 + $0x68] sm:$0xff] }
 0x43e   :  { %2937 = vrot.lane.b32.xlu1 %v2925_v52, %s5120_s25  ;;  %2939 = vrot.lane.b32.xlu2 %v2928_v0, %s5120_s25  ;;  %v2876_v25 = vld [vmem:[#allocation3 + $0x30] sm:$0xff]  ;;  %v4945_v19 = vld [vmem:[%s7500_s3 + $0xa8] sm:$0xff]  ;;  %v2966_v52 = vpack.c.b16 %v2892_v33, %v7164_v37  ;;  %v4944_v0 = vld [vmem:[%s7500_s3 + $0xa0] sm:$0xff] }
 0x43f   :  { %2863 = vst.msk [vmem:[#allocation3 + $0x20] sm:$0xff] %vm7113_vm9, %v2852_v40  ;;  %v5081_v51 = vpop.permute.xlu1 %5080  ;;  %v2899_v32 = vunpack.c.l.b16 %v2876_v25  ;;  %v7249_v34 = vunpack.c.h.b16 %v2876_v25  ;;  %3351 = vmatpush.bf16.msrb.mxu1 %v4946_v60  ;;  %3324 = vmatpush.bf16.msrb.mxu0 %v4937_v58  ;;  %v4934_v37 = vld [vmem:[%s7500_s3 + $0x50] sm:$0xff] }
 0x440   :  { %v5083_v24 = vunpack.i.h.bf16 %v5081_v51  ;;  %v5082_v57 = vunpack.i.l.bf16 %v5081_v51  ;;  %v4935_v51 = vld [vmem:[%s7500_s3 + $0x58] sm:$0xff]  ;;  %v4942_v33 = vld [vmem:[%s7500_s3 + $0x90] sm:$0xff] }
 0x441   :  { %v2907_v42 = vpack.c.b16 %v2899_v32, %v2899_v32 }
 0x442   :  { %v2843_v63 = vmax.f32 %v7070_v53, %v5083_v24  ;;  %v2813_v21 = vsel %vm2030_vm4, %v5082_v57, %v5083_v24  ;;  %v4943_v24 = vld [vmem:[%s7500_s3 + $0x98] sm:$0xff]  ;;  %v4933_v57 = vld [vmem:[%s7500_s3 + $0x48] sm:$0xff] }
 0x443   :  { %v2842_v18 = vmax.f32 %v6928_v31, %v2813_v21  ;;  %3307 = vmatmul.bf16.gmra.mxu3 %v7183_v13  ;;  %3352 = vmatpush.bf16.msrb.mxu1 %v4945_v19 }
 0x445   :  { %v2853_v55 = vpack.c.bf16 %v2843_v63, %v2842_v18  ;;  %v4941_v63 = vld [vmem:[%s7500_s3 + $0x88] sm:$0xff] }
 0x446   :  { %v5091_v22 = vpop.permute.xlu0 %5090  ;;  %v7212_v61 = vld [vmem:[#allocation3 + $0x20] sm:$0xff] }
 0x447   :  { %2864 = vst.msk [vmem:[#allocation3 + $0x28] sm:$0xff] %vm7113_vm9, %v2853_v55  ;;  %v5093_v53 = vunpack.i.h.bf16 %v5091_v22  ;;  %v5092_v31 = vunpack.i.l.bf16 %v5091_v22  ;;  %v2895_v36 = vunpack.c.l.b16 %v7212_v61  ;;  %v2896_v43 = vunpack.c.h.b16 %v7212_v61  ;;  %3353 = vmatpush.bf16.msrb.mxu1 %v4944_v0 }
 0x449   :  { %v2847_v10 = vmax.f32 %v7074_v62, %v5093_v53  ;;  %v2815_v38 = vsel %vm2030_vm4, %v5092_v31, %v5093_v53  ;;  %v2967_v23 = vpack.c.b16 %v2895_v36, %v2893_v17  ;;  %v2968_v56 = vpack.c.b16 %v2896_v43, %v2894_v27  ;;  %v4940_v27 = vld [vmem:[%s7500_s3 + $0x80] sm:$0xff] }
 0x44a   :  { %v2846_v30 = vmax.f32 %v7079_v44, %v2815_v38 }
 0x44b   :  { %3391 = vmatmul.bf16.gmra.mxu2 %v2967_v23  ;;  %3354 = vmatpush.bf16.msrb.mxu1 %v4943_v24 }
 0x44c   :  { %v2855_v39 = vpack.c.bf16 %v2847_v10, %v2846_v30 }
 0x44e   :  { %2869 = vst.msk [vmem:[#allocation3 + $0x38] sm:$0x11] %vm2868_vm12, %v2855_v39  ;;  %v7226_v62 = vld [vmem:[#allocation3 + $0x28] sm:$0xff] }
 0x44f   :  { %v2897_v20 = vunpack.c.l.b16 %v7226_v62  ;;  %v2898_v44 = vunpack.c.h.b16 %v7226_v62  ;;  %3355 = vmatpush.bf16.msrb.mxu1 %v4942_v33 }
 0x451   :  { %v2905_v49 = vpack.c.b16 %v2897_v20, %v2895_v36  ;;  %v7233_v14 = vpack.c.b16 %v2898_v44, %v2896_v43  ;;  %v2969_v4 = vpack.c.b16 %v2899_v32, %v2897_v20  ;;  %v2970_v21 = vpack.c.b16 %v7249_v34, %v2898_v44 }
 0x453   :  { %v2929_v35 = vrot.slane %v2905_v49, 2  ;;  %3312 = vmatmul.bf16.gmra.mxu3 %v2905_v49  ;;  %v2931_v46 = vrot.slane %v7233_v14, 2  ;;  %3356 = vmatpush.bf16.msrb.mxu1 %v4941_v63 }
 0x455   :  { %v2932_v50 = vsel %vm1181_vm1, %v2927_v15, %v2931_v46  ;;  %v2930_v2 = vsel %vm1181_vm1, %v2924_v6, %v2929_v35  ;;  %v2878_v12 = vld [vmem:[#allocation3 + $0x38] sm:$0x33]  ;;  %v4936_v15 = vld [vmem:[%s7500_s3 + $0x60] sm:$0xff] }
 0x456   :  { %2943 = vrot.lane.b32.xlu1 %v2932_v50, %s5120_s25  ;;  %2941 = vrot.lane.b32.xlu0 %v2930_v2, %s5120_s25  ;;  %v2917_v17 = vunpack.c.l.b16 %v2878_v12  ;;  %v2918_v16 = vunpack.c.h.b16 %v2878_v12  ;;  %v2879_v26 = vld [vmem:[#allocation3 + $0x38] sm:$0xff]  ;;  %v2908_v50 = vpack.c.b16 %v7249_v34, %v7249_v34 }
 0x457   :  { %v2963_v6 = vunpack.c.l.b16 %v2879_v26  ;;  %3325 = vmatpush.bf16.msrb.mxu0 %v4936_v15  ;;  %3357 = vmatpush.bf16.msrb.mxu1 %v4940_v27  ;;  %v2964_v18 = vunpack.c.h.b16 %v2879_v26  ;;  %v7354_v15 = vld [vmem:[%s7498_s5 + $0xd] ss:$0 sm:$0xff] }
 0x458   :  { %v2921_v3 = vpack.c.b16 %v2917_v17, %v2899_v32  ;;  %v2922_v45 = vpack.c.b16 %v2918_v16, %v7249_v34 }
 0x459   :  { %v2971_v40 = vpack.c.b16 %v2963_v6, %v2963_v6  ;;  %v2972_v59 = vpack.c.b16 %v2964_v18, %v2964_v18  ;;  %v7349_v6 = vld [vmem:[%s7498_s5 + $0xc] ss:$0 sm:$0xff] }
 0x45a   :  { %v2933_v28 = vrot.slane %v2921_v3, 2  ;;  %v2935_v9 = vrot.slane %v2922_v45, 2 }
 0x45b   :  { %3396 = vmatmul.bf16.gmra.mxu2 %v2969_v4  ;;  %3326 = vmatpush.bf16.msrb.mxu0 %v4935_v51 }
 0x45c   :  { %v2934_v1 = vsel %vm1181_vm1, %v2929_v35, %v2933_v28  ;;  %v2936_v13 = vsel %vm1181_vm1, %v2931_v46, %v2935_v9 }
 0x45d   :  { %2945 = vrot.lane.b32.xlu2 %v2934_v1, %s5120_s25 }
 0x45e   :  { %2947 = vrot.lane.b32.xlu0 %v2936_v13, %s5120_s25  ;;  %2949 = vrot.lane.b32.xlu1 %v2933_v28, %s5120_s25 }
 0x45f   :  { %3327 = vmatpush.bf16.msrb.mxu0 %v4934_v37 }
 0x463   :  { %3317 = vmatmul.bf16.gmra.mxu3 %v2907_v42  ;;  %3328 = vmatpush.bf16.msrb.mxu0 %v4933_v57 }
 0x465   :  { %2951 = vrot.lane.b32.xlu2 %v2935_v9, %s5120_s25 }
 0x467   :  { %3329 = vmatpush.bf16.msrb.mxu0 %v4932_v48 }
 0x46b   :  { %3401 = vmatmul.bf16.gmra.mxu2 %v2971_v40 }
 0x473   :  { %4670 = vmatmul.msk.bf16.vlgmr.msrb.gmra.mxu3 %vm2953_vm13, %v2966_v52 }
 0x483   :  { %4671 = vmatmul.msk.bf16.gmra.mxu3 %vm2953_vm13, %v2968_v56 }
 0x493   :  { %4672 = vmatmul.msk.bf16.gmra.mxu3 %vm2953_vm13, %v2970_v21 }
 0x498   :  { %v2940_v55 = vpop.permute.xlu2 %2939 }
 0x4a3   :  { %4673 = vmatmul.msk.bf16.gmra.mxu3 %vm2953_vm13, %v2972_v59 }
 0x4b0   :  { %v2938_v7 = vpop.permute.xlu1 %2937 }
 0x4b1   :  { %v2954_v22 = vsel %vm2953_vm13, %v2938_v7, %v2940_v55  ;;  %v2980_v61 = vsel %vm2953_vm13, %v7167_v29, %v2938_v7 }
 0x4b2   :  { %3330 = vmatmul.bf16.vlgmr.msrb.gmra.mxu0 %v2980_v61  ;;  %3358 = vmatmul.bf16.vlgmr.msrb.gmra.mxu1 %v2954_v22 }
 0x4b6   :  { %v3303_v53 = vpop.f32.mrf.mxu3 }
 0x4b7   :  { %v2946_v62 = vpop.permute.xlu2 %2945 }
 0x4b8   :  { %v2988_v49 = vsel %vm2953_vm13, %v7233_v14, %v2946_v62 }
 0x4be   :  { %v3305_v31 = vpop.f32.mrf.mxu3  ;;  %v3387_v36 = vpop.f32.mrf.mxu2 }
 0x4bf   :  { %v2952_v2 = vpop.permute.xlu2 %2951 }
 0x4c6   :  { %v7312_v10 = vpop.f32.mrf.mxu3  ;;  %v3389_v38 = vpop.f32.mrf.mxu2 }
 0x4c8   :  { %v2944_v23 = vpop.permute.xlu1 %2943  ;;  %v2942_v30 = vpop.permute.xlu0 %2941 }
 0x4c9   :  { %v2984_v47 = vsel %vm2953_vm13, %v7189_v8, %v2942_v30  ;;  %v2955_v39 = vsel %vm2953_vm13, %v2942_v30, %v2944_v23 }
 0x4ca   :  { %3335 = vmatmul.bf16.gmra.mxu0 %v2984_v47  ;;  %3363 = vmatmul.bf16.gmra.mxu1 %v2955_v39 }
 0x4ce   :  { %v7317_v54 = vpop.f32.mrf.mxu3  ;;  %v3392_v29 = vpop.f32.mrf.mxu2 }
 0x4d0   :  { %v2948_v43 = vpop.permute.xlu0 %2947  ;;  %v2950_v25 = vpop.permute.xlu1 %2949 }
 0x4d1   :  { %v2956_v35 = vsel %vm2953_vm13, %v2946_v62, %v2948_v43  ;;  %v2992_v12 = vsel %vm2953_vm13, %v2908_v50, %v2950_v25  ;;  %v2957_v14 = vsel %vm2953_vm13, %v2950_v25, %v2952_v2 }
 0x4d6   :  { %v7319_v20 = vpop.f32.mrf.mxu3  ;;  %v7321_v44 = vpop.f32.mrf.mxu2 }
 0x4da   :  { %3340 = vmatmul.bf16.gmra.mxu0 %v2988_v49  ;;  %3368 = vmatmul.bf16.gmra.mxu1 %v2956_v35 }
 0x4de   :  { %v7326_v8 = vpop.f32.mrf.mxu3  ;;  %v7328_v46 = vpop.f32.mrf.mxu2 }
 0x4e6   :  { %v7330_v41 = vpop.f32.mrf.mxu3  ;;  %v7332_v5 = vpop.f32.mrf.mxu2 }
 0x4ea   :  { %3345 = vmatmul.bf16.gmra.mxu0 %v2992_v12  ;;  %3373 = vmatmul.bf16.gmra.mxu1 %v2957_v14 }
 0x4ee   :  { %v3320_v11 = vpop.f32.mrf.mxu3  ;;  %v7338_v32 = vpop.f32.mrf.mxu2 }
 0x4f6   :  { %v3404_v17 = vpop.f32.mrf.mxu2  ;;  %v3415_v16 = vpop.f32.mrf.mxu3 }
 0x4fe   :  { %v3417_v3 = vpop.f32.mrf.mxu3 }
 0x506   :  { %v3420_v45 = vpop.f32.mrf.mxu3 }
 0x50e   :  { %v3422_v4 = vpop.f32.mrf.mxu3 }
 0x516   :  { %v7340_v28 = vpop.f32.mrf.mxu3 }
 0x51e   :  { %v7342_v9 = vpop.f32.mrf.mxu3 }
 0x526   :  { %v7344_v34 = vpop.f32.mrf.mxu3 }
 0x52e   :  { %v3432_v1 = vpop.f32.mrf.mxu3 }
 0x52f   :  { %v3331_v13 = vpop.f32.mrf.mxu0  ;;  %v3359_v42 = vpop.f32.mrf.mxu1 }
 0x530   :  { %v3332_v26 = vadd.f32 %v3331_v13, %v3303_v53 }
 0x532   :  { %v3360_v60 = vadd.f32 %v3359_v42, %v3332_v26 }
 0x534   :  { %v3388_v58 = vadd.f32 %v3387_v36, %v3360_v60 }
 0x536   :  { %v3416_v19 = vadd.f32 %v3415_v16, %v3388_v58 }
 0x537   :  { %v3333_v40 = vpop.f32.mrf.mxu0  ;;  %v3361_v51 = vpop.f32.mrf.mxu1 }
 0x538   :  { %v3437_v52 = vmul.f32 %v7349_v6, %v3416_v19  ;;  %v3334_v0 = vadd.f32 %v3333_v40, %v3305_v31 }
 0x53a   :  { %v3446_v24 = vadd.f32 %v7354_v15, %v3437_v52  ;;  %v3362_v37 = vadd.f32 %v3361_v51, %v3334_v0 }
 0x53c   :  { %v3453_v56 = vadd.f32 3.0, %v3446_v24  ;;  %v3390_v33 = vadd.f32 %v3389_v38, %v3362_v37 }
 0x53e   :  { %v3460_v57 = vmax.f32 %v3453_v56, 0.0  ;;  %v3418_v63 = vadd.f32 %v3417_v3, %v3390_v33 }
 0x540   :  { %v3438_v48 = vmul.f32 %v7349_v6, %v3418_v63  ;;  %v3467_v21 = vmin.f32 %v3460_v57, 6.0 }
 0x542   :  { %v3447_v27 = vadd.f32 %v7354_v15, %v3438_v48  ;;  %v3474_v55 = vmul.f32 %v3467_v21, %v3446_v24 }
 0x544   :  { %v3454_v18 = vadd.f32 3.0, %v3447_v27  ;;  %v3481_v23 = vmul.f32 0.16666667, %v3474_v55 }
 0x546   :  { %v3461_v59 = vmax.f32 %v3454_v18, 0.0  ;;  %v3509_v39 = vrot.slane %v3481_v23, 4 }
 0x547   :  { %v3336_v7 = vpop.f32.mrf.mxu0  ;;  %v3364_v22 = vpop.f32.mrf.mxu1 }
 0x548   :  { %v3337_v61 = vadd.f32 %v3336_v7, %v7312_v10  ;;  %v3468_v53 = vmin.f32 %v3461_v59, 6.0 }
 0x54a   :  { %v3365_v31 = vadd.f32 %v3364_v22, %v3337_v61  ;;  %v3475_v36 = vmul.f32 %v3468_v53, %v3447_v27 }
 0x54c   :  { %v3393_v30 = vadd.f32 %v3392_v29, %v3365_v31  ;;  %v3482_v38 = vmul.f32 0.16666667, %v3475_v36 }
 0x54e   :  { %v3421_v47 = vadd.f32 %v3420_v45, %v3393_v30  ;;  %v3510_v62 = vrot.slane %v3482_v38, 4 }
 0x54f   :  { %v3338_v43 = vpop.f32.mrf.mxu0  ;;  %v3366_v49 = vpop.f32.mrf.mxu1 }
 0x550   :  { %v3439_v35 = vmul.f32 %v7349_v6, %v3421_v47  ;;  %v3339_v25 = vadd.f32 %v3338_v43, %v7317_v54  ;;  %v3511_v50 = vsel %vm45_vm5, %v3509_v39, %v3510_v62 }
 0x551   :  { %v7364_v2 = vmax.f32 %v3481_v23, %v3511_v50 }
 0x552   :  { %v3448_v10 = vadd.f32 %v7354_v15, %v3439_v35  ;;  %v3367_v12 = vadd.f32 %v3366_v49, %v3339_v25 }
 0x554   :  { %v3455_v14 = vadd.f32 3.0, %v3448_v10  ;;  %v3395_v29 = vadd.f32 %v7321_v44, %v3367_v12 }
 0x556   :  { %v3462_v11 = vmax.f32 %v3455_v14, 0.0  ;;  %v3423_v17 = vadd.f32 %v3422_v4, %v3395_v29 }
 0x557   :  { %v3341_v16 = vpop.f32.mrf.mxu0  ;;  %v3369_v3 = vpop.f32.mrf.mxu1 }
 0x558   :  { %v3469_v45 = vmin.f32 %v3462_v11, 6.0  ;;  %v3440_v1 = vmul.f32 %v7349_v6, %v3423_v17  ;;  %v3342_v13 = vadd.f32 %v3341_v16, %v7319_v20 }
 0x55a   :  { %v3476_v54 = vmul.f32 %v3469_v45, %v3448_v10  ;;  %v3449_v42 = vadd.f32 %v7354_v15, %v3440_v1  ;;  %v3370_v26 = vadd.f32 %v3369_v3, %v3342_v13 }
 0x55c   :  { %v3483_v60 = vmul.f32 0.16666667, %v3476_v54  ;;  %v3456_v58 = vadd.f32 3.0, %v3449_v42  ;;  %v3398_v19 = vadd.f32 %v7328_v46, %v3370_v26 }
 0x55e   :  { %v3463_v40 = vmax.f32 %v3456_v58, 0.0  ;;  %v3426_v44 = vadd.f32 %v7340_v28, %v3398_v19  ;;  %v3512_v52 = vrot.slane %v3483_v60, 4  ;;  %v4983_v58 = vld [vmem:[%s7501_s4 + $0xb8] sm:$0xff]  ;;  %v5122_v19 = vmov 0.0  }
 0x55f   :  { %v3343_v4 = vpop.f32.mrf.mxu0  ;;  %v3371_v0 = vpop.f32.mrf.mxu1  ;;  %64 = vst [vmem:[#allocation5] sm:$0xff] %v5122_v19  ;;  %3863 = vmatpush.bf16.msra.mxu2 %v4983_v58 }
 0x560   :  { %v3441_v51 = vmul.f32 %v7349_v6, %v3426_v44  ;;  %v3344_v24 = vadd.f32 %v3343_v4, %v7326_v8  ;;  %v3513_v20 = vsel %vm45_vm5, %v3510_v62, %v3512_v52  ;;  %v3470_v37 = vmin.f32 %v3463_v40, 6.0  ;;  %65 = vst [vmem:[#allocation5 + $0x8] sm:$0xff] %v5122_v19  ;;  %v4967_v40 = vld [vmem:[%s7501_s4 + $0x38] sm:$0xff]  ;;  %v4966_v4 = vld [vmem:[%s7501_s4 + $0x30] sm:$0xff] }
 0x561   :  { %v7376_v56 = vmax.f32 %v3482_v38, %v3513_v20  ;;  %66 = vst [vmem:[#allocation5 + $0x10] sm:$0x3] %v5122_v19  ;;  %v4975_v44 = vld [vmem:[%s7501_s4 + $0x78] sm:$0xff]  ;;  %3835 = vmatpush.bf16.msra.mxu0 %v4967_v40  ;;  %v4965_v20 = vld [vmem:[%s7501_s4 + $0x28] sm:$0xff] }
 0x562   :  { %v3450_v33 = vadd.f32 %v7354_v15, %v3441_v51  ;;  %v3372_v57 = vadd.f32 %v3371_v0, %v3344_v24  ;;  %v3477_v63 = vmul.f32 %v3470_v37, %v3449_v42  ;;  %3849 = vmatpush.bf16.msra.mxu1 %v4975_v44  ;;  %v4974_v0 = vld [vmem:[%s7501_s4 + $0x70] sm:$0xff]  ;;  %v4981_v51 = vld [vmem:[%s7501_s4 + $0xa8] sm:$0xff] }
 0x563   :  { %v5094_v8 = vpack.i.bf16 %v7376_v56, %v7364_v2  ;;  %v4973_v37 = vld [vmem:[%s7501_s4 + $0x68] sm:$0xff] }
 0x564   :  { %v3457_v46 = vadd.f32 3.0, %v3450_v33  ;;  %v3400_v48 = vadd.f32 %v7332_v5, %v3372_v57  ;;  %v3484_v28 = vmul.f32 0.16666667, %v3477_v63  ;;  %v4964_v57 = vld [vmem:[%s7501_s4 + $0x20] sm:$0xff] }
 0x565   :  { %5095 = vrot.lane.b32.xlu0 %v5094_v8, %s5121_s2  ;;  %3836 = vmatpush.bf16.msra.mxu0 %v4966_v4  ;;  %v4972_v63 = vld [vmem:[%s7501_s4 + $0x60] sm:$0xff] }
 0x566   :  { %v3464_v27 = vmax.f32 %v3457_v46, 0.0  ;;  %v3428_v21 = vadd.f32 %v7342_v9, %v3400_v48  ;;  %v3514_v18 = vrot.slane %v3484_v28, 4  ;;  %3850 = vmatpush.bf16.msra.mxu1 %v4974_v0 }
 0x567   :  { %v3346_v59 = vpop.f32.mrf.mxu0  ;;  %v3374_v55 = vpop.f32.mrf.mxu1 }
 0x568   :  { %v3471_v7 = vmin.f32 %v3464_v27, 6.0  ;;  %v3442_v22 = vmul.f32 %v7349_v6, %v3428_v21  ;;  %v3347_v61 = vadd.f32 %v3346_v59, %v7330_v41  ;;  %v3515_v53 = vsel %vm45_vm5, %v3512_v52, %v3514_v18  ;;  %v4982_v52 = vld [vmem:[%s7501_s4 + $0xb0] sm:$0xff]  ;;  %v4979_v27 = vld [vmem:[%s7501_s4 + $0x98] sm:$0xff] }
 0x569   :  { %v3531_v5 = vmax.f32 %v3483_v60, %v3515_v53  ;;  %3864 = vmatpush.bf16.msra.mxu2 %v4982_v52  ;;  %3837 = vmatpush.bf16.msra.mxu0 %v4965_v20  ;;  %v4963_v53 = vld [vmem:[%s7501_s4 + $0x18] sm:$0xff]  ;;  %v5111_v20 = vld [vmem:[%s7498_s5 + $0x12] ss:$0 sm:$0xff] }
 0x56a   :  { %v3478_v31 = vmul.f32 %v3471_v7, %v3450_v33  ;;  %v3451_v9 = vadd.f32 %v7354_v15, %v3442_v22  ;;  %v3375_v36 = vadd.f32 %v3374_v55, %v3347_v61  ;;  %v4980_v33 = vld [vmem:[%s7501_s4 + $0xa0] sm:$0xff]  ;;  %3851 = vmatpush.bf16.msra.mxu1 %v4973_v37 }
 0x56c   :  { %v3485_v23 = vmul.f32 0.16666667, %v3478_v31  ;;  %v3458_v30 = vadd.f32 3.0, %v3451_v9  ;;  %v3403_v38 = vadd.f32 %v7338_v32, %v3375_v36  ;;  %v4970_v31 = vld [vmem:[%s7501_s4 + $0x50] sm:$0xff]  ;;  %v4961_v36 = vld [vmem:[%s7501_s4 + $0x8] sm:$0xff] }
 0x56d   :  { %3865 = vmatpush.bf16.msra.mxu2 %v4981_v51  ;;  %3838 = vmatpush.bf16.msra.mxu0 %v4964_v57  ;;  %v5112_v57 = vld [vmem:[%s7498_s5 + $0x13] ss:$0 sm:$0xff] }
 0x56e   :  { %v3465_v47 = vmax.f32 %v3458_v30, 0.0  ;;  %v3431_v39 = vadd.f32 %v7344_v34, %v3403_v38  ;;  %v3516_v62 = vrot.slane %v3485_v23, 4  ;;  %3852 = vmatpush.bf16.msra.mxu1 %v4972_v63  ;;  %v4976_v30 = vld [vmem:[%s7501_s4 + $0x80] sm:$0xff] }
 0x56f   :  { %v3348_v43 = vpop.f32.mrf.mxu0  ;;  %v3376_v41 = vpop.f32.mrf.mxu1  ;;  %v4960_v38 = vld [vmem:[%s7501_s4] sm:$0xff] }
 0x570   :  { %v3443_v49 = vmul.f32 %v7349_v6, %v3431_v39  ;;  %v3517_v35 = vsel %vm45_vm5, %v3514_v18, %v3516_v62  ;;  %v3472_v25 = vmin.f32 %v3465_v47, 6.0  ;;  %v4968_v47 = vld [vmem:[%s7501_s4 + $0x40] sm:$0xff] }
 0x571   :  { %v3532_v50 = vmax.f32 %v3484_v28, %v3517_v35  ;;  %3866 = vmatpush.bf16.msra.mxu2 %v4980_v33  ;;  %3839 = vmatpush.bf16.msra.mxu0 %v4963_v53 }
 0x572   :  { %v3452_v10 = vadd.f32 %v7354_v15, %v3443_v49  ;;  %v3479_v12 = vmul.f32 %v3472_v25, %v3451_v9  ;;  %v4977_v9 = vld [vmem:[%s7501_s4 + $0x88] sm:$0xff] }
 0x573   :  { %v5104_v32 = vpack.i.bf16 %v3532_v50, %v3531_v5  ;;  %v4962_v5 = vld [vmem:[%s7501_s4 + $0x10] sm:$0xff] }
 0x574   :  { %v3459_v14 = vadd.f32 3.0, %v3452_v10  ;;  %v3486_v29 = vmul.f32 0.16666667, %v3479_v12 }
 0x575   :  { %5105 = vrot.lane.b32.xlu2 %v5104_v32, %s5121_s2  ;;  %3867 = vmatpush.bf16.msra.mxu2 %v4979_v27 }
 0x576   :  { %v3466_v11 = vmax.f32 %v3459_v14, 0.0  ;;  %v3518_v17 = vrot.slane %v3486_v29, 4  ;;  %3840 = vmatpush.bf16.msra.mxu0 %v4962_v5 }
 0x578   :  { %v3473_v16 = vmin.f32 %v3466_v11, 6.0  ;;  %v3519_v34 = vsel %vm45_vm5, %v3516_v62, %v3518_v17 }
 0x579   :  { %v7395_v3 = vmax.f32 %v3485_v23, %v3519_v34  ;;  %v4969_v23 = vld [vmem:[%s7501_s4 + $0x48] sm:$0xff] }
 0x57a   :  { %v3480_v6 = vmul.f32 %v3473_v16, %v3452_v10  ;;  %3841 = vmatpush.bf16.msra.mxu0 %v4961_v36 }
 0x57c   :  { %v3487_v45 = vmul.f32 0.16666667, %v3480_v6 }
 0x57e   :  { %v3520_v1 = vrot.slane %v3487_v45, 4  ;;  %3842 = vmatpush.bf16.msra.mxu0 %v4960_v38 }
 0x580   :  { %v3535_v13 = vmax.f32 %v3487_v45, %v3520_v1  ;;  %v3521_v54 = vsel %vm45_vm5, %v3518_v17, %v3520_v1 }
 0x581   :  { %v7398_v15 = vmax.f32 %v3486_v29, %v3521_v54 }
 0x582   :  { %v3542_v42 = vpack.c.bf16 %v3535_v13, %v3535_v13 }
 0x583   :  { %v5099_v60 = vpack.i.bf16 %v7398_v15, %v7395_v3 }
 0x584   :  { %v3549_v26 = vunpack.c.l.bf16 %v3542_v42 }
 0x585   :  { %5100 = vrot.lane.b32.xlu1 %v5099_v60, %s5121_s2 }
 0x586   :  { %3569 = vrot.lane.b32.xlu0 %v3549_v26, %s5121_s2 }
 0x5cf   :  { %v5106_v24 = vpop.permute.xlu2 %5105 }
 0x5d7   :  { %v5096_v46 = vpop.permute.xlu0 %5095 }
 0x5d8   :  { %v5098_v48 = vunpack.i.h.bf16 %v5096_v46  ;;  %v5097_v28 = vunpack.i.l.bf16 %v5096_v46 }
 0x5da   :  { %v3579_v21 = vmax.f32 %v7376_v56, %v5098_v48  ;;  %v3578_v18 = vmax.f32 %v7364_v2, %v5097_v28  ;;  %v4971_v2 = vld [vmem:[%s7501_s4 + $0x58] sm:$0xff]  ;;  %v4978_v56 = vld [vmem:[%s7501_s4 + $0x90] sm:$0xff] }
 0x5db   :  { %3853 = vmatpush.bf16.msra.mxu1 %v4971_v2  ;;  %3868 = vmatpush.bf16.msra.mxu2 %v4978_v56 }
 0x5dc   :  { %v3586_v59 = vpack.c.bf16 %v3579_v21, %v3579_v21  ;;  %v3585_v55 = vpack.c.bf16 %v3578_v18, %v3578_v18 }
 0x5de   :  { %3594 = vst.msk [vmem:[#allocation4 + $0x4] sm:$0xf] %vm3592_vm14, %v3586_v59 }
 0x5df   :  { %3593 = vst.msk [vmem:[#allocation4] sm:$0xf] %vm3592_vm14, %v3585_v55  ;;  %3854 = vmatpush.bf16.msra.mxu1 %v4970_v31  ;;  %3869 = vmatpush.bf16.msra.mxu2 %v4977_v9 }
 0x5e3   :  { %3855 = vmatpush.bf16.msra.mxu1 %v4969_v23  ;;  %3870 = vmatpush.bf16.msra.mxu2 %v4976_v30 }
 0x5e5   :  { %v3604_v8 = vld [vmem:[#allocation4 + $0x4] sm:$0x1] }
 0x5e6   :  { %v3605_v7 = vunpack.c.l.bf16 %v3604_v8  ;;  %v3601_v22 = vld [vmem:[#allocation4] sm:$0x1] }
 0x5e7   :  { %v3602_v61 = vunpack.c.l.bf16 %v3601_v22  ;;  %3856 = vmatpush.bf16.msra.mxu1 %v4968_v47 }
 0x5e8   :  { %3606 = vst [vmem:[#allocation5 + $0x3] sm:$0x1] %v3605_v7 }
 0x5e9   :  { %3603 = vst [vmem:[#allocation5 + $0x2] sm:$0x1] %v3602_v61 }
 0x5f0   :  { %v3613_v11 = vld [vmem:[#allocation5] sm:$0xff] }
 0x5f1   :  { %v3617_v17 = vld [vmem:[#allocation5 + $0x1] sm:$0xff]  ;;  %v3615_v16 = vpack.c.bf16 %v3613_v11, %v3613_v11 }
 0x5f2   :  { %v3621_v32 = vld [vmem:[#allocation5 + $0x2] sm:$0xff]  ;;  %v3619_v34 = vpack.c.bf16 %v3617_v17, %v3617_v17 }
 0x5f3   :  { %v3623_v6 = vpack.c.bf16 %v3621_v32, %v3621_v32  ;;  %v3627_v42 = vunpack.c.l.b16 %v3615_v16 }
 0x5f4   :  { %v3633_v26 = vunpack.c.l.b16 %v3619_v34 }
 0x5f5   :  { %v3639_v19 = vunpack.c.l.b16 %v3623_v6 }
 0x5f7   :  { %v5101_v62 = vpop.permute.xlu1 %5100 }
 0x5f8   :  { %v3570_v39 = vpop.permute.xlu0 %3569  ;;  %v5103_v43 = vunpack.i.h.bf16 %v5101_v62  ;;  %v5102_v41 = vunpack.i.l.bf16 %v5101_v62 }
 0x5fa   :  { %v3583_v49 = vmax.f32 %v7398_v15, %v5103_v43  ;;  %v3582_v35 = vmax.f32 %v7395_v3, %v5102_v41 }
 0x5fc   :  { %v3590_v25 = vpack.c.bf16 %v3583_v49, %v3583_v49  ;;  %v3589_v50 = vpack.c.bf16 %v3582_v35, %v3582_v35 }
 0x5fe   :  { %3598 = vst.msk [vmem:[#allocation4 + $0x14] sm:$0xf] %vm3592_vm14, %v3590_v25 }
 0x5ff   :  { %3597 = vst.msk [vmem:[#allocation4 + $0x10] sm:$0xf] %vm3592_vm14, %v3589_v50 }
 0x605   :  { %v3610_v10 = vld [vmem:[#allocation4 + $0x14] sm:$0x1] }
 0x606   :  { %v3611_v12 = vunpack.c.l.bf16 %v3610_v10  ;;  %v3607_v14 = vld [vmem:[#allocation4 + $0x10] sm:$0x1] }
 0x607   :  { %v3608_v29 = vunpack.c.l.bf16 %v3607_v14 }
 0x608   :  { %3612 = vst [vmem:[#allocation5 + $0xb] sm:$0x1] %v3611_v12 }
 0x609   :  { %3609 = vst [vmem:[#allocation5 + $0xa] sm:$0x1] %v3608_v29 }
 0x610   :  { %v3614_v45 = vld [vmem:[#allocation5 + $0x8] sm:$0xff] }
 0x611   :  { %v3618_v3 = vld [vmem:[#allocation5 + $0x9] sm:$0xff]  ;;  %v3616_v13 = vpack.c.bf16 %v3614_v45, %v3614_v45 }
 0x612   :  { %v3622_v1 = vld [vmem:[#allocation5 + $0xa] sm:$0xff]  ;;  %v3620_v54 = vpack.c.bf16 %v3618_v3, %v3618_v3 }
 0x613   :  { %v3624_v15 = vpack.c.bf16 %v3622_v1, %v3622_v1  ;;  %v3628_v60 = vunpack.c.l.b16 %v3616_v13 }
 0x614   :  { %v3634_v58 = vunpack.c.l.b16 %v3620_v54 }
 0x615   :  { %v3640_v40 = vunpack.c.l.b16 %v3624_v15  ;;  %v3629_v44 = vpack.c.b16 %v3628_v60, %v3627_v42 }
 0x616   :  { %v3635_v52 = vpack.c.b16 %v3634_v58, %v3633_v26 }
 0x617   :  { %v3641_v4 = vpack.c.b16 %v3640_v40, %v3639_v19  ;;  %3843 = vmatmul.bf16.vlgmr.msra.gmra.mxu0 %v3629_v44 }
 0x618   :  { %3857 = vmatmul.bf16.vlgmr.msra.gmra.mxu1 %v3635_v52 }
 0x619   :  { %3871 = vmatmul.bf16.vlgmr.msra.gmra.mxu2 %v3641_v4 }
 0x694   :  { %v3844_v0 = vpop.f32.mrf.mxu0 }
 0x695   :  { %v3858_v51 = vpop.f32.mrf.mxu1 }
 0x696   :  { %v3859_v24 = vadd.f32 %v3858_v51, %v3844_v0 }
 0x69c   :  { %v3872_v37 = vpop.f32.mrf.mxu2  ;;  %v3846_v46 = vpop.f32.mrf.mxu0 }
 0x69d   :  { %v3873_v33 = vadd.f32 %v3872_v37, %v3859_v24  ;;  %v3860_v48 = vpop.f32.mrf.mxu1 }
 0x69e   :  { %v3861_v21 = vadd.f32 %v3860_v48, %v3846_v46 }
 0x69f   :  { %v3880_v63 = vmul.f32 %v5111_v20, %v3873_v33 }
 0x6a1   :  { %v3884_v28 = vadd.f32 %v5112_v57, %v3880_v63 }
 0x6a3   :  { %v3886_v27 = vadd.f32 3.0, %v3884_v28 }
 0x6a4   :  { %v3874_v18 = vpop.f32.mrf.mxu2 }
 0x6a5   :  { %v3888_v59 = vmax.f32 %v3886_v27, 0.0  ;;  %v3875_v55 = vadd.f32 %v3874_v18, %v3861_v21 }
 0x6a7   :  { %v3890_v8 = vmin.f32 %v3888_v59, 6.0  ;;  %v3881_v7 = vmul.f32 %v5111_v20, %v3875_v55 }
 0x6a9   :  { %v3892_v22 = vmul.f32 %v3890_v8, %v3884_v28  ;;  %v3885_v61 = vadd.f32 %v5112_v57, %v3881_v7 }
 0x6ab   :  { %v3894_v53 = vmul.f32 0.16666667, %v3892_v22  ;;  %v3887_v2 = vadd.f32 3.0, %v3885_v61 }
 0x6ad   :  { %3896 = vst [vmem:[%s7502_s6] sm:$0xff] %v3894_v53  ;;  %v3889_v56 = vmax.f32 %v3887_v2, 0.0 }
 0x6af   :  { %v3891_v5 = vmin.f32 %v3889_v56, 6.0 }
 0x6b1   :  { %v3893_v31 = vmul.f32 %v3891_v5, %v3885_v61 }
 0x6b3   :  { %v3895_v9 = vmul.f32 0.16666667, %v3893_v31 }
 0x6b5   :  { %3897 = vst [vmem:[%s7502_s6 + $0x8] sm:$0xff] %v3895_v9 }

</bundles_post_ra>
